<compile_context>
chip_gen: v6e
topology: v6e:2x2x1
jax: 0.10.0
libtpu: 0.0.40
codegen_flags: <defaults>
</compile_context>

<pallas_src>
import functools
import math

import jax
import jax.numpy as jnp
from jax.experimental import pallas as pl
from jax.experimental.pallas import tpu as pltpu

# ---- model hyper-parameters (small demo sizes, consistent with the module) ----
NUM_CLASSES = 29
NUM_HEADS = 4
NUM_LAYERS = 2
EMBED_SIZE = 32                        # module default is 512; small for the demo
NUM_ATTN_FEATURES = 2 * EMBED_SIZE     # 64
POSE_DIM = 106
POSE_PAD = 128                         # lane-dense pose slab (zeros beyond POSE_DIM)
SEQ_LEN = 8                            # sequence_length (module default 16)
CLS_PAD = 128                          # lane-dense classifier output slab


# -----------------------------------------------------------------------------
# Kernel 1: feature extractor stand-in.
# TODO(synk): the original FeatureExtractor is a pretrained ResNet34 backbone and is
# not defined in the reference source; a global-avg-pool + linear stand-in with the
# same (N, C, H, W) -> (N, embed_size) contract is used instead.
# -----------------------------------------------------------------------------
def _feat_kernel(x_ref, w_ref, b_ref, o_ref):
    # x_ref: (tile_n, C, HW)   w_ref: (C, E) already scaled by 1/(H*W)   b_ref: (1, E)
    s = jnp.sum(x_ref[...], axis=-1)                     # ONE lane (XLU) reduction -> (tile_n, C)
    acc = jnp.broadcast_to(b_ref[...], o_ref.shape)
    for c in range(s.shape[-1]):                         # degenerate K=C contraction on the VPU
        acc = acc + s[:, c:c + 1] * w_ref[c:c + 1, :]
    o_ref[...] = acc


def feature_extractor(frames, w_feat, b_feat):
    n, c, hw = frames.shape
    tile_n = min(n, 256)                                 # bounded tile (fits scoped VMEM on all gens)
    w_scaled = w_feat * (1.0 / hw)                       # fold the mean's 1/(H*W) into the weight
    return pl.pallas_call(
        _feat_kernel,
        out_shape=jax.ShapeDtypeStruct((n, EMBED_SIZE), jnp.float32),
        grid=(pl.cdiv(n, tile_n),),
        in_specs=[pl.BlockSpec((tile_n, c, hw), lambda i: (i, 0, 0)),
                  pl.BlockSpec((c, EMBED_SIZE), lambda i: (0, 0)),
                  pl.BlockSpec((1, EMBED_SIZE), lambda i: (0, 0))],
        out_specs=pl.BlockSpec((tile_n, EMBED_SIZE), lambda i: (i, 0)),
        compiler_params=pltpu.CompilerParams(dimension_semantics=("parallel",)),
    )(frames, w_scaled, b_feat)


# -----------------------------------------------------------------------------
# Kernel 2 (fused): MMTensorNorm(-1) + bottle_mm + ReLU + NUM_LAYERS self-attention
# layers + temporal mean + classifier.  grid = (batch "parallel", layer "arbitrary");
# the per-batch activation x stays resident in a VMEM scratch across the layer axis.
# TODO(synk): the exact SelfAttention decoder from the VTN repo is not defined in the
# reference source; a standard multi-head self-attention block with residual + LayerNorm
# is implemented instead.
# -----------------------------------------------------------------------------
def _fused_kernel(z_ref, pose_ref, wbz_ref, wbp_ref, bb_ref,
                  wqkv_ref, bqkv_ref, wo_ref, bseq_ref, wc_ref, bc_ref,
                  o_ref, x_scr, *, d_pose, din):
    layer = pl.program_id(1)
    d = NUM_ATTN_FEATURES
    h = NUM_HEADS
    hd = d // h
    n_pad = pose_ref.shape[-1] - d_pose                  # zero lanes padded onto pose

    # ---- layer 0 only: MMTensorNorm(dim=-1) + bottle_mm + ReLU into the scratch ----
    @pl.when(layer == 0)
    def _():
        z = z_ref[0]                                     # (T, 2E)
        p = pose_ref[0]                                  # (T, POSE_PAD), lanes >= d_pose are zero
        mean = (jnp.sum(z, axis=-1, keepdims=True)
                + jnp.sum(p, axis=-1, keepdims=True)) * (1.0 / din)
        zc = z - mean
        pc = p - mean                                    # pad lanes become -mean (corrected below,
                                                         # and killed by the zero weight rows)
        # unbiased (torch.std default) variance over the `din` logical features; the pad
        # lanes' spurious (-mean)^2 contribution is subtracted exactly -> no iota/where mask.
        var = (jnp.sum(zc * zc, axis=-1, keepdims=True)
               + jnp.sum(pc * pc, axis=-1, keepdims=True)
               - n_pad * mean * mean) * (1.0 / (din - 1))
        # TODO(synk): the PyTorch reference has no epsilon; a constant row gives inf/NaN
        # there too, so none is added here either.
        inv = jax.lax.rsqrt(var)                         # EUP rsqrt; (x - mean) / std
        xb = (jnp.dot(zc * inv, wbz_ref[...], preferred_element_type=jnp.float32)
              + jnp.dot(pc * inv, wbp_ref[...], preferred_element_type=jnp.float32)
              + bb_ref[...])
        x_scr[...] = jnp.maximum(xb, 0.0)                # bottle_mm + ReLU -> (T, D)

    # ---- one self-attention layer (this layer's weights streamed by the BlockSpecs) ----
    x = x_scr[...]                                       # (T, D)
    bvec = bseq_ref[0]                                   # (8, D): rows bo, gamma, beta, 0...
    bo, gamma, beta = bvec[0:1, :], bvec[1:2, :], bvec[2:3, :]

    # single lane-dense QKV projection; 1/sqrt(hd) already folded into the Q columns
    qkv = jnp.dot(x, wqkv_ref[0], preferred_element_type=jnp.float32) + bqkv_ref[0]  # (T, 3D)
    q, k, v = qkv[:, 0:d], qkv[:, d:2 * d], qkv[:, 2 * d:3 * d]

    ctx = []
    for i in range(h):                                   # per-head (T, T) scores, static slices
        sl = slice(i * hd, (i + 1) * hd)
        s = jax.lax.dot_general(q[:, sl], k[:, sl], (((1,), (1,)), ((), ())),
                                preferred_element_type=jnp.float32)      # (T, T)
        s = s - jnp.max(s, axis=-1, keepdims=True)
        pattn = jnp.exp(s)
        pattn = pattn * pl.reciprocal(jnp.sum(pattn, axis=-1, keepdims=True), approx=True)
        ctx.append(jnp.dot(pattn, v[:, sl], preferred_element_type=jnp.float32))      # (T, hd)
    ctx = jnp.concatenate(ctx, axis=-1)                  # concat-heads -> (T, D)

    proj = jnp.dot(ctx, wo_ref[0], preferred_element_type=jnp.float32) + bo           # (T, D)
    y = x + proj                                         # residual
    mu = jnp.mean(y, axis=-1, keepdims=True)
    var_l = jnp.mean((y - mu) * (y - mu), axis=-1, keepdims=True)
    x_new = (y - mu) * jax.lax.rsqrt(var_l + 1e-5) * gamma + beta                      # LayerNorm
    x_scr[...] = x_new

    # ---- last layer only: temporal mean FIRST (exact: linear + dropout=0), then one
    # lane-dense (1, D) x (D, 128) dot.  Broadcast over 8 sublanes only for aligned stores.
    @pl.when(layer == pl.num_programs(1) - 1)
    def _():
        xm = jnp.mean(x_new, axis=0, keepdims=True)                                    # (1, D)
        logits = jnp.dot(xm, wc_ref[...], preferred_element_type=jnp.float32) + bc_ref[...]
        o_ref[0] = jnp.broadcast_to(logits, (8, CLS_PAD))


def fused_pipeline(z, pose_pad, pk, *, batch, seq, d_pose, din):
    d = NUM_ATTN_FEATURES
    d_z = z.shape[-1]
    p_pad = pose_pad.shape[-1]
    kernel = functools.partial(_fused_kernel, d_pose=d_pose, din=din)
    return pl.pallas_call(
        kernel,
        out_shape=jax.ShapeDtypeStruct((batch, 8, CLS_PAD), jnp.float32),
        grid_spec=pltpu.PrefetchScalarGridSpec(
            num_scalar_prefetch=0,
            grid=(batch, NUM_LAYERS),
            in_specs=[
                pl.BlockSpec((1, seq, d_z), lambda b, l: (b, 0, 0)),      # z (per batch)
                pl.BlockSpec((1, seq, p_pad), lambda b, l: (b, 0, 0)),    # pose (per batch)
                pl.BlockSpec((d_z, d), lambda b, l: (0, 0)),              # bottle (z rows)
                pl.BlockSpec((p_pad, d), lambda b, l: (0, 0)),            # bottle (pose rows)
                pl.BlockSpec((1, d), lambda b, l: (0, 0)),                # bottle bias
                pl.BlockSpec((1, d, 3 * d), lambda b, l: (l, 0, 0)),      # per-layer QKV weights
                pl.BlockSpec((1, 1, 3 * d), lambda b, l: (l, 0, 0)),      # per-layer QKV bias
                pl.BlockSpec((1, d, d), lambda b, l: (l, 0, 0)),          # per-layer out proj
                pl.BlockSpec((1, 8, d), lambda b, l: (l, 0, 0)),          # per-layer bo/gamma/beta
                pl.BlockSpec((d, CLS_PAD), lambda b, l: (0, 0)),          # classifier W
                pl.BlockSpec((1, CLS_PAD), lambda b, l: (0, 0)),          # classifier b
            ],
            out_specs=pl.BlockSpec((1, 8, CLS_PAD), lambda b, l: (b, 0, 0)),
            scratch_shapes=[pltpu.VMEM((seq, d), jnp.float32)]),          # resident activation x
        compiler_params=pltpu.CompilerParams(
            dimension_semantics=("parallel", "arbitrary")),
    )(z, pose_pad, pk["w_bottle_z"], pk["w_bottle_p"], pk["b_bottle"],
      pk["w_qkv"], pk["b_qkv"], pk["w_out"], pk["b_seq"], pk["w_cls"], pk["b_cls"])


# -----------------------------------------------------------------------------
# Parameter init (deterministic, synthetic) and one-time packing for the fused kernel.
# -----------------------------------------------------------------------------
def init_params(key):
    d = NUM_ATTN_FEATURES
    din = POSE_DIM + d
    keys = iter(jax.random.split(key, 6 + 8 * NUM_LAYERS))

    def nrm(k, shape, scale=0.05):
        return scale * jax.random.normal(k, shape, dtype=jnp.float32)

    params = {
        "w_feat": nrm(next(keys), (3, EMBED_SIZE)),
        "b_feat": nrm(next(keys), (1, EMBED_SIZE)),
        "w_bottle": nrm(next(keys), (din, d)),
        "b_bottle": nrm(next(keys), (1, d)),
        "w_cls": nrm(next(keys), (d, NUM_CLASSES)),
        "b_cls": nrm(next(keys), (1, NUM_CLASSES)),
        "layers": [],
    }
    for _ in range(NUM_LAYERS):
        params["layers"].append({
            "wq": nrm(next(keys), (d, d)), "wk": nrm(next(keys), (d, d)),
            "wv": nrm(next(keys), (d, d)), "wo": nrm(next(keys), (d, d)),
            "bq": nrm(next(keys), (1, d)), "bk": nrm(next(keys), (1, d)),
            "bv": nrm(next(keys), (1, d)), "bo": nrm(next(keys), (1, d)),
            "gamma": jnp.ones((1, d), jnp.float32),
            "beta": jnp.zeros((1, d), jnp.float32),
        })
    return params


def pack_params(params):
    """Repack weights OUTSIDE the kernel: one (D, 3D) QKV matrix per layer (1/sqrt(hd)
    folded into the Q columns), (D, D) output projection, split + lane-padded bottle
    matrix, lane-dense classifier, and one (8, D) bias/gamma/beta tile per layer."""
    d = NUM_ATTN_FEATURES
    hd = d // NUM_HEADS
    scale = 1.0 / math.sqrt(hd)
    d_z = params["w_bottle"].shape[0] - POSE_DIM

    w_bottle_z = params["w_bottle"][:d_z]
    w_bottle_p = jnp.zeros((POSE_PAD, d), jnp.float32).at[:POSE_DIM].set(
        params["w_bottle"][d_z:])
    w_cls = jnp.zeros((d, CLS_PAD), jnp.float32).at[:, :NUM_CLASSES].set(params["w_cls"])
    b_cls = jnp.zeros((1, CLS_PAD), jnp.float32).at[:, :NUM_CLASSES].set(params["b_cls"])

    w_qkv, b_qkv, w_out, b_seq = [], [], [], []
    for lyr in params["layers"]:
        w_qkv.append(jnp.concatenate([lyr["wq"] * scale, lyr["wk"], lyr["wv"]], axis=1))
        b_qkv.append(jnp.concatenate([lyr["bq"] * scale, lyr["bk"], lyr["bv"]], axis=1))
        w_out.append(lyr["wo"])
        b_seq.append(jnp.concatenate(
            [lyr["bo"], lyr["gamma"], lyr["beta"], jnp.zeros((5, d), jnp.float32)], axis=0))

    return {
        "w_bottle_z": w_bottle_z, "w_bottle_p": w_bottle_p, "b_bottle": params["b_bottle"],
        "w_qkv": jnp.stack(w_qkv), "b_qkv": jnp.stack(b_qkv),
        "w_out": jnp.stack(w_out), "b_seq": jnp.stack(b_seq),
        "w_cls": w_cls, "b_cls": b_cls,
    }


# -----------------------------------------------------------------------------
# Full forward.
# -----------------------------------------------------------------------------
def vtnhcpf_forward(rgb_clip, pose_clip, params):
    b, t, x, c, h, w = rgb_clip.shape
    # rgb_clip.view(b, t*x, c, h, w) -> feature extractor -> z.view(b, t, -1)
    frames = rgb_clip.reshape(b * t * x, c, h * w).astype(jnp.float32)
    z = feature_extractor(frames, params["w_feat"], params["b_feat"])      # (b*t*x, E)
    z = z.reshape(b, t, x * EMBED_SIZE)                                    # (b, t, 2E)

    pose = pose_clip.astype(jnp.float32)
    d_pose = pose.shape[-1]
    pose_pad = jnp.pad(pose, ((0, 0), (0, 0), (0, POSE_PAD - d_pose)))     # lane-dense pose
    din = z.shape[-1] + d_pose                                             # 170 logical features

    packed = pack_params(params)
    out = fused_pipeline(z, pose_pad, packed, batch=b, seq=t,
                         d_pose=d_pose, din=din)                           # (b, 8, 128)
    return out[:, 0, :NUM_CLASSES]                                         # classifier + mean(1)


if __name__ == "__main__":
    key = jax.random.PRNGKey(0)
    k_rgb, k_pose, k_par = jax.random.split(key, 3)

    B, T, X, C, H, W = 2, SEQ_LEN, 2, 3, 16, 16
    rgb_clip = jax.random.normal(k_rgb, (B, T, X, C, H, W), dtype=jnp.float32)
    pose_clip = jax.random.normal(k_pose, (B, T, POSE_DIM), dtype=jnp.float32)
    params = init_params(k_par)

    y = jax.block_until_ready(vtnhcpf_forward(rgb_clip, pose_clip, params))
    assert y.shape == (B, NUM_CLASSES) and y.dtype == jnp.float32
    print("KERNEL_OK")
</pallas_src>

<mosaic_0001>
module attributes {stable_mosaic.version = 11 : i64} {
  func.func @_feat_kernel(%arg0: i32, %arg1: memref<32x3x256xf32, #tpu.memory_space<vmem>>, %arg2: memref<3x32xf32, #tpu.memory_space<vmem>>, %arg3: memref<1x32xf32, #tpu.memory_space<vmem>>, %arg4: memref<32x32xf32, #tpu.memory_space<vmem>>) attributes {dimension_semantics = [#tpu.dimension_semantics<parallel>], iteration_bounds = array<i64: 1>, scalar_prefetch = 0 : i64, scratch_operands = 0 : i64, tpu.core_type = #tpu.core_type<tc>, window_params = [{transform_indices = @transform_0, window_bounds = array<i64: 32, 3, 256>}, {pipeline_mode = #tpu.pipeline_mode<synchronous>, transform_indices = @transform_1, window_bounds = array<i64: 3, 32>}, {pipeline_mode = #tpu.pipeline_mode<synchronous>, transform_indices = @transform_2, window_bounds = array<i64: 1, 32>}, {transform_indices = @transform_3, window_bounds = array<i64: 32, 32>}]} {
    %c0 = arith.constant 0 : index
    %c0_0 = arith.constant 0 : index
    %c0_1 = arith.constant 0 : index
    %0 = vector.load %arg1[%c0, %c0_0, %c0_1] : memref<32x3x256xf32, #tpu.memory_space<vmem>>, vector<32x3x256xf32>
    %cst = arith.constant dense<0.000000e+00> : vector<32x3xf32>
    %1 = vector.multi_reduction <add>, %0, %cst [2] : vector<32x3x256xf32> to vector<32x3xf32>
    %c0_2 = arith.constant 0 : index
    %c0_3 = arith.constant 0 : index
    %2 = vector.load %arg3[%c0_2, %c0_3] : memref<1x32xf32, #tpu.memory_space<vmem>>, vector<1x32xf32>
    %3 = vector.shape_cast %2 : vector<1x32xf32> to vector<1x32xf32>
    %4 = vector.broadcast %3 : vector<1x32xf32> to vector<32x32xf32>
    %5 = vector.extract_strided_slice %1 {offsets = [0, 0], sizes = [32, 1], strides = [1, 1]} : vector<32x3xf32> to vector<32x1xf32>
    %c0_4 = arith.constant 0 : index
    %c0_5 = arith.constant 0 : index
    %6 = vector.load %arg2[%c0_4, %c0_5] : memref<3x32xf32, #tpu.memory_space<vmem>>, vector<1x32xf32>
    %7 = vector.broadcast %5 : vector<32x1xf32> to vector<32x32xf32>
    %8 = vector.broadcast %6 : vector<1x32xf32> to vector<32x32xf32>
    %9 = arith.mulf %7, %8 : vector<32x32xf32>
    %10 = arith.addf %4, %9 : vector<32x32xf32>
    %11 = vector.extract_strided_slice %1 {offsets = [0, 1], sizes = [32, 1], strides = [1, 1]} : vector<32x3xf32> to vector<32x1xf32>
    %c1 = arith.constant 1 : index
    %c0_6 = arith.constant 0 : index
    %12 = vector.load %arg2[%c1, %c0_6] : memref<3x32xf32, #tpu.memory_space<vmem>>, vector<1x32xf32>
    %13 = vector.broadcast %11 : vector<32x1xf32> to vector<32x32xf32>
    %14 = vector.broadcast %12 : vector<1x32xf32> to vector<32x32xf32>
    %15 = arith.mulf %13, %14 : vector<32x32xf32>
    %16 = arith.addf %10, %15 : vector<32x32xf32>
    %17 = vector.extract_strided_slice %1 {offsets = [0, 2], sizes = [32, 1], strides = [1, 1]} : vector<32x3xf32> to vector<32x1xf32>
    %c2 = arith.constant 2 : index
    %c0_7 = arith.constant 0 : index
    %18 = vector.load %arg2[%c2, %c0_7] : memref<3x32xf32, #tpu.memory_space<vmem>>, vector<1x32xf32>
    %19 = vector.broadcast %17 : vector<32x1xf32> to vector<32x32xf32>
    %20 = vector.broadcast %18 : vector<1x32xf32> to vector<32x32xf32>
    %21 = arith.mulf %19, %20 : vector<32x32xf32>
    %22 = arith.addf %16, %21 : vector<32x32xf32>
    %c0_8 = arith.constant 0 : index
    %c0_9 = arith.constant 0 : index
    %23 = vector.load %arg4[%c0_8, %c0_9] : memref<32x32xf32, #tpu.memory_space<vmem>>, vector<32x32xf32>
    tpu.vector_store %arg4[%c0_8, %c0_9], %22 {strides = array<i32>} : memref<32x32xf32, #tpu.memory_space<vmem>>, vector<32x32xf32>,
    return
  }
  func.func @transform_0(%arg0: i32) -> (i32, i32, i32) {
    %c0_i32 = arith.constant 0 : i32
    %c0_i32_0 = arith.constant 0 : i32
    %c0_i32_1 = arith.constant 0 : i32
    return %arg0, %c0_i32, %c0_i32_0 : i32, i32, i32
  }
  func.func @transform_1(%arg0: i32) -> (i32, i32) {
    %c0_i32 = arith.constant 0 : i32
    %c0_i32_0 = arith.constant 0 : i32
    %c0_i32_1 = arith.constant 0 : i32
    return %c0_i32, %c0_i32_0 : i32, i32
  }
  func.func @transform_2(%arg0: i32) -> (i32, i32) {
    %c0_i32 = arith.constant 0 : i32
    %c0_i32_0 = arith.constant 0 : i32
    %c0_i32_1 = arith.constant 0 : i32
    return %c0_i32, %c0_i32_0 : i32, i32
  }
  func.func @transform_3(%arg0: i32) -> (i32, i32) {
    %c0_i32 = arith.constant 0 : i32
    %c0_i32_0 = arith.constant 0 : i32
    return %arg0, %c0_i32 : i32, i32
  }
}

</mosaic_0001>

<bundles_post_ra>
// kernel: tpu_custom_call.1
= control target key start
LH: loop header
LB: loop body
LE: loop exit
PB: predicated region body
PF: predicated region fallthrough
CT: control target
= control target key end

     0   :  { %vm143_vm0 = vcmask 1042432   ;;  %s7547_s0 = inlined_call_operand.vmem [shape: f32[32,3,256], index: 0, kind: input, shape index: {}]   ;;  %s7548_s1 = inlined_call_operand.vmem [shape: f32[3,32], index: 1, kind: input, shape index: {}]   ;;  %s7549_s2 = inlined_call_operand.vmem [shape: f32[1,32], index: 2, kind: input, shape index: {}]   ;;  %s7550_s3 = inlined_call_operand.hbm [shape: f32[32,32], index: 3, kind: output, shape index: {}]  }
   0x1   :  { %v17_v0 = vld [vmem:[%s7547_s0 + $0x10] sm:$0x77]  ;;  %v15_v1 = vld [vmem:[%s7547_s0] sm:$0x77]  ;;  %v18_v6 = vld [vmem:[%s7547_s0 + $0x18] sm:$0x77] }
   0x2   :  { %v81_v2 = vcombine.high %v17_v0, %v17_v0  ;;  %v154_v3 = vsel %vm143_vm0, %v17_v0, 0.0  ;;  %v79_v4 = vcombine.high %v15_v1, %v15_v1  ;;  %v144_v5 = vsel %vm143_vm0, %v15_v1, 0.0  ;;  %v16_v7 = vld [vmem:[%s7547_s0 + $0x8] sm:$0x77]  ;;  %v19_v12 = vld [vmem:[%s7547_s0 + $0x20] sm:$0x77] }
   0x3   :  { %v82_v8 = vcombine.high %v18_v6, %v18_v6  ;;  %v159_v9 = vsel %vm143_vm0, %v18_v6, 0.0  ;;  %v80_v10 = vcombine.high %v16_v7, %v16_v7  ;;  %v20_v11 = vld [vmem:[%s7547_s0 + $0x28] sm:$0x77]  ;;  %v149_v15 = vsel %vm143_vm0, %v16_v7, 0.0  ;;  %v22_v21 = vld [vmem:[%s7547_s0 + $0x38] sm:$0x77] }
   0x4   :  { %v155_v13 = vsel %vm143_vm0, %v81_v2, 0.0  ;;  %v145_v14 = vsel %vm143_vm0, %v79_v4, 0.0  ;;  %v84_v16 = vcombine.high %v20_v11, %v20_v11  ;;  %v21_v22 = vld [vmem:[%s7547_s0 + $0x30] sm:$0x77]  ;;  %v83_v23 = vcombine.high %v19_v12, %v19_v12  ;;  %v24_v32 = vld [vmem:[%s7547_s0 + $0x48] sm:$0x77] }
   0x5   :  { %v156_v17 = vadd.f32 %v155_v13, %v154_v3  ;;  %v146_v18 = vadd.f32 %v145_v14, %v144_v5  ;;  %v160_v19 = vsel %vm143_vm0, %v82_v8, 0.0  ;;  %v150_v20 = vsel %vm143_vm0, %v80_v10, 0.0  ;;  %v23_v33 = vld [vmem:[%s7547_s0 + $0x40] sm:$0x77]  ;;  %v26_v42 = vld [vmem:[%s7547_s0 + $0x58] sm:$0x77] }
   0x6   :  { %v161_v24 = vadd.f32 %v160_v19, %v159_v9  ;;  %v151_v25 = vadd.f32 %v150_v20, %v149_v15  ;;  %v169_v26 = vsel %vm143_vm0, %v20_v11, 0.0  ;;  %v170_v27 = vsel %vm143_vm0, %v84_v16, 0.0  ;;  %v25_v43 = vld [vmem:[%s7547_s0 + $0x50] sm:$0x77]  ;;  %v28_v52 = vld [vmem:[%s7547_s0 + $0x68] sm:$0x77] }
   0x7   :  { %157 = vadd.xlane.f32.xlu1 %v156_v17  ;;  %147 = vadd.xlane.f32.xlu0 %v146_v18  ;;  %v164_v28 = vsel %vm143_vm0, %v19_v12, 0.0  ;;  %v165_v29 = vsel %vm143_vm0, %v83_v23, 0.0  ;;  %v86_v30 = vcombine.high %v22_v21, %v22_v21  ;;  %v85_v31 = vcombine.high %v21_v22, %v21_v22  ;;  %v27_v53 = vld [vmem:[%s7547_s0 + $0x60] sm:$0x77] }
   0x8   :  { %v171_v34 = vadd.f32 %v170_v27, %v169_v26  ;;  %v166_v35 = vadd.f32 %v165_v29, %v164_v28  ;;  %v179_v36 = vsel %vm143_vm0, %v22_v21, 0.0  ;;  %v88_v37 = vcombine.high %v24_v32, %v24_v32 }
   0x9   :  { %v180_v38 = vsel %vm143_vm0, %v86_v30, 0.0  ;;  %v174_v39 = vsel %vm143_vm0, %v21_v22, 0.0  ;;  %v175_v40 = vsel %vm143_vm0, %v85_v31, 0.0  ;;  %v87_v41 = vcombine.high %v23_v33, %v23_v33 }
   0xa   :  { %v181_v44 = vadd.f32 %v180_v38, %v179_v36  ;;  %v176_v45 = vadd.f32 %v175_v40, %v174_v39  ;;  %v189_v46 = vsel %vm143_vm0, %v24_v32, 0.0  ;;  %v190_v47 = vsel %vm143_vm0, %v88_v37, 0.0 }
   0xb   :  { %162 = vadd.xlane.f32.xlu1 %v161_v24  ;;  %152 = vadd.xlane.f32.xlu0 %v151_v25  ;;  %v184_v48 = vsel %vm143_vm0, %v23_v33, 0.0  ;;  %v185_v49 = vsel %vm143_vm0, %v87_v41, 0.0  ;;  %v90_v50 = vcombine.high %v26_v42, %v26_v42  ;;  %v89_v51 = vcombine.high %v25_v43, %v25_v43 }
   0xc   :  { %v191_v54 = vadd.f32 %v190_v47, %v189_v46  ;;  %v186_v55 = vadd.f32 %v185_v49, %v184_v48  ;;  %v199_v56 = vsel %vm143_vm0, %v26_v42, 0.0  ;;  %v194_v57 = vsel %vm143_vm0, %v25_v43, 0.0 }
   0xf   :  { %172 = vadd.xlane.f32.xlu1 %v171_v34  ;;  %167 = vadd.xlane.f32.xlu0 %v166_v35 }
  0x13   :  { %182 = vadd.xlane.f32.xlu1 %v181_v44  ;;  %177 = vadd.xlane.f32.xlu0 %v176_v45 }
  0x14   :  { %8 = vsyncpa [#allocation3], 0  ;;  %v200_v58 = vsel %vm143_vm0, %v90_v50, 0.0  ;;  %v195_v59 = vsel %vm143_vm0, %v89_v51, 0.0  ;;  %v92_v60 = vcombine.high %v28_v52, %v28_v52  ;;  %v91_v61 = vcombine.high %v27_v53, %v27_v53  ;;  %v30_v62 = vld [vmem:[%s7547_s0 + $0x78] sm:$0x77] }
  0x15   :  { %v29_v63 = vld [vmem:[%s7547_s0 + $0x70] sm:$0x77]  ;;  %v201_v0 = vadd.f32 %v200_v58, %v199_v56  ;;  %v196_v1 = vadd.f32 %v195_v59, %v194_v57  ;;  %v209_v2 = vsel %vm143_vm0, %v28_v52, 0.0  ;;  %v94_v3 = vcombine.high %v30_v62, %v30_v62  ;;  %v32_v8 = vld [vmem:[%s7547_s0 + $0x88] sm:$0x77] }
  0x16   :  { %v210_v4 = vsel %vm143_vm0, %v92_v60, 0.0  ;;  %v204_v5 = vsel %vm143_vm0, %v27_v53, 0.0  ;;  %v205_v6 = vsel %vm143_vm0, %v91_v61, 0.0  ;;  %v93_v7 = vcombine.high %v29_v63, %v29_v63  ;;  %v31_v9 = vld [vmem:[%s7547_s0 + $0x80] sm:$0x77] }
  0x17   :  { %192 = vadd.xlane.f32.xlu1 %v191_v54  ;;  %187 = vadd.xlane.f32.xlu0 %v186_v55  ;;  %v211_v10 = vadd.f32 %v210_v4, %v209_v2  ;;  %v206_v11 = vadd.f32 %v205_v6, %v204_v5  ;;  %v219_v12 = vsel %vm143_vm0, %v30_v62, 0.0  ;;  %v220_v13 = vsel %vm143_vm0, %v94_v3, 0.0  ;;  %v34_v18 = vld [vmem:[%s7547_s0 + $0x98] sm:$0x77]  ;;  %v33_v19 = vld [vmem:[%s7547_s0 + $0x90] sm:$0x77] }
  0x18   :  { %v214_v14 = vsel %vm143_vm0, %v29_v63, 0.0  ;;  %v215_v15 = vsel %vm143_vm0, %v93_v7, 0.0  ;;  %v96_v16 = vcombine.high %v32_v8, %v32_v8  ;;  %v95_v17 = vcombine.high %v31_v9, %v31_v9  ;;  %v36_v28 = vld [vmem:[%s7547_s0 + $0xa8] sm:$0x77]  ;;  %v35_v29 = vld [vmem:[%s7547_s0 + $0xa0] sm:$0x77] }
  0x19   :  { %v221_v20 = vadd.f32 %v220_v13, %v219_v12  ;;  %v216_v21 = vadd.f32 %v215_v15, %v214_v14  ;;  %v229_v22 = vsel %vm143_vm0, %v32_v8, 0.0  ;;  %v98_v23 = vcombine.high %v34_v18, %v34_v18  ;;  %v38_v38 = vld [vmem:[%s7547_s0 + $0xb8] sm:$0x77]  ;;  %v37_v39 = vld [vmem:[%s7547_s0 + $0xb0] sm:$0x77] }
  0x1a   :  { %v230_v24 = vsel %vm143_vm0, %v96_v16, 0.0  ;;  %v224_v25 = vsel %vm143_vm0, %v31_v9, 0.0  ;;  %v225_v26 = vsel %vm143_vm0, %v95_v17, 0.0  ;;  %v97_v27 = vcombine.high %v33_v19, %v33_v19  ;;  %v40_v48 = vld [vmem:[%s7547_s0 + $0xc8] sm:$0x77] }
  0x1b   :  { %202 = vadd.xlane.f32.xlu1 %v201_v0  ;;  %197 = vadd.xlane.f32.xlu0 %v196_v1  ;;  %v231_v30 = vadd.f32 %v230_v24, %v229_v22  ;;  %v226_v31 = vadd.f32 %v225_v26, %v224_v25  ;;  %v239_v32 = vsel %vm143_vm0, %v34_v18, 0.0  ;;  %v240_v33 = vsel %vm143_vm0, %v98_v23, 0.0  ;;  %v39_v49 = vld [vmem:[%s7547_s0 + $0xc0] sm:$0x77]  ;;  %v42_v58 = vld [vmem:[%s7547_s0 + $0xd8] sm:$0x77] }
  0x1c   :  { %v234_v34 = vsel %vm143_vm0, %v33_v19, 0.0  ;;  %v235_v35 = vsel %vm143_vm0, %v97_v27, 0.0  ;;  %v100_v36 = vcombine.high %v36_v28, %v36_v28  ;;  %v99_v37 = vcombine.high %v35_v29, %v35_v29  ;;  %v41_v59 = vld [vmem:[%s7547_s0 + $0xd0] sm:$0x77]  ;;  %v44_v4 = vld [vmem:[%s7547_s0 + $0xe8] sm:$0x77] }
  0x1d   :  { %v241_v40 = vadd.f32 %v240_v33, %v239_v32  ;;  %v236_v41 = vadd.f32 %v235_v35, %v234_v34  ;;  %v249_v42 = vsel %vm143_vm0, %v36_v28, 0.0  ;;  %v244_v43 = vsel %vm143_vm0, %v35_v29, 0.0  ;;  %v43_v5 = vld [vmem:[%s7547_s0 + $0xe0] sm:$0x77]  ;;  %v46_v14 = vld [vmem:[%s7547_s0 + $0xf8] sm:$0x77] }
  0x1e   :  { %v250_v44 = vsel %vm143_vm0, %v100_v36, 0.0  ;;  %v245_v45 = vsel %vm143_vm0, %v99_v37, 0.0  ;;  %v102_v46 = vcombine.high %v38_v38, %v38_v38  ;;  %v101_v47 = vcombine.high %v37_v39, %v37_v39  ;;  %v45_v15 = vld [vmem:[%s7547_s0 + $0xf0] sm:$0x77]  ;;  %v4659_v33 = vld [vmem:[%s7548_s1] ss:$0 sm:$0xff] }
  0x1f   :  { %212 = vadd.xlane.f32.xlu1 %v211_v10  ;;  %207 = vadd.xlane.f32.xlu0 %v206_v11  ;;  %v251_v50 = vadd.f32 %v250_v44, %v249_v42  ;;  %v246_v51 = vadd.f32 %v245_v45, %v244_v43  ;;  %v259_v52 = vsel %vm143_vm0, %v38_v38, 0.0  ;;  %v104_v53 = vcombine.high %v40_v48, %v40_v48 }
  0x20   :  { %v260_v54 = vsel %vm143_vm0, %v102_v46, 0.0  ;;  %v254_v55 = vsel %vm143_vm0, %v37_v39, 0.0  ;;  %v255_v56 = vsel %vm143_vm0, %v101_v47, 0.0  ;;  %v103_v57 = vcombine.high %v39_v49, %v39_v49 }
  0x21   :  { %v261_v60 = vadd.f32 %v260_v54, %v259_v52  ;;  %v256_v61 = vadd.f32 %v255_v56, %v254_v55  ;;  %v269_v62 = vsel %vm143_vm0, %v40_v48, 0.0  ;;  %v270_v63 = vsel %vm143_vm0, %v104_v53, 0.0 }
  0x22   :  { %v264_v0 = vsel %vm143_vm0, %v39_v49, 0.0  ;;  %v265_v1 = vsel %vm143_vm0, %v103_v57, 0.0  ;;  %v106_v2 = vcombine.high %v42_v58, %v42_v58  ;;  %v105_v3 = vcombine.high %v41_v59, %v41_v59 }
  0x23   :  { %222 = vadd.xlane.f32.xlu1 %v221_v20  ;;  %217 = vadd.xlane.f32.xlu0 %v216_v21  ;;  %v271_v6 = vadd.f32 %v270_v63, %v269_v62  ;;  %v266_v7 = vadd.f32 %v265_v1, %v264_v0  ;;  %v279_v8 = vsel %vm143_vm0, %v42_v58, 0.0  ;;  %v108_v9 = vcombine.high %v44_v4, %v44_v4 }
  0x24   :  { %v280_v10 = vsel %vm143_vm0, %v106_v2, 0.0  ;;  %v274_v11 = vsel %vm143_vm0, %v41_v59, 0.0  ;;  %v275_v12 = vsel %vm143_vm0, %v105_v3, 0.0  ;;  %v107_v13 = vcombine.high %v43_v5, %v43_v5 }
  0x25   :  { %v281_v16 = vadd.f32 %v280_v10, %v279_v8  ;;  %v276_v17 = vadd.f32 %v275_v12, %v274_v11  ;;  %v289_v18 = vsel %vm143_vm0, %v44_v4, 0.0  ;;  %v290_v19 = vsel %vm143_vm0, %v108_v9, 0.0 }
  0x26   :  { %v284_v20 = vsel %vm143_vm0, %v43_v5, 0.0  ;;  %v285_v21 = vsel %vm143_vm0, %v107_v13, 0.0  ;;  %v110_v22 = vcombine.high %v46_v14, %v46_v14  ;;  %v109_v23 = vcombine.high %v45_v15, %v45_v15 }
  0x27   :  { %232 = vadd.xlane.f32.xlu1 %v231_v30  ;;  %227 = vadd.xlane.f32.xlu0 %v226_v31  ;;  %v291_v24 = vadd.f32 %v290_v19, %v289_v18  ;;  %v286_v25 = vadd.f32 %v285_v21, %v284_v20  ;;  %v299_v26 = vsel %vm143_vm0, %v46_v14, 0.0  ;;  %v294_v28 = vsel %vm143_vm0, %v45_v15, 0.0 }
  0x28   :  { %v300_v27 = vsel %vm143_vm0, %v110_v22, 0.0  ;;  %v295_v29 = vsel %vm143_vm0, %v109_v23, 0.0  ;;  %v312_v32 = vlaneseq  ;;  %v4723_v35 = vmov 0  }
  0x29   :  { %v301_v30 = vadd.f32 %v300_v27, %v299_v26  ;;  %v296_v31 = vadd.f32 %v295_v29, %v294_v28  ;;  %4667 = vset.pattern.permute.xlu1 %v4723_v35  ;;  %4666 = vset.pattern.permute.xlu0 %v4723_v35  ;;  %vm1115_vm1 = vcmask 130112   ;;  %vm1122_vm2 = vcmask 195712  }
  0x2a   :  { %v4910_v34 = vshrl.u32 %v312_v32, 7  ;;  %v1105_v36 = vand.u32 127, %v312_v32  ;;  %vm1129_vm3 = vcmask 261312   ;;  %vm1720_vm4 = vcmask 1041409  }
  0x2b   :  { %242 = vadd.xlane.f32.xlu1 %v241_v40  ;;  %237 = vadd.xlane.f32.xlu0 %v236_v41  ;;  %vm1722_vm5 = vcmask 1042434   ;;  %vm1724_vm6 = vcmask 1043459   ;;  %vm1726_vm7 = vcmask 1044484   ;;  %vm1728_vm8 = vcmask 1045509  }
  0x2c   :  { %v4913_v37 = vsub.s32 %v1105_v36, %v4910_v34  ;;  %v1110_v38 = vadd.s32 4294967288, %v1105_v36  ;;  %v1117_v39 = vadd.s32 4294967280, %v1105_v36  ;;  %v1124_v40 = vadd.s32 4294967272, %v1105_v36 }
  0x2d   :  { %v4989_v12 = vsub.s32 0, %v4910_v34  ;;  %vm1730_vm9 = vcmask 1046534   ;;  %vm1732_vm10 = vcmask 1047559   ;;  %vm4637_vm11 = vcmask 261120  }
  0x2e   :  { %v4916_v41 = vsub.s32 %v1110_v38, %v4910_v34  ;;  %v4919_v42 = vsub.s32 %v1117_v39, %v4910_v34  ;;  %v4922_v43 = vsub.s32 %v1124_v40, %v4910_v34 }
  0x2f   :  { %252 = vadd.xlane.f32.xlu1 %v251_v50  ;;  %247 = vadd.xlane.f32.xlu0 %v246_v51 }
  0x33   :  { %262 = vadd.xlane.f32.xlu1 %v261_v60  ;;  %257 = vadd.xlane.f32.xlu0 %v256_v61 }
  0x37   :  { %272 = vadd.xlane.f32.xlu1 %v271_v6  ;;  %267 = vadd.xlane.f32.xlu0 %v266_v7 }
  0x3b   :  { %282 = vadd.xlane.f32.xlu1 %v281_v16  ;;  %277 = vadd.xlane.f32.xlu0 %v276_v17 }
  0x3f   :  { %292 = vadd.xlane.f32.xlu1 %v291_v24  ;;  %287 = vadd.xlane.f32.xlu0 %v286_v25 }
  0x43   :  { %302 = vadd.xlane.f32.xlu1 %v301_v30  ;;  %297 = vadd.xlane.f32.xlu0 %v296_v31 }
  0x54   :  { %450 = vbcast.lane.b32.xlu1 %v4659_v33, 264 }
  0x58   :  { %454 = vbcast.lane.b32.xlu1 %v4659_v33, 272 }
  0x59   :  { %446 = vbcast.lane.b32.xlu0 %v4659_v33, 256 }
  0x5c   :  { %458 = vbcast.lane.b32.xlu1 %v4659_v33, 280 }
  0x90   :  { %v4924_v44 = vpop.xlane.xlu1 %157  ;;  %v4926_v45 = vpop.xlane.xlu0 %147 }
  0x91   :  { %v315_v13 = vrot.slane %v4926_v45, %v4989_v12  ;;  %v323_v26 = vrot.slane %v4924_v44, %v4989_v12 }
  0x94   :  { %v4928_v46 = vpop.xlane.xlu1 %162  ;;  %v4930_v47 = vpop.xlane.xlu0 %152 }
  0x95   :  { %v319_v20 = vrot.slane %v4930_v47, %v4989_v12  ;;  %v327_v31 = vrot.slane %v4928_v46, %v4989_v12 }
  0x98   :  { %v4932_v48 = vpop.xlane.xlu1 %172  ;;  %v4934_v49 = vpop.xlane.xlu0 %167 }
  0x99   :  { %v331_v38 = vrot.slane %v4934_v49, %v4989_v12 }
  0x9c   :  { %v4936_v50 = vpop.xlane.xlu1 %182  ;;  %v4938_v51 = vpop.xlane.xlu0 %177 }
  0xa0   :  { %v4940_v52 = vpop.xlane.xlu1 %192  ;;  %v4942_v53 = vpop.xlane.xlu0 %187 }
  0xa4   :  { %v4944_v54 = vpop.xlane.xlu1 %202  ;;  %v4946_v55 = vpop.xlane.xlu0 %197 }
  0xa8   :  { %v4948_v56 = vpop.xlane.xlu1 %212  ;;  %v4950_v57 = vpop.xlane.xlu0 %207 }
  0xac   :  { %v4952_v58 = vpop.xlane.xlu1 %222  ;;  %v4954_v59 = vpop.xlane.xlu0 %217 }
  0xb0   :  { %v4956_v60 = vpop.xlane.xlu1 %232  ;;  %v4958_v61 = vpop.xlane.xlu0 %227 }
  0xb4   :  { %v4960_v62 = vpop.xlane.xlu1 %242  ;;  %v4962_v63 = vpop.xlane.xlu0 %237 }
  0xb8   :  { %v4964_v0 = vpop.xlane.xlu1 %252  ;;  %v4966_v1 = vpop.xlane.xlu0 %247 }
  0xbc   :  { %v4968_v2 = vpop.xlane.xlu1 %262  ;;  %v4970_v3 = vpop.xlane.xlu0 %257 }
  0xbd   :  { %7561 = vst [vmem:[#allocation5_spill] sm:$0xff] %v4968_v2  ;;  %7562 = vst [vmem:[#allocation6_spill] sm:$0xff] %v4970_v3 }
  0xc0   :  { %v4972_v4 = vpop.xlane.xlu1 %272  ;;  %v4974_v5 = vpop.xlane.xlu0 %267 }
  0xc4   :  { %v4976_v6 = vpop.xlane.xlu1 %282  ;;  %v4978_v7 = vpop.xlane.xlu0 %277 }
  0xc5   :  { %7563 = vst [vmem:[#allocation7_spill] sm:$0xff] %v4976_v6  ;;  %7564 = vst [vmem:[#allocation8_spill] sm:$0xff] %v4978_v7 }
  0xc8   :  { %v4980_v8 = vpop.xlane.xlu1 %292  ;;  %v4982_v9 = vpop.xlane.xlu0 %287 }
  0xc9   :  { %7565 = vst [vmem:[#allocation9_spill] sm:$0xff] %v4980_v8  ;;  %7566 = vst [vmem:[#allocation10_spill] sm:$0xff] %v4982_v9 }
  0xcc   :  { %v4984_v10 = vpop.xlane.xlu1 %302  ;;  %v4986_v11 = vpop.xlane.xlu0 %297 }
  0xcd   :  { %7567 = vst [vmem:[#allocation11_spill] sm:$0xff] %v4984_v10  ;;  %7568 = vst [vmem:[#allocation12_spill] sm:$0xff] %v4986_v11 }
  0xd0   :  { %v4993_v14 = vpop.permute.xlu1 %450  ;;  %v4995_v15 = vpop.permute.xlu0 %446 }
  0xd1   :  { %v465_v16 = vmul.f32 %v4993_v14, %v315_v13  ;;  %v464_v17 = vmul.f32 %v4995_v15, %v315_v13  ;;  %v468_v22 = vmul.f32 %v4995_v15, %v319_v20  ;;  %v469_v25 = vmul.f32 %v4993_v14, %v319_v20 }
  0xd2   :  { %v472_v27 = vmul.f32 %v4995_v15, %v323_v26  ;;  %v473_v30 = vmul.f32 %v4993_v14, %v323_v26  ;;  %v476_v32 = vmul.f32 %v4995_v15, %v327_v31  ;;  %v477_v36 = vmul.f32 %v4993_v14, %v327_v31 }
  0xd3   :  { %724 = vperm.xlu1 %4667, %v465_v16   ;;  %721 = vperm.xlu0 %4666, %v464_v17   ;;  %v480_v39 = vmul.f32 %v4995_v15, %v331_v38  ;;  %v481_v16 = vmul.f32 %v4993_v14, %v331_v38  ;;  %v335_v17 = vrot.slane %v4932_v48, %v4989_v12 }
  0xd4   :  { %v4999_v18 = vpop.permute.xlu1 %454 }
  0xd5   :  { %v466_v19 = vmul.f32 %v4999_v18, %v315_v13  ;;  %v470_v24 = vmul.f32 %v4999_v18, %v319_v20  ;;  %v474_v29 = vmul.f32 %v4999_v18, %v323_v26  ;;  %v478_v35 = vmul.f32 %v4999_v18, %v327_v31 }
  0xd7   :  { %727 = vperm.xlu1 %4667, %v466_v19   ;;  %v484_v19 = vmul.f32 %v4995_v15, %v335_v17 }
  0xd8   :  { %v5004_v21 = vpop.permute.xlu1 %458 }
  0xd9   :  { %v467_v23 = vmul.f32 %v5004_v21, %v315_v13  ;;  %v471_v28 = vmul.f32 %v5004_v21, %v319_v20  ;;  %v475_v33 = vmul.f32 %v5004_v21, %v323_v26  ;;  %v479_v40 = vmul.f32 %v5004_v21, %v327_v31 }
  0xda   :  { %v482_v13 = vmul.f32 %v4999_v18, %v331_v38  ;;  %v483_v20 = vmul.f32 %v5004_v21, %v331_v38  ;;  %v487_v26 = vmul.f32 %v5004_v21, %v335_v17 }
  0xdb   :  { %733 = vperm.xlu1 %4667, %v468_v22   ;;  %730 = vperm.xlu0 %4666, %v467_v23   ;;  %v486_v22 = vmul.f32 %v4999_v18, %v335_v17  ;;  %v485_v23 = vmul.f32 %v4993_v14, %v335_v17 }
  0xdf   :  { %739 = vperm.xlu1 %4667, %v470_v24   ;;  %736 = vperm.xlu0 %4666, %v469_v25   ;;  %v339_v24 = vrot.slane %v4938_v51, %v4989_v12 }
  0xe1   :  { %v488_v25 = vmul.f32 %v4995_v15, %v339_v24  ;;  %v491_v31 = vmul.f32 %v5004_v21, %v339_v24 }
  0xe3   :  { %745 = vperm.xlu1 %4667, %v472_v27   ;;  %742 = vperm.xlu0 %4666, %v471_v28   ;;  %v490_v27 = vmul.f32 %v4999_v18, %v339_v24  ;;  %v489_v28 = vmul.f32 %v4993_v14, %v339_v24 }
  0xe7   :  { %751 = vperm.xlu1 %4667, %v474_v29   ;;  %748 = vperm.xlu0 %4666, %v473_v30   ;;  %v343_v29 = vrot.slane %v4936_v50, %v4989_v12 }
  0xe9   :  { %v492_v30 = vmul.f32 %v4995_v15, %v343_v29  ;;  %v495_v38 = vmul.f32 %v5004_v21, %v343_v29 }
  0xeb   :  { %757 = vperm.xlu1 %4667, %v476_v32   ;;  %754 = vperm.xlu0 %4666, %v475_v33   ;;  %v494_v32 = vmul.f32 %v4999_v18, %v343_v29  ;;  %v493_v33 = vmul.f32 %v4993_v14, %v343_v29 }
  0xef   :  { %763 = vperm.xlu1 %4667, %v478_v35   ;;  %760 = vperm.xlu0 %4666, %v477_v36   ;;  %v347_v35 = vrot.slane %v4942_v53, %v4989_v12 }
  0xf1   :  { %v496_v36 = vmul.f32 %v4995_v15, %v347_v35  ;;  %v499_v17 = vmul.f32 %v5004_v21, %v347_v35 }
  0xf3   :  { %769 = vperm.xlu1 %4667, %v480_v39   ;;  %766 = vperm.xlu0 %4666, %v479_v40   ;;  %v498_v39 = vmul.f32 %v4999_v18, %v347_v35  ;;  %v497_v40 = vmul.f32 %v4993_v14, %v347_v35 }
  0xf7   :  { %775 = vperm.xlu1 %4667, %v482_v13   ;;  %772 = vperm.xlu0 %4666, %v481_v16   ;;  %v351_v13 = vrot.slane %v4940_v52, %v4989_v12 }
  0xf9   :  { %v500_v16 = vmul.f32 %v4995_v15, %v351_v13  ;;  %v503_v24 = vmul.f32 %v5004_v21, %v351_v13 }
  0xfb   :  { %781 = vperm.xlu1 %4667, %v484_v19   ;;  %778 = vperm.xlu0 %4666, %v483_v20   ;;  %v502_v19 = vmul.f32 %v4999_v18, %v351_v13  ;;  %v501_v20 = vmul.f32 %v4993_v14, %v351_v13 }
  0xff   :  { %787 = vperm.xlu1 %4667, %v486_v22   ;;  %784 = vperm.xlu0 %4666, %v485_v23   ;;  %v355_v22 = vrot.slane %v4946_v55, %v4989_v12 }
 0x101   :  { %v504_v23 = vmul.f32 %v4995_v15, %v355_v22  ;;  %v507_v29 = vmul.f32 %v5004_v21, %v355_v22 }
 0x103   :  { %793 = vperm.xlu1 %4667, %v488_v25   ;;  %790 = vperm.xlu0 %4666, %v487_v26   ;;  %v506_v25 = vmul.f32 %v4999_v18, %v355_v22  ;;  %v505_v26 = vmul.f32 %v4993_v14, %v355_v22 }
 0x107   :  { %799 = vperm.xlu1 %4667, %v490_v27   ;;  %796 = vperm.xlu0 %4666, %v489_v28   ;;  %v359_v27 = vrot.slane %v4944_v54, %v4989_v12 }
 0x109   :  { %v508_v28 = vmul.f32 %v4995_v15, %v359_v27  ;;  %v511_v35 = vmul.f32 %v5004_v21, %v359_v27 }
 0x10b   :  { %805 = vperm.xlu1 %4667, %v492_v30   ;;  %802 = vperm.xlu0 %4666, %v491_v31   ;;  %v510_v30 = vmul.f32 %v4999_v18, %v359_v27  ;;  %v509_v31 = vmul.f32 %v4993_v14, %v359_v27 }
 0x10f   :  { %811 = vperm.xlu1 %4667, %v494_v32   ;;  %808 = vperm.xlu0 %4666, %v493_v33   ;;  %v363_v32 = vrot.slane %v4950_v57, %v4989_v12 }
 0x111   :  { %v512_v33 = vmul.f32 %v4995_v15, %v363_v32  ;;  %v515_v13 = vmul.f32 %v5004_v21, %v363_v32 }
 0x113   :  { %817 = vperm.xlu1 %4667, %v496_v36   ;;  %814 = vperm.xlu0 %4666, %v495_v38   ;;  %v514_v36 = vmul.f32 %v4999_v18, %v363_v32  ;;  %v513_v38 = vmul.f32 %v4993_v14, %v363_v32 }
 0x117   :  { %823 = vperm.xlu1 %4667, %v498_v39   ;;  %820 = vperm.xlu0 %4666, %v497_v40   ;;  %v367_v39 = vrot.slane %v4948_v56, %v4989_v12 }
 0x119   :  { %v516_v40 = vmul.f32 %v4995_v15, %v367_v39  ;;  %v519_v22 = vmul.f32 %v5004_v21, %v367_v39 }
 0x11b   :  { %829 = vperm.xlu1 %4667, %v500_v16   ;;  %826 = vperm.xlu0 %4666, %v499_v17   ;;  %v518_v16 = vmul.f32 %v4999_v18, %v367_v39  ;;  %v517_v17 = vmul.f32 %v4993_v14, %v367_v39 }
 0x11f   :  { %835 = vperm.xlu1 %4667, %v502_v19   ;;  %832 = vperm.xlu0 %4666, %v501_v20   ;;  %v371_v19 = vrot.slane %v4954_v59, %v4989_v12 }
 0x121   :  { %v520_v20 = vmul.f32 %v4995_v15, %v371_v19  ;;  %v523_v27 = vmul.f32 %v5004_v21, %v371_v19 }
 0x123   :  { %841 = vperm.xlu1 %4667, %v504_v23   ;;  %838 = vperm.xlu0 %4666, %v503_v24   ;;  %v522_v23 = vmul.f32 %v4999_v18, %v371_v19  ;;  %v521_v24 = vmul.f32 %v4993_v14, %v371_v19 }
 0x127   :  { %847 = vperm.xlu1 %4667, %v506_v25   ;;  %844 = vperm.xlu0 %4666, %v505_v26   ;;  %v375_v25 = vrot.slane %v4952_v58, %v4989_v12 }
 0x129   :  { %v524_v26 = vmul.f32 %v4995_v15, %v375_v25 }
 0x12b   :  { %853 = vperm.xlu1 %4667, %v508_v28   ;;  %850 = vperm.xlu0 %4666, %v507_v29   ;;  %v526_v28 = vmul.f32 %v4999_v18, %v375_v25  ;;  %v525_v29 = vmul.f32 %v4993_v14, %v375_v25 }
 0x12f   :  { %859 = vperm.xlu1 %4667, %v510_v30   ;;  %856 = vperm.xlu0 %4666, %v509_v31   ;;  %v379_v31 = vrot.slane %v4958_v61, %v4989_v12 }
 0x131   :  { %v528_v32 = vmul.f32 %v4995_v15, %v379_v31  ;;  %v529_v39 = vmul.f32 %v4993_v14, %v379_v31  ;;  %v531_v19 = vmul.f32 %v5004_v21, %v379_v31 }
 0x133   :  { %865 = vperm.xlu1 %4667, %v512_v33   ;;  %862 = vperm.xlu0 %4666, %v511_v35   ;;  %v527_v33 = vmul.f32 %v5004_v21, %v375_v25 }
 0x137   :  { %871 = vperm.xlu1 %4667, %v514_v36   ;;  %868 = vperm.xlu0 %4666, %v513_v38   ;;  %v530_v38 = vmul.f32 %v4999_v18, %v379_v31 }
 0x13b   :  { %877 = vperm.xlu1 %4667, %v516_v40   ;;  %874 = vperm.xlu0 %4666, %v515_v13  }
 0x13f   :  { %883 = vperm.xlu1 %4667, %v518_v16   ;;  %880 = vperm.xlu0 %4666, %v517_v17   ;;  %v383_v16 = vrot.slane %v4956_v60, %v4989_v12 }
 0x141   :  { %v532_v17 = vmul.f32 %v4995_v15, %v383_v16 }
 0x143   :  { %889 = vperm.xlu1 %4667, %v520_v20   ;;  %886 = vperm.xlu0 %4666, %v519_v22  }
 0x147   :  { %895 = vperm.xlu1 %4667, %v522_v23   ;;  %892 = vperm.xlu0 %4666, %v521_v24   ;;  %v534_v23 = vmul.f32 %v4999_v18, %v383_v16  ;;  %v533_v24 = vmul.f32 %v4993_v14, %v383_v16 }
 0x14b   :  { %901 = vperm.xlu1 %4667, %v524_v26   ;;  %898 = vperm.xlu0 %4666, %v523_v27   ;;  %v387_v27 = vrot.slane %v4962_v63, %v4989_v12 }
 0x14e   :  { %v5094_v30 = vpop.permute.xlu1 %724  ;;  %v5100_v35 = vpop.permute.xlu0 %721 }
 0x14f   :  { %907 = vperm.xlu1 %4667, %v526_v28   ;;  %904 = vperm.xlu0 %4666, %v525_v29   ;;  %v536_v28 = vmul.f32 %v4995_v15, %v387_v27  ;;  %v535_v29 = vmul.f32 %v5004_v21, %v383_v16 }
 0x152   :  { %v5102_v36 = vpop.permute.xlu1 %727 }
 0x153   :  { %913 = vperm.xlu1 %4667, %v528_v32   ;;  %910 = vperm.xlu0 %4666, %v527_v33   ;;  %v538_v33 = vmul.f32 %v4999_v18, %v387_v27 }
 0x156   :  { %v5106_v40 = vpop.permute.xlu1 %733  ;;  %v5108_v13 = vpop.permute.xlu0 %730 }
 0x157   :  { %919 = vperm.xlu1 %4667, %v530_v38   ;;  %916 = vperm.xlu0 %4666, %v529_v39   ;;  %v537_v38 = vmul.f32 %v4993_v14, %v387_v27 }
 0x15a   :  { %v5114_v20 = vpop.permute.xlu1 %739  ;;  %v5116_v22 = vpop.permute.xlu0 %736 }
 0x15b   :  { %925 = vperm.xlu1 %4667, %v532_v17   ;;  %922 = vperm.xlu0 %4666, %v531_v19   ;;  %v391_v19 = vrot.slane %v4960_v62, %v4989_v12 }
 0x15d   :  { %v540_v16 = vmul.f32 %v4995_v15, %v391_v19 }
 0x15e   :  { %v5120_v25 = vpop.permute.xlu1 %745  ;;  %v5122_v26 = vpop.permute.xlu0 %742 }
 0x15f   :  { %7569 = vst [vmem:[#allocation13_spill] sm:$0xff] %v5120_v25  ;;  %931 = vperm.xlu1 %4667, %v534_v23   ;;  %928 = vperm.xlu0 %4666, %v533_v24   ;;  %v539_v23 = vmul.f32 %v5004_v21, %v387_v27 }
 0x162   :  { %v5128_v31 = vpop.permute.xlu1 %751  ;;  %v5130_v32 = vpop.permute.xlu0 %748 }
 0x163   :  { %7570 = vst [vmem:[#allocation14_spill] sm:$0xff] %v5128_v31  ;;  %937 = vperm.xlu1 %4667, %v536_v28   ;;  %934 = vperm.xlu0 %4666, %v535_v29   ;;  %v542_v29 = vmul.f32 %v4999_v18, %v391_v19 }
 0x166   :  { %v5134_v39 = vpop.permute.xlu1 %757  ;;  %v5136_v17 = vpop.permute.xlu0 %754 }
 0x167   :  { %7571 = vst [vmem:[#allocation15_spill] sm:$0xff] %v5134_v39  ;;  %7572 = vst [vmem:[#allocation16_spill] sm:$0xff] %v5136_v17  ;;  %943 = vperm.xlu1 %4667, %v538_v33   ;;  %940 = vperm.xlu0 %4666, %v537_v38   ;;  %v541_v39 = vmul.f32 %v4993_v14, %v391_v19  ;;  %v395_v33 = vrot.slane %v4966_v1, %v4989_v12 }
 0x168   :  { %v543_v38 = vmul.f32 %v5004_v21, %v391_v19 }
 0x169   :  { %v544_v27 = vmul.f32 %v4995_v15, %v395_v33 }
 0x16a   :  { %v5142_v24 = vpop.permute.xlu1 %763  ;;  %v5144_v28 = vpop.permute.xlu0 %760 }
 0x16b   :  { %7573 = vst [vmem:[#allocation17_spill] sm:$0xff] %v5142_v24  ;;  %949 = vperm.xlu1 %4667, %v540_v16   ;;  %946 = vperm.xlu0 %4666, %v539_v23   ;;  %v546_v23 = vmul.f32 %v4999_v18, %v395_v33 }
 0x16e   :  { %v5148_v17 = vpop.permute.xlu1 %769  ;;  %v5150_v31 = vpop.permute.xlu0 %766 }
 0x16f   :  { %7574 = vst [vmem:[#allocation18_spill] sm:$0xff] %v5148_v17  ;;  %7575 = vst [vmem:[#allocation19_spill] sm:$0xff] %v5150_v31  ;;  %955 = vperm.xlu1 %4667, %v542_v29   ;;  %952 = vperm.xlu0 %4666, %v541_v39   ;;  %v545_v17 = vmul.f32 %v4993_v14, %v395_v33  ;;  %v399_v39 = vrot.slane %v4964_v0, %v4989_v12 }
 0x170   :  { %v547_v29 = vmul.f32 %v5004_v21, %v395_v33 }
 0x171   :  { %v548_v19 = vmul.f32 %v4995_v15, %v399_v39 }
 0x172   :  { %v5156_v24 = vpop.permute.xlu1 %775  ;;  %v5158_v16 = vpop.permute.xlu0 %772 }
 0x173   :  { %7576 = vst [vmem:[#allocation20_spill] sm:$0xff] %v5156_v24  ;;  %7577 = vst [vmem:[#allocation21_spill] sm:$0xff] %v5158_v16  ;;  %961 = vperm.xlu1 %4667, %v544_v27   ;;  %958 = vperm.xlu0 %4666, %v543_v38   ;;  %v550_v38 = vmul.f32 %v4999_v18, %v399_v39 }
 0x176   :  { %v5162_v31 = vpop.permute.xlu1 %781  ;;  %v5164_v25 = vpop.permute.xlu0 %778 }
 0x177   :  { %7578 = vst [vmem:[#allocation22_spill] sm:$0xff] %v5162_v31  ;;  %7579 = vst [vmem:[#allocation23_spill] sm:$0xff] %v5164_v25  ;;  %967 = vperm.xlu1 %4667, %v546_v23   ;;  %964 = vperm.xlu0 %4666, %v545_v17   ;;  %v549_v31 = vmul.f32 %v4993_v14, %v399_v39  ;;  %v403_v17 = vrot.slane %v4970_v3, %v4989_v12 }
 0x178   :  { %v551_v23 = vmul.f32 %v5004_v21, %v399_v39 }
 0x179   :  { %v552_v33 = vmul.f32 %v4995_v15, %v403_v17 }
 0x17a   :  { %v5170_v24 = vpop.permute.xlu1 %787  ;;  %v5172_v27 = vpop.permute.xlu0 %784 }
 0x17b   :  { %7580 = vst [vmem:[#allocation24_spill] sm:$0xff] %v5170_v24  ;;  %7581 = vst [vmem:[#allocation25_spill] sm:$0xff] %v5172_v27  ;;  %973 = vperm.xlu1 %4667, %v548_v19   ;;  %970 = vperm.xlu0 %4666, %v547_v29   ;;  %v554_v29 = vmul.f32 %v4999_v18, %v403_v17 }
 0x17e   :  { %v5176_v25 = vpop.permute.xlu1 %793  ;;  %v5178_v16 = vpop.permute.xlu0 %790 }
 0x17f   :  { %7582 = vst [vmem:[#allocation26_spill] sm:$0xff] %v5176_v25  ;;  %7583 = vst [vmem:[#allocation27_spill] sm:$0xff] %v5178_v16  ;;  %979 = vperm.xlu1 %4667, %v550_v38   ;;  %976 = vperm.xlu0 %4666, %v549_v31   ;;  %v553_v25 = vmul.f32 %v4993_v14, %v403_v17  ;;  %v407_v31 = vrot.slane %v4968_v2, %v4989_v12 }
 0x180   :  { %v555_v38 = vmul.f32 %v5004_v21, %v403_v17 }
 0x181   :  { %v556_v39 = vmul.f32 %v4995_v15, %v407_v31 }
 0x182   :  { %v5184_v24 = vpop.permute.xlu1 %799  ;;  %v5186_v19 = vpop.permute.xlu0 %796 }
 0x183   :  { %7584 = vst [vmem:[#allocation28_spill] sm:$0xff] %v5184_v24  ;;  %7585 = vst [vmem:[#allocation29_spill] sm:$0xff] %v5186_v19  ;;  %985 = vperm.xlu1 %4667, %v552_v33   ;;  %982 = vperm.xlu0 %4666, %v551_v23   ;;  %v558_v23 = vmul.f32 %v4999_v18, %v407_v31 }
 0x186   :  { %v5190_v16 = vpop.permute.xlu1 %805  ;;  %v5192_v27 = vpop.permute.xlu0 %802 }
 0x187   :  { %7586 = vst [vmem:[#allocation30_spill] sm:$0xff] %v5190_v16  ;;  %7587 = vst [vmem:[#allocation31_spill] sm:$0xff] %v5192_v27  ;;  %991 = vperm.xlu1 %4667, %v554_v29   ;;  %988 = vperm.xlu0 %4666, %v553_v25   ;;  %v557_v16 = vmul.f32 %v4993_v14, %v407_v31  ;;  %v411_v25 = vrot.slane %v4974_v5, %v4989_v12 }
 0x188   :  { %v559_v29 = vmul.f32 %v5004_v21, %v407_v31 }
 0x189   :  { %v560_v17 = vmul.f32 %v4995_v15, %v411_v25 }
 0x18a   :  { %v5198_v24 = vpop.permute.xlu1 %811  ;;  %v5200_v33 = vpop.permute.xlu0 %808 }
 0x18b   :  { %7588 = vst [vmem:[#allocation32_spill] sm:$0xff] %v5198_v24  ;;  %7589 = vst [vmem:[#allocation33_spill] sm:$0xff] %v5200_v33  ;;  %997 = vperm.xlu1 %4667, %v556_v39   ;;  %994 = vperm.xlu0 %4666, %v555_v38   ;;  %v562_v38 = vmul.f32 %v4999_v18, %v411_v25 }
 0x18e   :  { %v5204_v27 = vpop.permute.xlu1 %817  ;;  %v5206_v19 = vpop.permute.xlu0 %814 }
 0x18f   :  { %7590 = vst [vmem:[#allocation34_spill] sm:$0xff] %v5204_v27  ;;  %7591 = vst [vmem:[#allocation35_spill] sm:$0xff] %v5206_v19  ;;  %1003 = vperm.xlu1 %4667, %v558_v23   ;;  %1000 = vperm.xlu0 %4666, %v557_v16   ;;  %v561_v27 = vmul.f32 %v4993_v14, %v411_v25  ;;  %v415_v16 = vrot.slane %v4972_v4, %v4989_v12 }
 0x190   :  { %v563_v23 = vmul.f32 %v5004_v21, %v411_v25 }
 0x191   :  { %v564_v31 = vmul.f32 %v4995_v15, %v415_v16 }
 0x192   :  { %v5212_v24 = vpop.permute.xlu1 %823  ;;  %v5214_v39 = vpop.permute.xlu0 %820 }
 0x193   :  { %7592 = vst [vmem:[#allocation36_spill] sm:$0xff] %v5212_v24  ;;  %7593 = vst [vmem:[#allocation37_spill] sm:$0xff] %v5214_v39  ;;  %1009 = vperm.xlu1 %4667, %v560_v17   ;;  %1006 = vperm.xlu0 %4666, %v559_v29   ;;  %v566_v29 = vmul.f32 %v4999_v18, %v415_v16 }
 0x196   :  { %v5218_v19 = vpop.permute.xlu1 %829  ;;  %v5220_v33 = vpop.permute.xlu0 %826 }
 0x197   :  { %7594 = vst [vmem:[#allocation38_spill] sm:$0xff] %v5218_v19  ;;  %7595 = vst [vmem:[#allocation39_spill] sm:$0xff] %v5220_v33  ;;  %1015 = vperm.xlu1 %4667, %v562_v38   ;;  %1012 = vperm.xlu0 %4666, %v561_v27   ;;  %v565_v19 = vmul.f32 %v4993_v14, %v415_v16  ;;  %v419_v27 = vrot.slane %v4978_v7, %v4989_v12 }
 0x198   :  { %v567_v38 = vmul.f32 %v5004_v21, %v415_v16 }
 0x199   :  { %v568_v25 = vmul.f32 %v4995_v15, %v419_v27 }
 0x19a   :  { %v5226_v24 = vpop.permute.xlu1 %835  ;;  %v5228_v17 = vpop.permute.xlu0 %832 }
 0x19b   :  { %7596 = vst [vmem:[#allocation40_spill] sm:$0xff] %v5226_v24  ;;  %7597 = vst [vmem:[#allocation41_spill] sm:$0xff] %v5228_v17  ;;  %1021 = vperm.xlu1 %4667, %v564_v31   ;;  %1018 = vperm.xlu0 %4666, %v563_v23   ;;  %v570_v23 = vmul.f32 %v4999_v18, %v419_v27 }
 0x19e   :  { %v5232_v33 = vpop.permute.xlu1 %841  ;;  %v5234_v39 = vpop.permute.xlu0 %838 }
 0x19f   :  { %7598 = vst [vmem:[#allocation42_spill] sm:$0xff] %v5232_v33  ;;  %7599 = vst [vmem:[#allocation43_spill] sm:$0xff] %v5234_v39  ;;  %1027 = vperm.xlu1 %4667, %v566_v29   ;;  %1024 = vperm.xlu0 %4666, %v565_v19   ;;  %v569_v33 = vmul.f32 %v4993_v14, %v419_v27  ;;  %v423_v19 = vrot.slane %v4976_v6, %v4989_v12 }
 0x1a0   :  { %v571_v29 = vmul.f32 %v5004_v21, %v419_v27 }
 0x1a1   :  { %v572_v16 = vmul.f32 %v4995_v15, %v423_v19 }
 0x1a2   :  { %v5240_v24 = vpop.permute.xlu1 %847  ;;  %v5242_v31 = vpop.permute.xlu0 %844 }
 0x1a3   :  { %7600 = vst [vmem:[#allocation44_spill] sm:$0xff] %v5240_v24  ;;  %7601 = vst [vmem:[#allocation45_spill] sm:$0xff] %v5242_v31  ;;  %1033 = vperm.xlu1 %4667, %v568_v25   ;;  %1030 = vperm.xlu0 %4666, %v567_v38   ;;  %v574_v38 = vmul.f32 %v4999_v18, %v423_v19 }
 0x1a6   :  { %v5246_v39 = vpop.permute.xlu1 %853  ;;  %v5248_v17 = vpop.permute.xlu0 %850 }
 0x1a7   :  { %7602 = vst [vmem:[#allocation46_spill] sm:$0xff] %v5246_v39  ;;  %7603 = vst [vmem:[#allocation47_spill] sm:$0xff] %v5248_v17  ;;  %1039 = vperm.xlu1 %4667, %v570_v23   ;;  %1036 = vperm.xlu0 %4666, %v569_v33   ;;  %v573_v39 = vmul.f32 %v4993_v14, %v423_v19  ;;  %v427_v33 = vrot.slane %v4982_v9, %v4989_v12 }
 0x1a8   :  { %v575_v23 = vmul.f32 %v5004_v21, %v423_v19 }
 0x1a9   :  { %v576_v27 = vmul.f32 %v4995_v15, %v427_v33 }
 0x1aa   :  { %v5254_v24 = vpop.permute.xlu1 %859  ;;  %v5256_v25 = vpop.permute.xlu0 %856 }
 0x1ab   :  { %7604 = vst [vmem:[#allocation48_spill] sm:$0xff] %v5254_v24  ;;  %7605 = vst [vmem:[#allocation49_spill] sm:$0xff] %v5256_v25  ;;  %1045 = vperm.xlu1 %4667, %v572_v16   ;;  %1042 = vperm.xlu0 %4666, %v571_v29   ;;  %v578_v29 = vmul.f32 %v4999_v18, %v427_v33 }
 0x1ae   :  { %v5260_v17 = vpop.permute.xlu1 %865  ;;  %v5262_v31 = vpop.permute.xlu0 %862 }
 0x1af   :  { %7606 = vst [vmem:[#allocation50_spill] sm:$0xff] %v5260_v17  ;;  %7607 = vst [vmem:[#allocation51_spill] sm:$0xff] %v5262_v31  ;;  %1051 = vperm.xlu1 %4667, %v574_v38   ;;  %1048 = vperm.xlu0 %4666, %v573_v39   ;;  %v577_v17 = vmul.f32 %v4993_v14, %v427_v33  ;;  %v431_v39 = vrot.slane %v4980_v8, %v4989_v12 }
 0x1b0   :  { %v579_v38 = vmul.f32 %v5004_v21, %v427_v33 }
 0x1b1   :  { %v580_v19 = vmul.f32 %v4995_v15, %v431_v39 }
 0x1b2   :  { %v5268_v24 = vpop.permute.xlu1 %871  ;;  %v5270_v16 = vpop.permute.xlu0 %868 }
 0x1b3   :  { %7608 = vst [vmem:[#allocation52_spill] sm:$0xff] %v5268_v24  ;;  %7609 = vst [vmem:[#allocation53_spill] sm:$0xff] %v5270_v16  ;;  %1057 = vperm.xlu1 %4667, %v576_v27   ;;  %1054 = vperm.xlu0 %4666, %v575_v23   ;;  %v582_v23 = vmul.f32 %v4999_v18, %v431_v39 }
 0x1b6   :  { %v5274_v31 = vpop.permute.xlu1 %877  ;;  %v5276_v25 = vpop.permute.xlu0 %874 }
 0x1b7   :  { %7610 = vst [vmem:[#allocation54_spill] sm:$0xff] %v5274_v31  ;;  %7611 = vst [vmem:[#allocation55_spill] sm:$0xff] %v5276_v25  ;;  %1063 = vperm.xlu1 %4667, %v578_v29   ;;  %1060 = vperm.xlu0 %4666, %v577_v17   ;;  %v581_v31 = vmul.f32 %v4993_v14, %v431_v39  ;;  %v435_v17 = vrot.slane %v4986_v11, %v4989_v12 }
 0x1b8   :  { %v583_v29 = vmul.f32 %v5004_v21, %v431_v39 }
 0x1b9   :  { %v584_v33 = vmul.f32 %v4995_v15, %v435_v17 }
 0x1ba   :  { %v5282_v24 = vpop.permute.xlu1 %883  ;;  %v5284_v27 = vpop.permute.xlu0 %880 }
 0x1bb   :  { %7612 = vst [vmem:[#allocation56_spill] sm:$0xff] %v5282_v24  ;;  %7613 = vst [vmem:[#allocation57_spill] sm:$0xff] %v5284_v27  ;;  %1069 = vperm.xlu1 %4667, %v580_v19   ;;  %1066 = vperm.xlu0 %4666, %v579_v38   ;;  %v586_v38 = vmul.f32 %v4999_v18, %v435_v17 }
 0x1be   :  { %v5288_v25 = vpop.permute.xlu1 %889  ;;  %v5290_v16 = vpop.permute.xlu0 %886 }
 0x1bf   :  { %7614 = vst [vmem:[#allocation58_spill] sm:$0xff] %v5288_v25  ;;  %7615 = vst [vmem:[#allocation59_spill] sm:$0xff] %v5290_v16  ;;  %1075 = vperm.xlu1 %4667, %v582_v23   ;;  %1072 = vperm.xlu0 %4666, %v581_v31   ;;  %v585_v25 = vmul.f32 %v4993_v14, %v435_v17  ;;  %v439_v31 = vrot.slane %v4984_v10, %v4989_v12  ;;  %v4660_v12 = vld [vmem:[%s7548_s1 + $0x1] ss:$0 sm:$0xff] }
 0x1c0   :  { %v587_v23 = vmul.f32 %v5004_v21, %v435_v17 }
 0x1c1   :  { %v588_v39 = vmul.f32 %v4995_v15, %v439_v31  ;;  %v591_v15 = vmul.f32 %v5004_v21, %v439_v31 }
 0x1c2   :  { %v5296_v24 = vpop.permute.xlu1 %895  ;;  %v5298_v19 = vpop.permute.xlu0 %892 }
 0x1c3   :  { %7616 = vst [vmem:[#allocation60_spill] sm:$0xff] %v5296_v24  ;;  %7617 = vst [vmem:[#allocation61_spill] sm:$0xff] %v5298_v19  ;;  %1081 = vperm.xlu1 %4667, %v584_v33   ;;  %1078 = vperm.xlu0 %4666, %v583_v29   ;;  %v590_v29 = vmul.f32 %v4999_v18, %v439_v31 }
 0x1c6   :  { %v5302_v16 = vpop.permute.xlu1 %901  ;;  %v5304_v27 = vpop.permute.xlu0 %898 }
 0x1c7   :  { %7618 = vst [vmem:[#allocation62_spill] sm:$0xff] %v5302_v16  ;;  %7619 = vst [vmem:[#allocation63_spill] sm:$0xff] %v5304_v27  ;;  %1087 = vperm.xlu1 %4667, %v586_v38   ;;  %1084 = vperm.xlu0 %4666, %v585_v25   ;;  %v589_v16 = vmul.f32 %v4993_v14, %v439_v31 }
 0x1ca   :  { %v5310_v24 = vpop.permute.xlu1 %907  ;;  %v5312_v33 = vpop.permute.xlu0 %904 }
 0x1cb   :  { %7620 = vst [vmem:[#allocation64_spill] sm:$0xff] %v5310_v24  ;;  %7621 = vst [vmem:[#allocation65_spill] sm:$0xff] %v5312_v33  ;;  %1093 = vperm.xlu1 %4667, %v588_v39   ;;  %1090 = vperm.xlu0 %4666, %v587_v23  }
 0x1ce   :  { %v5316_v27 = vpop.permute.xlu1 %913  ;;  %v5318_v19 = vpop.permute.xlu0 %910 }
 0x1cf   :  { %7622 = vst [vmem:[#allocation66_spill] sm:$0xff] %v5316_v27  ;;  %7623 = vst [vmem:[#allocation67_spill] sm:$0xff] %v5318_v19  ;;  %1099 = vperm.xlu1 %4667, %v590_v29   ;;  %1096 = vperm.xlu0 %4666, %v589_v16  }
 0x1d2   :  { %v5324_v25 = vpop.permute.xlu1 %919  ;;  %v5326_v17 = vpop.permute.xlu0 %916 }
 0x1d3   :  { %7624 = vst [vmem:[#allocation68_spill] sm:$0xff] %v5324_v25  ;;  %7625 = vst [vmem:[#allocation69_spill] sm:$0xff] %v5326_v17  ;;  %1102 = vperm.xlu0 %4666, %v591_v15   ;;  %1898 = vbcast.lane.b32.xlu1 %v4660_v12, 256 }
 0x1d6   :  { %v5328_v18 = vpop.permute.xlu1 %925  ;;  %v5330_v14 = vpop.permute.xlu0 %922 }
 0x1d7   :  { %7626 = vst [vmem:[#allocation70_spill] sm:$0xff] %v5328_v18  ;;  %7627 = vst [vmem:[#allocation71_spill] sm:$0xff] %v5330_v14  ;;  %1906 = vbcast.lane.b32.xlu1 %v4660_v12, 272  ;;  %1902 = vbcast.lane.b32.xlu0 %v4660_v12, 264 }
 0x1da   :  { %v5332_v38 = vpop.permute.xlu1 %931  ;;  %v5334_v16 = vpop.permute.xlu0 %928 }
 0x1db   :  { %7628 = vst [vmem:[#allocation72_spill] sm:$0xff] %v5332_v38  ;;  %7629 = vst [vmem:[#allocation73_spill] sm:$0xff] %v5334_v16  ;;  %1910 = vbcast.lane.b32.xlu0 %v4660_v12, 280 }
 0x1de   :  { %v5336_v39 = vpop.permute.xlu1 %937  ;;  %v5338_v21 = vpop.permute.xlu0 %934 }
 0x1df   :  { %7630 = vst [vmem:[#allocation74_spill] sm:$0xff] %v5336_v39  ;;  %7631 = vst [vmem:[#allocation75_spill] sm:$0xff] %v5338_v21 }
 0x1e2   :  { %v5340_v31 = vpop.permute.xlu1 %943  ;;  %v5342_v23 = vpop.permute.xlu0 %940 }
 0x1e3   :  { %7632 = vst [vmem:[#allocation76_spill] sm:$0xff] %v5340_v31  ;;  %7633 = vst [vmem:[#allocation77_spill] sm:$0xff] %v5342_v23 }
 0x1e6   :  { %v5344_v29 = vpop.permute.xlu1 %949  ;;  %v5346_v15 = vpop.permute.xlu0 %946 }
 0x1e7   :  { %7634 = vst [vmem:[#allocation78_spill] sm:$0xff] %v5344_v29  ;;  %7635 = vst [vmem:[#allocation79_spill] sm:$0xff] %v5346_v15 }
 0x1ea   :  { %v5348_v14 = vpop.permute.xlu1 %955  ;;  %v5350_v25 = vpop.permute.xlu0 %952 }
 0x1eb   :  { %7636 = vst [vmem:[#allocation80_spill] sm:$0xff] %v5348_v14  ;;  %7637 = vst [vmem:[#allocation81_spill] sm:$0xff] %v5350_v25 }
 0x1ee   :  { %v5352_v27 = vpop.permute.xlu1 %961  ;;  %v5354_v38 = vpop.permute.xlu0 %958 }
 0x1ef   :  { %7638 = vst [vmem:[#allocation82_spill] sm:$0xff] %v5352_v27  ;;  %7639 = vst [vmem:[#allocation83_spill] sm:$0xff] %v5354_v38 }
 0x1f2   :  { %v5356_v12 = vpop.permute.xlu1 %967  ;;  %v5358_v39 = vpop.permute.xlu0 %964 }
 0x1f3   :  { %7640 = vst [vmem:[#allocation84_spill] sm:$0xff] %v5356_v12  ;;  %7641 = vst [vmem:[#allocation85_spill] sm:$0xff] %v5358_v39 }
 0x1f6   :  { %v5360_v21 = vpop.permute.xlu1 %973  ;;  %v5362_v31 = vpop.permute.xlu0 %970 }
 0x1f7   :  { %7642 = vst [vmem:[#allocation86_spill] sm:$0xff] %v5360_v21  ;;  %7643 = vst [vmem:[#allocation87_spill] sm:$0xff] %v5362_v31 }
 0x1fa   :  { %v5364_v23 = vpop.permute.xlu1 %979  ;;  %v5366_v29 = vpop.permute.xlu0 %976 }
 0x1fb   :  { %7644 = vst [vmem:[#allocation88_spill] sm:$0xff] %v5364_v23  ;;  %7645 = vst [vmem:[#allocation89_spill] sm:$0xff] %v5366_v29 }
 0x1fe   :  { %v5368_v15 = vpop.permute.xlu1 %985  ;;  %v5370_v14 = vpop.permute.xlu0 %982 }
 0x1ff   :  { %7646 = vst [vmem:[#allocation90_spill] sm:$0xff] %v5368_v15  ;;  %7647 = vst [vmem:[#allocation91_spill] sm:$0xff] %v5370_v14 }
 0x202   :  { %v5372_v25 = vpop.permute.xlu1 %991  ;;  %v5374_v27 = vpop.permute.xlu0 %988 }
 0x203   :  { %7648 = vst [vmem:[#allocation92_spill] sm:$0xff] %v5372_v25  ;;  %7649 = vst [vmem:[#allocation93_spill] sm:$0xff] %v5374_v27 }
 0x206   :  { %v5376_v38 = vpop.permute.xlu1 %997  ;;  %v5378_v12 = vpop.permute.xlu0 %994 }
 0x207   :  { %7650 = vst [vmem:[#allocation94_spill] sm:$0xff] %v5376_v38  ;;  %7651 = vst [vmem:[#allocation95_spill] sm:$0xff] %v5378_v12 }
 0x20a   :  { %v5380_v39 = vpop.permute.xlu1 %1003  ;;  %v5382_v21 = vpop.permute.xlu0 %1000 }
 0x20b   :  { %7652 = vst [vmem:[#allocation96_spill] sm:$0xff] %v5380_v39  ;;  %7653 = vst [vmem:[#allocation97_spill] sm:$0xff] %v5382_v21 }
 0x20e   :  { %v5384_v31 = vpop.permute.xlu1 %1009  ;;  %v5386_v23 = vpop.permute.xlu0 %1006 }
 0x20f   :  { %7654 = vst [vmem:[#allocation98_spill] sm:$0xff] %v5384_v31  ;;  %7655 = vst [vmem:[#allocation99_spill] sm:$0xff] %v5386_v23 }
 0x212   :  { %v5388_v29 = vpop.permute.xlu1 %1015  ;;  %v5390_v15 = vpop.permute.xlu0 %1012 }
 0x213   :  { %7656 = vst [vmem:[#allocation100_spill] sm:$0xff] %v5388_v29  ;;  %7657 = vst [vmem:[#allocation101_spill] sm:$0xff] %v5390_v15 }
 0x216   :  { %v5392_v14 = vpop.permute.xlu1 %1021  ;;  %v5394_v25 = vpop.permute.xlu0 %1018 }
 0x217   :  { %7658 = vst [vmem:[#allocation102_spill] sm:$0xff] %v5392_v14  ;;  %7659 = vst [vmem:[#allocation103_spill] sm:$0xff] %v5394_v25 }
 0x21a   :  { %v5396_v27 = vpop.permute.xlu1 %1027  ;;  %v5398_v38 = vpop.permute.xlu0 %1024 }
 0x21b   :  { %7660 = vst [vmem:[#allocation104_spill] sm:$0xff] %v5396_v27  ;;  %7661 = vst [vmem:[#allocation105_spill] sm:$0xff] %v5398_v38 }
 0x21e   :  { %v5400_v12 = vpop.permute.xlu1 %1033  ;;  %v5402_v39 = vpop.permute.xlu0 %1030 }
 0x21f   :  { %7662 = vst [vmem:[#allocation106_spill] sm:$0xff] %v5400_v12  ;;  %7663 = vst [vmem:[#allocation107_spill] sm:$0xff] %v5402_v39 }
 0x222   :  { %v5404_v21 = vpop.permute.xlu1 %1039  ;;  %v5406_v31 = vpop.permute.xlu0 %1036 }
 0x223   :  { %7664 = vst [vmem:[#allocation108_spill] sm:$0xff] %v5404_v21  ;;  %7665 = vst [vmem:[#allocation109_spill] sm:$0xff] %v5406_v31 }
 0x226   :  { %v5408_v23 = vpop.permute.xlu1 %1045  ;;  %v5410_v29 = vpop.permute.xlu0 %1042 }
 0x227   :  { %7666 = vst [vmem:[#allocation110_spill] sm:$0xff] %v5408_v23  ;;  %7667 = vst [vmem:[#allocation111_spill] sm:$0xff] %v5410_v29 }
 0x22a   :  { %v5412_v15 = vpop.permute.xlu1 %1051  ;;  %v5414_v14 = vpop.permute.xlu0 %1048 }
 0x22b   :  { %7668 = vst [vmem:[#allocation112_spill] sm:$0xff] %v5412_v15  ;;  %7669 = vst [vmem:[#allocation113_spill] sm:$0xff] %v5414_v14 }
 0x22e   :  { %v5416_v25 = vpop.permute.xlu1 %1057  ;;  %v5418_v27 = vpop.permute.xlu0 %1054 }
 0x22f   :  { %7670 = vst [vmem:[#allocation114_spill] sm:$0xff] %v5416_v25  ;;  %7671 = vst [vmem:[#allocation115_spill] sm:$0xff] %v5418_v27 }
 0x232   :  { %v5420_v38 = vpop.permute.xlu1 %1063  ;;  %v5422_v12 = vpop.permute.xlu0 %1060 }
 0x233   :  { %7672 = vst [vmem:[#allocation116_spill] sm:$0xff] %v5420_v38  ;;  %7673 = vst [vmem:[#allocation117_spill] sm:$0xff] %v5422_v12 }
 0x236   :  { %v5424_v39 = vpop.permute.xlu1 %1069  ;;  %v5426_v21 = vpop.permute.xlu0 %1066 }
 0x237   :  { %7674 = vst [vmem:[#allocation118_spill] sm:$0xff] %v5424_v39  ;;  %7675 = vst [vmem:[#allocation119_spill] sm:$0xff] %v5426_v21 }
 0x23a   :  { %v5428_v31 = vpop.permute.xlu1 %1075  ;;  %v5430_v23 = vpop.permute.xlu0 %1072 }
 0x23b   :  { %7676 = vst [vmem:[#allocation120_spill] sm:$0xff] %v5428_v31  ;;  %7677 = vst [vmem:[#allocation121_spill] sm:$0xff] %v5430_v23  ;;  %v5449_v31 = vsub.s32 1, %v4910_v34 }
 0x23d   :  { %v1775_v16 = vrot.slane %v4924_v44, %v5449_v31 }
 0x23e   :  { %v5432_v29 = vpop.permute.xlu1 %1081  ;;  %v5434_v15 = vpop.permute.xlu0 %1078 }
 0x23f   :  { %7678 = vst [vmem:[#allocation122_spill] sm:$0xff] %v5432_v29  ;;  %7679 = vst [vmem:[#allocation123_spill] sm:$0xff] %v5434_v15  ;;  %v1767_v29 = vrot.slane %v4926_v45, %v5449_v31 }
 0x242   :  { %v5436_v14 = vpop.permute.xlu1 %1087  ;;  %v5438_v25 = vpop.permute.xlu0 %1084 }
 0x243   :  { %7680 = vst [vmem:[#allocation124_spill] sm:$0xff] %v5436_v14  ;;  %7681 = vst [vmem:[#allocation125_spill] sm:$0xff] %v5438_v25  ;;  %v1771_v25 = vrot.slane %v4930_v47, %v5449_v31 }
 0x246   :  { %v5440_v27 = vpop.permute.xlu1 %1093  ;;  %v5442_v38 = vpop.permute.xlu0 %1090 }
 0x247   :  { %7682 = vst [vmem:[#allocation126_spill] sm:$0xff] %v5440_v27  ;;  %7683 = vst [vmem:[#allocation127_spill] sm:$0xff] %v5442_v38 }
 0x24a   :  { %v5444_v12 = vpop.permute.xlu1 %1099  ;;  %v5446_v39 = vpop.permute.xlu0 %1096 }
 0x24b   :  { %7684 = vst [vmem:[#allocation128_spill] sm:$0xff] %v5444_v12  ;;  %7685 = vst [vmem:[#allocation129_spill] sm:$0xff] %v5446_v39 }
 0x24e   :  { %v5453_v21 = vpop.permute.xlu1 %1898  ;;  %v5455_v15 = vpop.permute.xlu0 %1102 }
 0x24f   :  { %7686 = vst [vmem:[#allocation130_spill] sm:$0xff] %v5455_v15  ;;  %v1916_v14 = vmul.f32 %v5453_v21, %v1767_v29  ;;  %v1920_v15 = vmul.f32 %v5453_v21, %v1771_v25 }
 0x251   :  { %2173 = vperm.xlu1 %4667, %v1916_v14  }
 0x252   :  { %v5458_v27 = vpop.permute.xlu1 %1906  ;;  %v5460_v38 = vpop.permute.xlu0 %1902 }
 0x253   :  { %v1918_v12 = vmul.f32 %v5458_v27, %v1767_v29  ;;  %v1917_v39 = vmul.f32 %v5460_v38, %v1767_v29  ;;  %v1922_v14 = vmul.f32 %v5458_v27, %v1771_v25  ;;  %v1921_v17 = vmul.f32 %v5460_v38, %v1771_v25 }
 0x254   :  { %v1926_v19 = vmul.f32 %v5458_v27, %v1775_v16 }
 0x255   :  { %2179 = vperm.xlu1 %4667, %v1918_v12   ;;  %2176 = vperm.xlu0 %4666, %v1917_v39   ;;  %v1924_v12 = vmul.f32 %v5453_v21, %v1775_v16 }
 0x256   :  { %v5466_v23 = vpop.permute.xlu0 %1910 }
 0x257   :  { %v1919_v18 = vmul.f32 %v5466_v23, %v1767_v29  ;;  %v1923_v39 = vmul.f32 %v5466_v23, %v1771_v25  ;;  %v1925_v29 = vmul.f32 %v5460_v38, %v1775_v16 }
 0x259   :  { %2185 = vperm.xlu1 %4667, %v1920_v15   ;;  %2182 = vperm.xlu0 %4666, %v1919_v18   ;;  %v1779_v18 = vrot.slane %v4928_v46, %v5449_v31 }
 0x25b   :  { %v1928_v15 = vmul.f32 %v5453_v21, %v1779_v18  ;;  %v1929_v25 = vmul.f32 %v5460_v38, %v1779_v18 }
 0x25d   :  { %2191 = vperm.xlu1 %4667, %v1922_v14   ;;  %2188 = vperm.xlu0 %4666, %v1921_v17   ;;  %v1927_v14 = vmul.f32 %v5466_v23, %v1775_v16  ;;  %v1930_v17 = vmul.f32 %v5458_v27, %v1779_v18 }
 0x261   :  { %2197 = vperm.xlu1 %4667, %v1924_v12   ;;  %2194 = vperm.xlu0 %4666, %v1923_v39   ;;  %v1783_v12 = vrot.slane %v4934_v49, %v5449_v31 }
 0x263   :  { %v1932_v39 = vmul.f32 %v5453_v21, %v1783_v12  ;;  %v1933_v16 = vmul.f32 %v5460_v38, %v1783_v12 }
 0x265   :  { %2203 = vperm.xlu1 %4667, %v1926_v19   ;;  %2200 = vperm.xlu0 %4666, %v1925_v29   ;;  %v1931_v19 = vmul.f32 %v5466_v23, %v1779_v18  ;;  %v1934_v29 = vmul.f32 %v5458_v27, %v1783_v12 }
 0x269   :  { %2209 = vperm.xlu1 %4667, %v1928_v15   ;;  %2206 = vperm.xlu0 %4666, %v1927_v14   ;;  %v1787_v15 = vrot.slane %v4932_v48, %v5449_v31 }
 0x26b   :  { %v1936_v14 = vmul.f32 %v5453_v21, %v1787_v15  ;;  %v1937_v18 = vmul.f32 %v5460_v38, %v1787_v15 }
 0x26d   :  { %2215 = vperm.xlu1 %4667, %v1930_v17   ;;  %2212 = vperm.xlu0 %4666, %v1929_v25   ;;  %v1935_v17 = vmul.f32 %v5466_v23, %v1783_v12  ;;  %v1938_v25 = vmul.f32 %v5458_v27, %v1787_v15 }
 0x271   :  { %2221 = vperm.xlu1 %4667, %v1932_v39   ;;  %2218 = vperm.xlu0 %4666, %v1931_v19   ;;  %v1791_v39 = vrot.slane %v4938_v51, %v5449_v31 }
 0x273   :  { %v1940_v19 = vmul.f32 %v5453_v21, %v1791_v39  ;;  %v1941_v12 = vmul.f32 %v5460_v38, %v1791_v39 }
 0x275   :  { %2227 = vperm.xlu1 %4667, %v1934_v29   ;;  %2224 = vperm.xlu0 %4666, %v1933_v16   ;;  %v1939_v29 = vmul.f32 %v5466_v23, %v1787_v15  ;;  %v1942_v16 = vmul.f32 %v5458_v27, %v1791_v39 }
 0x279   :  { %2233 = vperm.xlu1 %4667, %v1936_v14   ;;  %2230 = vperm.xlu0 %4666, %v1935_v17   ;;  %v1795_v14 = vrot.slane %v4936_v50, %v5449_v31 }
 0x27b   :  { %v1944_v17 = vmul.f32 %v5453_v21, %v1795_v14  ;;  %v1945_v15 = vmul.f32 %v5460_v38, %v1795_v14 }
 0x27d   :  { %2239 = vperm.xlu1 %4667, %v1938_v25   ;;  %2236 = vperm.xlu0 %4666, %v1937_v18   ;;  %v1943_v25 = vmul.f32 %v5466_v23, %v1791_v39  ;;  %v1946_v18 = vmul.f32 %v5458_v27, %v1795_v14 }
 0x281   :  { %2245 = vperm.xlu1 %4667, %v1940_v19   ;;  %2242 = vperm.xlu0 %4666, %v1939_v29   ;;  %v1799_v19 = vrot.slane %v4942_v53, %v5449_v31 }
 0x283   :  { %v1948_v29 = vmul.f32 %v5453_v21, %v1799_v19  ;;  %v1949_v39 = vmul.f32 %v5460_v38, %v1799_v19 }
 0x285   :  { %2251 = vperm.xlu1 %4667, %v1942_v16   ;;  %2248 = vperm.xlu0 %4666, %v1941_v12   ;;  %v1947_v16 = vmul.f32 %v5466_v23, %v1795_v14  ;;  %v1950_v12 = vmul.f32 %v5458_v27, %v1799_v19 }
 0x289   :  { %2257 = vperm.xlu1 %4667, %v1944_v17   ;;  %2254 = vperm.xlu0 %4666, %v1943_v25   ;;  %v1803_v17 = vrot.slane %v4940_v52, %v5449_v31 }
 0x28b   :  { %v1952_v25 = vmul.f32 %v5453_v21, %v1803_v17  ;;  %v1953_v14 = vmul.f32 %v5460_v38, %v1803_v17 }
 0x28d   :  { %2263 = vperm.xlu1 %4667, %v1946_v18   ;;  %2260 = vperm.xlu0 %4666, %v1945_v15   ;;  %v1951_v18 = vmul.f32 %v5466_v23, %v1799_v19  ;;  %v1954_v15 = vmul.f32 %v5458_v27, %v1803_v17 }
 0x291   :  { %2269 = vperm.xlu1 %4667, %v1948_v29   ;;  %2266 = vperm.xlu0 %4666, %v1947_v16   ;;  %v1807_v29 = vrot.slane %v4946_v55, %v5449_v31 }
 0x293   :  { %v1956_v16 = vmul.f32 %v5453_v21, %v1807_v29  ;;  %v1957_v19 = vmul.f32 %v5460_v38, %v1807_v29 }
 0x295   :  { %2275 = vperm.xlu1 %4667, %v1950_v12   ;;  %2272 = vperm.xlu0 %4666, %v1949_v39   ;;  %v1955_v12 = vmul.f32 %v5466_v23, %v1803_v17  ;;  %v1958_v39 = vmul.f32 %v5458_v27, %v1807_v29 }
 0x299   :  { %2281 = vperm.xlu1 %4667, %v1952_v25   ;;  %2278 = vperm.xlu0 %4666, %v1951_v18   ;;  %v1811_v25 = vrot.slane %v4944_v54, %v5449_v31 }
 0x29b   :  { %v1960_v18 = vmul.f32 %v5453_v21, %v1811_v25  ;;  %v1961_v17 = vmul.f32 %v5460_v38, %v1811_v25 }
 0x29d   :  { %2287 = vperm.xlu1 %4667, %v1954_v15   ;;  %2284 = vperm.xlu0 %4666, %v1953_v14   ;;  %v1959_v15 = vmul.f32 %v5466_v23, %v1807_v29  ;;  %v1962_v14 = vmul.f32 %v5458_v27, %v1811_v25 }
 0x2a1   :  { %2293 = vperm.xlu1 %4667, %v1956_v16   ;;  %2290 = vperm.xlu0 %4666, %v1955_v12   ;;  %v1815_v16 = vrot.slane %v4950_v57, %v5449_v31 }
 0x2a3   :  { %v1964_v12 = vmul.f32 %v5453_v21, %v1815_v16  ;;  %v1965_v29 = vmul.f32 %v5460_v38, %v1815_v16 }
 0x2a5   :  { %2299 = vperm.xlu1 %4667, %v1958_v39   ;;  %2296 = vperm.xlu0 %4666, %v1957_v19   ;;  %v1963_v39 = vmul.f32 %v5466_v23, %v1811_v25  ;;  %v1966_v19 = vmul.f32 %v5458_v27, %v1815_v16 }
 0x2a9   :  { %2305 = vperm.xlu1 %4667, %v1960_v18   ;;  %2302 = vperm.xlu0 %4666, %v1959_v15   ;;  %v1819_v18 = vrot.slane %v4948_v56, %v5449_v31 }
 0x2ab   :  { %v1968_v15 = vmul.f32 %v5453_v21, %v1819_v18  ;;  %v1969_v25 = vmul.f32 %v5460_v38, %v1819_v18 }
 0x2ad   :  { %2311 = vperm.xlu1 %4667, %v1962_v14   ;;  %2308 = vperm.xlu0 %4666, %v1961_v17   ;;  %v1967_v14 = vmul.f32 %v5466_v23, %v1815_v16  ;;  %v1970_v17 = vmul.f32 %v5458_v27, %v1819_v18 }
 0x2b1   :  { %2317 = vperm.xlu1 %4667, %v1964_v12   ;;  %2314 = vperm.xlu0 %4666, %v1963_v39   ;;  %v1823_v12 = vrot.slane %v4954_v59, %v5449_v31 }
 0x2b3   :  { %v1972_v39 = vmul.f32 %v5453_v21, %v1823_v12  ;;  %v1973_v16 = vmul.f32 %v5460_v38, %v1823_v12 }
 0x2b5   :  { %2323 = vperm.xlu1 %4667, %v1966_v19   ;;  %2320 = vperm.xlu0 %4666, %v1965_v29   ;;  %v1971_v19 = vmul.f32 %v5466_v23, %v1819_v18  ;;  %v1974_v29 = vmul.f32 %v5458_v27, %v1823_v12 }
 0x2b9   :  { %2329 = vperm.xlu1 %4667, %v1968_v15   ;;  %2326 = vperm.xlu0 %4666, %v1967_v14   ;;  %v1827_v15 = vrot.slane %v4952_v58, %v5449_v31 }
 0x2bb   :  { %v1976_v14 = vmul.f32 %v5453_v21, %v1827_v15  ;;  %v1977_v18 = vmul.f32 %v5460_v38, %v1827_v15 }
 0x2bd   :  { %2335 = vperm.xlu1 %4667, %v1970_v17   ;;  %2332 = vperm.xlu0 %4666, %v1969_v25   ;;  %v1975_v17 = vmul.f32 %v5466_v23, %v1823_v12  ;;  %v1978_v25 = vmul.f32 %v5458_v27, %v1827_v15 }
 0x2c1   :  { %2341 = vperm.xlu1 %4667, %v1972_v39   ;;  %2338 = vperm.xlu0 %4666, %v1971_v19   ;;  %v1831_v19 = vrot.slane %v4958_v61, %v5449_v31 }
 0x2c5   :  { %2347 = vperm.xlu1 %4667, %v1974_v29   ;;  %2344 = vperm.xlu0 %4666, %v1973_v16   ;;  %v1980_v29 = vmul.f32 %v5453_v21, %v1831_v19  ;;  %v1979_v16 = vmul.f32 %v5466_v23, %v1827_v15 }
 0x2c9   :  { %2353 = vperm.xlu1 %4667, %v1976_v14   ;;  %2350 = vperm.xlu0 %4666, %v1975_v17   ;;  %v1982_v14 = vmul.f32 %v5458_v27, %v1831_v19  ;;  %v1981_v17 = vmul.f32 %v5460_v38, %v1831_v19 }
 0x2cc   :  { %v5556_v39 = vpop.permute.xlu1 %2173 }
 0x2cd   :  { %7687 = vst [vmem:[#allocation131_spill] sm:$0xff] %v5556_v39  ;;  %2359 = vperm.xlu1 %4667, %v1978_v25   ;;  %2356 = vperm.xlu0 %4666, %v1977_v18   ;;  %v1835_v25 = vrot.slane %v4956_v60, %v5449_v31  ;;  %v1983_v18 = vmul.f32 %v5466_v23, %v1831_v19 }
 0x2cf   :  { %v1984_v15 = vmul.f32 %v5453_v21, %v1835_v25 }
 0x2d0   :  { %v5562_v24 = vpop.permute.xlu1 %2179  ;;  %v5564_v12 = vpop.permute.xlu0 %2176 }
 0x2d1   :  { %7688 = vst [vmem:[#allocation132_spill] sm:$0xff] %v5562_v24  ;;  %7689 = vst [vmem:[#allocation133_spill] sm:$0xff] %v5564_v12  ;;  %2365 = vperm.xlu1 %4667, %v1980_v29   ;;  %2362 = vperm.xlu0 %4666, %v1979_v16   ;;  %v1986_v16 = vmul.f32 %v5458_v27, %v1835_v25 }
 0x2d4   :  { %v5568_v33 = vpop.permute.xlu1 %2185  ;;  %v5570_v39 = vpop.permute.xlu0 %2182 }
 0x2d5   :  { %7690 = vst [vmem:[#allocation134_spill] sm:$0xff] %v5568_v33  ;;  %7691 = vst [vmem:[#allocation135_spill] sm:$0xff] %v5570_v39  ;;  %2371 = vperm.xlu1 %4667, %v1982_v14   ;;  %2368 = vperm.xlu0 %4666, %v1981_v17   ;;  %v1985_v33 = vmul.f32 %v5460_v38, %v1835_v25  ;;  %v1839_v14 = vrot.slane %v4962_v63, %v5449_v31 }
 0x2d6   :  { %v1987_v17 = vmul.f32 %v5466_v23, %v1835_v25 }
 0x2d7   :  { %v1988_v19 = vmul.f32 %v5453_v21, %v1839_v14 }
 0x2d8   :  { %v5576_v24 = vpop.permute.xlu1 %2191  ;;  %v5578_v29 = vpop.permute.xlu0 %2188 }
 0x2d9   :  { %7692 = vst [vmem:[#allocation136_spill] sm:$0xff] %v5576_v24  ;;  %7693 = vst [vmem:[#allocation137_spill] sm:$0xff] %v5578_v29  ;;  %2377 = vperm.xlu1 %4667, %v1984_v15   ;;  %2374 = vperm.xlu0 %4666, %v1983_v18   ;;  %v1990_v18 = vmul.f32 %v5458_v27, %v1839_v14 }
 0x2dc   :  { %v5582_v39 = vpop.permute.xlu1 %2197  ;;  %v5584_v12 = vpop.permute.xlu0 %2194 }
 0x2dd   :  { %7694 = vst [vmem:[#allocation138_spill] sm:$0xff] %v5582_v39  ;;  %7695 = vst [vmem:[#allocation139_spill] sm:$0xff] %v5584_v12  ;;  %2383 = vperm.xlu1 %4667, %v1986_v16   ;;  %2380 = vperm.xlu0 %4666, %v1985_v33   ;;  %v1989_v39 = vmul.f32 %v5460_v38, %v1839_v14  ;;  %v1843_v33 = vrot.slane %v4960_v62, %v5449_v31 }
 0x2de   :  { %v1991_v16 = vmul.f32 %v5466_v23, %v1839_v14 }
 0x2df   :  { %v1992_v25 = vmul.f32 %v5453_v21, %v1843_v33 }
 0x2e0   :  { %v5590_v24 = vpop.permute.xlu1 %2203  ;;  %v5592_v15 = vpop.permute.xlu0 %2200 }
 0x2e1   :  { %7696 = vst [vmem:[#allocation140_spill] sm:$0xff] %v5590_v24  ;;  %7697 = vst [vmem:[#allocation141_spill] sm:$0xff] %v5592_v15  ;;  %2389 = vperm.xlu1 %4667, %v1988_v19   ;;  %2386 = vperm.xlu0 %4666, %v1987_v17   ;;  %v1994_v17 = vmul.f32 %v5458_v27, %v1843_v33 }
 0x2e4   :  { %v5596_v12 = vpop.permute.xlu1 %2209  ;;  %v5598_v29 = vpop.permute.xlu0 %2206 }
 0x2e5   :  { %7698 = vst [vmem:[#allocation142_spill] sm:$0xff] %v5596_v12  ;;  %7699 = vst [vmem:[#allocation143_spill] sm:$0xff] %v5598_v29  ;;  %2395 = vperm.xlu1 %4667, %v1990_v18   ;;  %2392 = vperm.xlu0 %4666, %v1989_v39   ;;  %v1993_v12 = vmul.f32 %v5460_v38, %v1843_v33  ;;  %v1847_v39 = vrot.slane %v4966_v1, %v5449_v31 }
 0x2e6   :  { %v1995_v18 = vmul.f32 %v5466_v23, %v1843_v33 }
 0x2e7   :  { %v1996_v14 = vmul.f32 %v5453_v21, %v1847_v39 }
 0x2e8   :  { %v5604_v24 = vpop.permute.xlu1 %2215  ;;  %v5606_v19 = vpop.permute.xlu0 %2212 }
 0x2e9   :  { %7700 = vst [vmem:[#allocation144_spill] sm:$0xff] %v5604_v24  ;;  %7701 = vst [vmem:[#allocation145_spill] sm:$0xff] %v5606_v19  ;;  %2401 = vperm.xlu1 %4667, %v1992_v25   ;;  %2398 = vperm.xlu0 %4666, %v1991_v16   ;;  %v1998_v16 = vmul.f32 %v5458_v27, %v1847_v39 }
 0x2ec   :  { %v5610_v29 = vpop.permute.xlu1 %2221  ;;  %v5612_v15 = vpop.permute.xlu0 %2218 }
 0x2ed   :  { %7702 = vst [vmem:[#allocation146_spill] sm:$0xff] %v5610_v29  ;;  %7703 = vst [vmem:[#allocation147_spill] sm:$0xff] %v5612_v15  ;;  %2407 = vperm.xlu1 %4667, %v1994_v17   ;;  %2404 = vperm.xlu0 %4666, %v1993_v12   ;;  %v1997_v29 = vmul.f32 %v5460_v38, %v1847_v39  ;;  %v1851_v12 = vrot.slane %v4964_v0, %v5449_v31 }
 0x2ee   :  { %v1999_v17 = vmul.f32 %v5466_v23, %v1847_v39 }
 0x2ef   :  { %v2000_v33 = vmul.f32 %v5453_v21, %v1851_v12 }
 0x2f0   :  { %v5618_v24 = vpop.permute.xlu1 %2227  ;;  %v5620_v25 = vpop.permute.xlu0 %2224 }
 0x2f1   :  { %7704 = vst [vmem:[#allocation148_spill] sm:$0xff] %v5618_v24  ;;  %7705 = vst [vmem:[#allocation149_spill] sm:$0xff] %v5620_v25  ;;  %2413 = vperm.xlu1 %4667, %v1996_v14   ;;  %2410 = vperm.xlu0 %4666, %v1995_v18   ;;  %v2002_v18 = vmul.f32 %v5458_v27, %v1851_v12 }
 0x2f4   :  { %v5624_v15 = vpop.permute.xlu1 %2233  ;;  %v5626_v19 = vpop.permute.xlu0 %2230 }
 0x2f5   :  { %7706 = vst [vmem:[#allocation150_spill] sm:$0xff] %v5624_v15  ;;  %7707 = vst [vmem:[#allocation151_spill] sm:$0xff] %v5626_v19  ;;  %2419 = vperm.xlu1 %4667, %v1998_v16   ;;  %2416 = vperm.xlu0 %4666, %v1997_v29   ;;  %v2001_v15 = vmul.f32 %v5460_v38, %v1851_v12  ;;  %v1855_v29 = vrot.slane %v4970_v3, %v5449_v31 }
 0x2f6   :  { %v2003_v16 = vmul.f32 %v5466_v23, %v1851_v12 }
 0x2f7   :  { %v2004_v39 = vmul.f32 %v5453_v21, %v1855_v29 }
 0x2f8   :  { %v5632_v24 = vpop.permute.xlu1 %2239  ;;  %v5634_v14 = vpop.permute.xlu0 %2236 }
 0x2f9   :  { %7708 = vst [vmem:[#allocation152_spill] sm:$0xff] %v5632_v24  ;;  %7709 = vst [vmem:[#allocation153_spill] sm:$0xff] %v5634_v14  ;;  %2425 = vperm.xlu1 %4667, %v2000_v33   ;;  %2422 = vperm.xlu0 %4666, %v1999_v17   ;;  %v2006_v17 = vmul.f32 %v5458_v27, %v1855_v29 }
 0x2fc   :  { %v5638_v19 = vpop.permute.xlu1 %2245  ;;  %v5640_v25 = vpop.permute.xlu0 %2242 }
 0x2fd   :  { %7710 = vst [vmem:[#allocation154_spill] sm:$0xff] %v5638_v19  ;;  %7711 = vst [vmem:[#allocation155_spill] sm:$0xff] %v5640_v25  ;;  %2431 = vperm.xlu1 %4667, %v2002_v18   ;;  %2428 = vperm.xlu0 %4666, %v2001_v15   ;;  %v2005_v19 = vmul.f32 %v5460_v38, %v1855_v29  ;;  %v1859_v15 = vrot.slane %v4968_v2, %v5449_v31 }
 0x2fe   :  { %v2007_v18 = vmul.f32 %v5466_v23, %v1855_v29 }
 0x2ff   :  { %v2008_v12 = vmul.f32 %v5453_v21, %v1859_v15 }
 0x300   :  { %v5646_v24 = vpop.permute.xlu1 %2251  ;;  %v5648_v33 = vpop.permute.xlu0 %2248 }
 0x301   :  { %7712 = vst [vmem:[#allocation156_spill] sm:$0xff] %v5646_v24  ;;  %2437 = vperm.xlu1 %4667, %v2004_v39   ;;  %2434 = vperm.xlu0 %4666, %v2003_v16   ;;  %v2010_v16 = vmul.f32 %v5458_v27, %v1859_v15 }
 0x304   :  { %v5652_v25 = vpop.permute.xlu1 %2257  ;;  %v5654_v14 = vpop.permute.xlu0 %2254 }
 0x305   :  { %7713 = vst [vmem:[#allocation157_spill] sm:$0xff] %v5652_v25  ;;  %7714 = vst [vmem:[#allocation158_spill] sm:$0xff] %v5654_v14  ;;  %2443 = vperm.xlu1 %4667, %v2006_v17   ;;  %2440 = vperm.xlu0 %4666, %v2005_v19   ;;  %v2009_v25 = vmul.f32 %v5460_v38, %v1859_v15  ;;  %v1863_v19 = vrot.slane %v4974_v5, %v5449_v31 }
 0x306   :  { %v2011_v17 = vmul.f32 %v5466_v23, %v1859_v15 }
 0x307   :  { %v2012_v29 = vmul.f32 %v5453_v21, %v1863_v19 }
 0x308   :  { %v5660_v3 = vpop.permute.xlu1 %2263  ;;  %v5662_v39 = vpop.permute.xlu0 %2260 }
 0x309   :  { %7715 = vst [vmem:[#allocation159_spill] sm:$0xff] %v5660_v3  ;;  %2449 = vperm.xlu1 %4667, %v2008_v12   ;;  %2446 = vperm.xlu0 %4666, %v2007_v18   ;;  %v2014_v18 = vmul.f32 %v5458_v27, %v1863_v19 }
 0x30c   :  { %v5666_v14 = vpop.permute.xlu1 %2269  ;;  %v5668_v24 = vpop.permute.xlu0 %2266 }
 0x30d   :  { %7716 = vst [vmem:[#allocation160_spill] sm:$0xff] %v5666_v14  ;;  %7717 = vst [vmem:[#allocation161_spill] sm:$0xff] %v5668_v24  ;;  %2455 = vperm.xlu1 %4667, %v2010_v16   ;;  %2452 = vperm.xlu0 %4666, %v2009_v25   ;;  %v2013_v14 = vmul.f32 %v5460_v38, %v1863_v19  ;;  %v1867_v25 = vrot.slane %v4972_v4, %v5449_v31 }
 0x30e   :  { %v2015_v16 = vmul.f32 %v5466_v23, %v1863_v19 }
 0x30f   :  { %v2016_v15 = vmul.f32 %v5453_v21, %v1867_v25 }
 0x310   :  { %v5674_v2 = vpop.permute.xlu1 %2275  ;;  %v5676_v12 = vpop.permute.xlu0 %2272 }
 0x311   :  { %7718 = vst [vmem:[#allocation162_spill] sm:$0xff] %v5674_v2  ;;  %7719 = vst [vmem:[#allocation163_spill] sm:$0xff] %v5676_v12  ;;  %2461 = vperm.xlu1 %4667, %v2012_v29   ;;  %2458 = vperm.xlu0 %4666, %v2011_v17   ;;  %v2018_v17 = vmul.f32 %v5458_v27, %v1867_v25 }
 0x314   :  { %v5680_v24 = vpop.permute.xlu1 %2281  ;;  %v5682_v3 = vpop.permute.xlu0 %2278 }
 0x315   :  { %7720 = vst [vmem:[#allocation164_spill] sm:$0xff] %v5680_v24  ;;  %7721 = vst [vmem:[#allocation165_spill] sm:$0xff] %v5682_v3  ;;  %2467 = vperm.xlu1 %4667, %v2014_v18   ;;  %2464 = vperm.xlu0 %4666, %v2013_v14   ;;  %v2017_v24 = vmul.f32 %v5460_v38, %v1867_v25  ;;  %v1871_v14 = vrot.slane %v4978_v7, %v5449_v31 }
 0x316   :  { %v2019_v18 = vmul.f32 %v5466_v23, %v1867_v25 }
 0x317   :  { %v2020_v19 = vmul.f32 %v5453_v21, %v1871_v14 }
 0x318   :  { %v5688_v2 = vpop.permute.xlu1 %2287  ;;  %v5690_v29 = vpop.permute.xlu0 %2284 }
 0x319   :  { %7722 = vst [vmem:[#allocation166_spill] sm:$0xff] %v5688_v2  ;;  %7723 = vst [vmem:[#allocation167_spill] sm:$0xff] %v5690_v29  ;;  %2473 = vperm.xlu1 %4667, %v2016_v15   ;;  %2470 = vperm.xlu0 %4666, %v2015_v16   ;;  %v2022_v16 = vmul.f32 %v5458_v27, %v1871_v14 }
 0x31c   :  { %v5694_v3 = vpop.permute.xlu1 %2293  ;;  %v5696_v12 = vpop.permute.xlu0 %2290 }
 0x31d   :  { %7724 = vst [vmem:[#allocation168_spill] sm:$0xff] %v5694_v3  ;;  %7725 = vst [vmem:[#allocation169_spill] sm:$0xff] %v5696_v12  ;;  %2479 = vperm.xlu1 %4667, %v2018_v17   ;;  %2476 = vperm.xlu0 %4666, %v2017_v24   ;;  %v2021_v3 = vmul.f32 %v5460_v38, %v1871_v14  ;;  %v1875_v24 = vrot.slane %v4976_v6, %v5449_v31  ;;  %v7864_v6 = vld [vmem:[#allocation161_spill] sm:$0xff] }
 0x31e   :  { %v2023_v17 = vmul.f32 %v5466_v23, %v1871_v14  ;;  %v2706_v7 = vrot.slane %v7864_v6, %v4922_v43 }
 0x31f   :  { %v2024_v25 = vmul.f32 %v5453_v21, %v1875_v24 }
 0x320   :  { %v5702_v2 = vpop.permute.xlu1 %2299  ;;  %v5704_v15 = vpop.permute.xlu0 %2296 }
 0x321   :  { %7726 = vst [vmem:[#allocation170_spill] sm:$0xff] %v5702_v2  ;;  %7727 = vst [vmem:[#allocation171_spill] sm:$0xff] %v5704_v15  ;;  %2485 = vperm.xlu1 %4667, %v2020_v19   ;;  %2482 = vperm.xlu0 %4666, %v2019_v18   ;;  %v2026_v18 = vmul.f32 %v5458_v27, %v1875_v24 }
 0x324   :  { %v5708_v12 = vpop.permute.xlu1 %2305  ;;  %v5710_v29 = vpop.permute.xlu0 %2302 }
 0x325   :  { %7728 = vst [vmem:[#allocation172_spill] sm:$0xff] %v5708_v12  ;;  %7729 = vst [vmem:[#allocation173_spill] sm:$0xff] %v5710_v29  ;;  %2491 = vperm.xlu1 %4667, %v2022_v16   ;;  %2488 = vperm.xlu0 %4666, %v2021_v3   ;;  %v2025_v12 = vmul.f32 %v5460_v38, %v1875_v24  ;;  %v1879_v3 = vrot.slane %v4982_v9, %v5449_v31 }
 0x326   :  { %v2027_v16 = vmul.f32 %v5466_v23, %v1875_v24 }
 0x327   :  { %v2028_v14 = vmul.f32 %v5453_v21, %v1879_v3 }
 0x328   :  { %v5716_v2 = vpop.permute.xlu1 %2311  ;;  %v5718_v19 = vpop.permute.xlu0 %2308 }
 0x329   :  { %7730 = vst [vmem:[#allocation174_spill] sm:$0xff] %v5716_v2  ;;  %7731 = vst [vmem:[#allocation175_spill] sm:$0xff] %v5718_v19  ;;  %2497 = vperm.xlu1 %4667, %v2024_v25   ;;  %2494 = vperm.xlu0 %4666, %v2023_v17   ;;  %v2030_v17 = vmul.f32 %v5458_v27, %v1879_v3 }
 0x32c   :  { %v5722_v29 = vpop.permute.xlu1 %2317  ;;  %v5724_v15 = vpop.permute.xlu0 %2314 }
 0x32d   :  { %7732 = vst [vmem:[#allocation176_spill] sm:$0xff] %v5722_v29  ;;  %7733 = vst [vmem:[#allocation177_spill] sm:$0xff] %v5724_v15  ;;  %2503 = vperm.xlu1 %4667, %v2026_v18   ;;  %2500 = vperm.xlu0 %4666, %v2025_v12   ;;  %v2029_v29 = vmul.f32 %v5460_v38, %v1879_v3  ;;  %v1883_v12 = vrot.slane %v4980_v8, %v5449_v31 }
 0x32e   :  { %v2031_v18 = vmul.f32 %v5466_v23, %v1879_v3 }
 0x32f   :  { %v2032_v24 = vmul.f32 %v5453_v21, %v1883_v12 }
 0x330   :  { %v5730_v2 = vpop.permute.xlu1 %2323  ;;  %v5732_v25 = vpop.permute.xlu0 %2320 }
 0x331   :  { %7734 = vst [vmem:[#allocation178_spill] sm:$0xff] %v5730_v2  ;;  %7735 = vst [vmem:[#allocation179_spill] sm:$0xff] %v5732_v25  ;;  %2509 = vperm.xlu1 %4667, %v2028_v14   ;;  %2506 = vperm.xlu0 %4666, %v2027_v16   ;;  %v2034_v16 = vmul.f32 %v5458_v27, %v1883_v12 }
 0x334   :  { %v5736_v15 = vpop.permute.xlu1 %2329  ;;  %v5738_v19 = vpop.permute.xlu0 %2326 }
 0x335   :  { %7736 = vst [vmem:[#allocation180_spill] sm:$0xff] %v5736_v15  ;;  %7737 = vst [vmem:[#allocation181_spill] sm:$0xff] %v5738_v19  ;;  %2515 = vperm.xlu1 %4667, %v2030_v17   ;;  %2512 = vperm.xlu0 %4666, %v2029_v29   ;;  %v2033_v15 = vmul.f32 %v5460_v38, %v1883_v12  ;;  %v1887_v29 = vrot.slane %v4986_v11, %v5449_v31 }
 0x336   :  { %v2035_v17 = vmul.f32 %v5466_v23, %v1883_v12 }
 0x337   :  { %v2036_v3 = vmul.f32 %v5453_v21, %v1887_v29 }
 0x338   :  { %v5744_v2 = vpop.permute.xlu1 %2335  ;;  %v5746_v14 = vpop.permute.xlu0 %2332 }
 0x339   :  { %7738 = vst [vmem:[#allocation182_spill] sm:$0xff] %v5744_v2  ;;  %7739 = vst [vmem:[#allocation183_spill] sm:$0xff] %v5746_v14  ;;  %2521 = vperm.xlu1 %4667, %v2032_v24   ;;  %2518 = vperm.xlu0 %4666, %v2031_v18   ;;  %v2038_v18 = vmul.f32 %v5458_v27, %v1887_v29 }
 0x33c   :  { %v5750_v19 = vpop.permute.xlu1 %2341  ;;  %v5752_v25 = vpop.permute.xlu0 %2338 }
 0x33d   :  { %7740 = vst [vmem:[#allocation184_spill] sm:$0xff] %v5750_v19  ;;  %7741 = vst [vmem:[#allocation185_spill] sm:$0xff] %v5752_v25  ;;  %2527 = vperm.xlu1 %4667, %v2034_v16   ;;  %2524 = vperm.xlu0 %4666, %v2033_v15   ;;  %v2037_v19 = vmul.f32 %v5460_v38, %v1887_v29  ;;  %v1891_v15 = vrot.slane %v4984_v10, %v5449_v31 }
 0x33e   :  { %v2039_v16 = vmul.f32 %v5466_v23, %v1887_v29 }
 0x33f   :  { %v2040_v12 = vmul.f32 %v5453_v21, %v1891_v15  ;;  %v4661_v21 = vld [vmem:[%s7548_s1 + $0x2] ss:$0 sm:$0xff]  ;;  %v2043_v31 = vmul.f32 %v5466_v23, %v1891_v15 }
 0x340   :  { %v5758_v2 = vpop.permute.xlu1 %2347  ;;  %v5760_v24 = vpop.permute.xlu0 %2344 }
 0x341   :  { %7742 = vst [vmem:[#allocation186_spill] sm:$0xff] %v5758_v2  ;;  %7743 = vst [vmem:[#allocation187_spill] sm:$0xff] %v5760_v24  ;;  %2533 = vperm.xlu1 %4667, %v2036_v3   ;;  %2530 = vperm.xlu0 %4666, %v2035_v17   ;;  %v2042_v17 = vmul.f32 %v5458_v27, %v1891_v15  ;;  %v7852_v24 = vld [vmem:[#allocation148_spill] sm:$0xff] }
 0x342   :  { %v2644_v9 = vrot.slane %v7852_v24, %v4919_v42 }
 0x344   :  { %v5764_v25 = vpop.permute.xlu1 %2353  ;;  %v5766_v14 = vpop.permute.xlu0 %2350 }
 0x345   :  { %7744 = vst [vmem:[#allocation188_spill] sm:$0xff] %v5764_v25  ;;  %7745 = vst [vmem:[#allocation189_spill] sm:$0xff] %v5766_v14  ;;  %2539 = vperm.xlu1 %4667, %v2038_v18   ;;  %2536 = vperm.xlu0 %4666, %v2037_v19   ;;  %v2041_v25 = vmul.f32 %v5460_v38, %v1891_v15 }
 0x348   :  { %v5772_v11 = vpop.permute.xlu1 %2359  ;;  %v5774_v3 = vpop.permute.xlu0 %2356 }
 0x349   :  { %7746 = vst [vmem:[#allocation190_spill] sm:$0xff] %v5772_v11  ;;  %7747 = vst [vmem:[#allocation191_spill] sm:$0xff] %v5774_v3  ;;  %2545 = vperm.xlu1 %4667, %v2040_v12   ;;  %2542 = vperm.xlu0 %4666, %v2039_v16  }
 0x34c   :  { %v5778_v14 = vpop.permute.xlu1 %2365  ;;  %v5780_v2 = vpop.permute.xlu0 %2362 }
 0x34d   :  { %7748 = vst [vmem:[#allocation192_spill] sm:$0xff] %v5778_v14  ;;  %7749 = vst [vmem:[#allocation193_spill] sm:$0xff] %v5780_v2  ;;  %2551 = vperm.xlu1 %4667, %v2042_v17   ;;  %2548 = vperm.xlu0 %4666, %v2041_v25   ;;  %v7848_v2 = vld [vmem:[#allocation149_spill] sm:$0xff] }
 0x34e   :  { %v2639_v10 = vrot.slane %v7848_v2, %v4916_v41  ;;  %v7851_v2 = vld [vmem:[#allocation146_spill] sm:$0xff] }
 0x350   :  { %v5786_v19 = vpop.permute.xlu1 %2371  ;;  %v5788_v29 = vpop.permute.xlu0 %2368 }
 0x351   :  { %7750 = vst [vmem:[#allocation194_spill] sm:$0xff] %v5786_v19  ;;  %7751 = vst [vmem:[#allocation195_spill] sm:$0xff] %v5788_v29  ;;  %2554 = vperm.xlu0 %4666, %v2043_v31   ;;  %3335 = vbcast.lane.b32.xlu1 %v4661_v21, 256 }
 0x354   :  { %v5790_v27 = vpop.permute.xlu1 %2377  ;;  %v5792_v38 = vpop.permute.xlu0 %2374 }
 0x355   :  { %7752 = vst [vmem:[#allocation196_spill] sm:$0xff] %v5790_v27  ;;  %7753 = vst [vmem:[#allocation197_spill] sm:$0xff] %v5792_v38  ;;  %3343 = vbcast.lane.b32.xlu1 %v4661_v21, 272  ;;  %3339 = vbcast.lane.b32.xlu0 %v4661_v21, 264 }
 0x358   :  { %v5794_v18 = vpop.permute.xlu1 %2383  ;;  %v5796_v25 = vpop.permute.xlu0 %2380 }
 0x359   :  { %7754 = vst [vmem:[#allocation198_spill] sm:$0xff] %v5794_v18  ;;  %7755 = vst [vmem:[#allocation199_spill] sm:$0xff] %v5796_v25  ;;  %3347 = vbcast.lane.b32.xlu0 %v4661_v21, 280 }
 0x35c   :  { %v5798_v12 = vpop.permute.xlu1 %2389  ;;  %v5800_v23 = vpop.permute.xlu0 %2386 }
 0x35d   :  { %7756 = vst [vmem:[#allocation200_spill] sm:$0xff] %v5798_v12  ;;  %7757 = vst [vmem:[#allocation201_spill] sm:$0xff] %v5800_v23 }
 0x360   :  { %v5802_v15 = vpop.permute.xlu1 %2395  ;;  %v5804_v16 = vpop.permute.xlu0 %2392 }
 0x361   :  { %7758 = vst [vmem:[#allocation202_spill] sm:$0xff] %v5802_v15  ;;  %7759 = vst [vmem:[#allocation203_spill] sm:$0xff] %v5804_v16 }
 0x364   :  { %v5806_v17 = vpop.permute.xlu1 %2401  ;;  %v5808_v31 = vpop.permute.xlu0 %2398 }
 0x365   :  { %7760 = vst [vmem:[#allocation204_spill] sm:$0xff] %v5806_v17  ;;  %7761 = vst [vmem:[#allocation205_spill] sm:$0xff] %v5808_v31 }
 0x368   :  { %v5810_v38 = vpop.permute.xlu1 %2407  ;;  %v5812_v27 = vpop.permute.xlu0 %2404 }
 0x369   :  { %7762 = vst [vmem:[#allocation206_spill] sm:$0xff] %v5810_v38  ;;  %7763 = vst [vmem:[#allocation207_spill] sm:$0xff] %v5812_v27 }
 0x36c   :  { %v5814_v18 = vpop.permute.xlu1 %2413  ;;  %v5816_v25 = vpop.permute.xlu0 %2410 }
 0x36d   :  { %7764 = vst [vmem:[#allocation208_spill] sm:$0xff] %v5814_v18  ;;  %7765 = vst [vmem:[#allocation209_spill] sm:$0xff] %v5816_v25 }
 0x370   :  { %v5818_v21 = vpop.permute.xlu1 %2419  ;;  %v5820_v12 = vpop.permute.xlu0 %2416 }
 0x371   :  { %7766 = vst [vmem:[#allocation210_spill] sm:$0xff] %v5818_v21  ;;  %7767 = vst [vmem:[#allocation211_spill] sm:$0xff] %v5820_v12 }
 0x374   :  { %v5822_v23 = vpop.permute.xlu1 %2425  ;;  %v5824_v15 = vpop.permute.xlu0 %2422 }
 0x375   :  { %7768 = vst [vmem:[#allocation212_spill] sm:$0xff] %v5822_v23  ;;  %7769 = vst [vmem:[#allocation213_spill] sm:$0xff] %v5824_v15 }
 0x378   :  { %v5826_v16 = vpop.permute.xlu1 %2431  ;;  %v5828_v17 = vpop.permute.xlu0 %2428 }
 0x379   :  { %7770 = vst [vmem:[#allocation214_spill] sm:$0xff] %v5826_v16  ;;  %7771 = vst [vmem:[#allocation215_spill] sm:$0xff] %v5828_v17 }
 0x37c   :  { %v5830_v31 = vpop.permute.xlu1 %2437  ;;  %v5832_v38 = vpop.permute.xlu0 %2434 }
 0x37d   :  { %7772 = vst [vmem:[#allocation216_spill] sm:$0xff] %v5830_v31  ;;  %7773 = vst [vmem:[#allocation217_spill] sm:$0xff] %v5832_v38 }
 0x380   :  { %v5834_v27 = vpop.permute.xlu1 %2443  ;;  %v5836_v18 = vpop.permute.xlu0 %2440 }
 0x381   :  { %7774 = vst [vmem:[#allocation218_spill] sm:$0xff] %v5834_v27  ;;  %7775 = vst [vmem:[#allocation219_spill] sm:$0xff] %v5836_v18 }
 0x384   :  { %v5838_v25 = vpop.permute.xlu1 %2449  ;;  %v5840_v21 = vpop.permute.xlu0 %2446 }
 0x385   :  { %7776 = vst [vmem:[#allocation220_spill] sm:$0xff] %v5838_v25  ;;  %7777 = vst [vmem:[#allocation221_spill] sm:$0xff] %v5840_v21 }
 0x388   :  { %v5842_v12 = vpop.permute.xlu1 %2455  ;;  %v5844_v23 = vpop.permute.xlu0 %2452 }
 0x389   :  { %7778 = vst [vmem:[#allocation222_spill] sm:$0xff] %v5842_v12  ;;  %7779 = vst [vmem:[#allocation223_spill] sm:$0xff] %v5844_v23 }
 0x38c   :  { %v5846_v15 = vpop.permute.xlu1 %2461  ;;  %v5848_v16 = vpop.permute.xlu0 %2458 }
 0x38d   :  { %7780 = vst [vmem:[#allocation224_spill] sm:$0xff] %v5846_v15  ;;  %7781 = vst [vmem:[#allocation225_spill] sm:$0xff] %v5848_v16 }
 0x390   :  { %v5850_v17 = vpop.permute.xlu1 %2467  ;;  %v5852_v31 = vpop.permute.xlu0 %2464 }
 0x391   :  { %7782 = vst [vmem:[#allocation226_spill] sm:$0xff] %v5850_v17  ;;  %7783 = vst [vmem:[#allocation227_spill] sm:$0xff] %v5852_v31 }
 0x394   :  { %v5854_v38 = vpop.permute.xlu1 %2473  ;;  %v5856_v27 = vpop.permute.xlu0 %2470 }
 0x395   :  { %7784 = vst [vmem:[#allocation228_spill] sm:$0xff] %v5854_v38  ;;  %7785 = vst [vmem:[#allocation229_spill] sm:$0xff] %v5856_v27 }
 0x398   :  { %v5858_v18 = vpop.permute.xlu1 %2479  ;;  %v5860_v25 = vpop.permute.xlu0 %2476 }
 0x399   :  { %7786 = vst [vmem:[#allocation230_spill] sm:$0xff] %v5858_v18  ;;  %7787 = vst [vmem:[#allocation231_spill] sm:$0xff] %v5860_v25 }
 0x39c   :  { %v5862_v21 = vpop.permute.xlu1 %2485  ;;  %v5864_v12 = vpop.permute.xlu0 %2482 }
 0x39d   :  { %7788 = vst [vmem:[#allocation232_spill] sm:$0xff] %v5862_v21  ;;  %7789 = vst [vmem:[#allocation233_spill] sm:$0xff] %v5864_v12 }
 0x3a0   :  { %v5866_v23 = vpop.permute.xlu1 %2491  ;;  %v5868_v15 = vpop.permute.xlu0 %2488 }
 0x3a1   :  { %7790 = vst [vmem:[#allocation234_spill] sm:$0xff] %v5866_v23  ;;  %7791 = vst [vmem:[#allocation235_spill] sm:$0xff] %v5868_v15 }
 0x3a4   :  { %v5870_v16 = vpop.permute.xlu1 %2497  ;;  %v5872_v17 = vpop.permute.xlu0 %2494 }
 0x3a5   :  { %7792 = vst [vmem:[#allocation236_spill] sm:$0xff] %v5870_v16  ;;  %7793 = vst [vmem:[#allocation237_spill] sm:$0xff] %v5872_v17 }
 0x3a8   :  { %v5874_v31 = vpop.permute.xlu1 %2503  ;;  %v5876_v38 = vpop.permute.xlu0 %2500 }
 0x3a9   :  { %7794 = vst [vmem:[#allocation238_spill] sm:$0xff] %v5874_v31  ;;  %7795 = vst [vmem:[#allocation239_spill] sm:$0xff] %v5876_v38 }
 0x3ac   :  { %v5878_v27 = vpop.permute.xlu1 %2509  ;;  %v5880_v18 = vpop.permute.xlu0 %2506 }
 0x3ad   :  { %7796 = vst [vmem:[#allocation240_spill] sm:$0xff] %v5878_v27  ;;  %7797 = vst [vmem:[#allocation241_spill] sm:$0xff] %v5880_v18 }
 0x3b0   :  { %v5882_v25 = vpop.permute.xlu1 %2515  ;;  %v5884_v21 = vpop.permute.xlu0 %2512 }
 0x3b1   :  { %7798 = vst [vmem:[#allocation242_spill] sm:$0xff] %v5882_v25  ;;  %7799 = vst [vmem:[#allocation243_spill] sm:$0xff] %v5884_v21 }
 0x3b4   :  { %v5886_v12 = vpop.permute.xlu1 %2521  ;;  %v5888_v23 = vpop.permute.xlu0 %2518 }
 0x3b5   :  { %7800 = vst [vmem:[#allocation244_spill] sm:$0xff] %v5886_v12  ;;  %7801 = vst [vmem:[#allocation245_spill] sm:$0xff] %v5888_v23 }
 0x3b8   :  { %v5890_v15 = vpop.permute.xlu1 %2527  ;;  %v5892_v16 = vpop.permute.xlu0 %2524 }
 0x3b9   :  { %7802 = vst [vmem:[#allocation246_spill] sm:$0xff] %v5890_v15  ;;  %7803 = vst [vmem:[#allocation247_spill] sm:$0xff] %v5892_v16  ;;  %v5911_v15 = vsub.s32 2, %v4910_v34 }
 0x3bb   :  { %v3208_v34 = vrot.slane %v4930_v47, %v5911_v15  ;;  %v3212_v19 = vrot.slane %v4924_v44, %v5911_v15 }
 0x3bc   :  { %v5894_v17 = vpop.permute.xlu1 %2533  ;;  %v5896_v31 = vpop.permute.xlu0 %2530 }
 0x3bd   :  { %7804 = vst [vmem:[#allocation248_spill] sm:$0xff] %v5894_v17  ;;  %7805 = vst [vmem:[#allocation249_spill] sm:$0xff] %v5896_v31  ;;  %v3204_v17 = vrot.slane %v4926_v45, %v5911_v15 }
 0x3c0   :  { %v5898_v38 = vpop.permute.xlu1 %2539  ;;  %v5900_v27 = vpop.permute.xlu0 %2536 }
 0x3c1   :  { %7806 = vst [vmem:[#allocation250_spill] sm:$0xff] %v5898_v38  ;;  %7807 = vst [vmem:[#allocation251_spill] sm:$0xff] %v5900_v27 }
 0x3c4   :  { %v5902_v18 = vpop.permute.xlu1 %2545  ;;  %v5904_v25 = vpop.permute.xlu0 %2542 }
 0x3c5   :  { %7808 = vst [vmem:[#allocation252_spill] sm:$0xff] %v5902_v18  ;;  %7809 = vst [vmem:[#allocation253_spill] sm:$0xff] %v5904_v25 }
 0x3c8   :  { %v5906_v21 = vpop.permute.xlu1 %2551  ;;  %v5908_v12 = vpop.permute.xlu0 %2548 }
 0x3c9   :  { %7810 = vst [vmem:[#allocation254_spill] sm:$0xff] %v5906_v21  ;;  %7811 = vst [vmem:[#allocation255_spill] sm:$0xff] %v5908_v12 }
 0x3cc   :  { %v5915_v23 = vpop.permute.xlu1 %3335  ;;  %v5917_v31 = vpop.permute.xlu0 %2554 }
 0x3cd   :  { %7812 = vst [vmem:[#allocation256_spill] sm:$0xff] %v5917_v31  ;;  %v3353_v38 = vmul.f32 %v5915_v23, %v3204_v17  ;;  %v3357_v31 = vmul.f32 %v5915_v23, %v3208_v34  ;;  %v3361_v47 = vmul.f32 %v5915_v23, %v3212_v19 }
 0x3cf   :  { %3610 = vperm.xlu1 %4667, %v3353_v38  }
 0x3d0   :  { %v5920_v18 = vpop.permute.xlu1 %3343  ;;  %v5922_v25 = vpop.permute.xlu0 %3339 }
 0x3d1   :  { %v3355_v21 = vmul.f32 %v5920_v18, %v3204_v17  ;;  %v3354_v12 = vmul.f32 %v5922_v25, %v3204_v17  ;;  %v3359_v38 = vmul.f32 %v5920_v18, %v3208_v34  ;;  %v3358_v16 = vmul.f32 %v5922_v25, %v3208_v34 }
 0x3d3   :  { %3616 = vperm.xlu1 %4667, %v3355_v21   ;;  %3613 = vperm.xlu0 %4666, %v3354_v12   ;;  %v3363_v21 = vmul.f32 %v5920_v18, %v3212_v19 }
 0x3d4   :  { %v5928_v45 = vpop.permute.xlu0 %3347 }
 0x3d5   :  { %v3356_v27 = vmul.f32 %v5928_v45, %v3204_v17  ;;  %v3360_v12 = vmul.f32 %v5928_v45, %v3208_v34  ;;  %v3362_v17 = vmul.f32 %v5922_v25, %v3212_v19  ;;  %v3364_v44 = vmul.f32 %v5928_v45, %v3212_v19 }
 0x3d7   :  { %3622 = vperm.xlu1 %4667, %v3357_v31   ;;  %3619 = vperm.xlu0 %4666, %v3356_v27   ;;  %v3216_v27 = vrot.slane %v4928_v46, %v5911_v15 }
 0x3d9   :  { %v3365_v31 = vmul.f32 %v5915_v23, %v3216_v27  ;;  %v3366_v34 = vmul.f32 %v5922_v25, %v3216_v27  ;;  %v3368_v46 = vmul.f32 %v5928_v45, %v3216_v27 }
 0x3db   :  { %3628 = vperm.xlu1 %4667, %v3359_v38   ;;  %3625 = vperm.xlu0 %4666, %v3358_v16   ;;  %v3367_v16 = vmul.f32 %v5920_v18, %v3216_v27  ;;  %v3220_v38 = vrot.slane %v4934_v49, %v5911_v15 }
 0x3dd   :  { %v3370_v19 = vmul.f32 %v5922_v25, %v3220_v38  ;;  %v3372_v49 = vmul.f32 %v5928_v45, %v3220_v38 }
 0x3df   :  { %3634 = vperm.xlu1 %4667, %v3361_v47   ;;  %3631 = vperm.xlu0 %4666, %v3360_v12   ;;  %v3369_v47 = vmul.f32 %v5915_v23, %v3220_v38  ;;  %v3371_v12 = vmul.f32 %v5920_v18, %v3220_v38 }
 0x3e3   :  { %3640 = vperm.xlu1 %4667, %v3363_v21   ;;  %3637 = vperm.xlu0 %4666, %v3362_v17   ;;  %v3224_v21 = vrot.slane %v4932_v48, %v5911_v15 }
 0x3e5   :  { %v3373_v17 = vmul.f32 %v5915_v23, %v3224_v21  ;;  %v3374_v27 = vmul.f32 %v5922_v25, %v3224_v21  ;;  %v3376_v48 = vmul.f32 %v5928_v45, %v3224_v21 }
 0x3e7   :  { %3646 = vperm.xlu1 %4667, %v3365_v31   ;;  %3643 = vperm.xlu0 %4666, %v3364_v44   ;;  %v3375_v31 = vmul.f32 %v5920_v18, %v3224_v21  ;;  %v3228_v44 = vrot.slane %v4938_v51, %v5911_v15  ;;  %v3236_v21 = vrot.slane %v4942_v53, %v5911_v15 }
 0x3e9   :  { %v3378_v38 = vmul.f32 %v5922_v25, %v3228_v44  ;;  %v3380_v51 = vmul.f32 %v5928_v45, %v3228_v44  ;;  %v3388_v53 = vmul.f32 %v5928_v45, %v3236_v21 }
 0x3eb   :  { %3652 = vperm.xlu1 %4667, %v3367_v16   ;;  %3649 = vperm.xlu0 %4666, %v3366_v34   ;;  %v3377_v16 = vmul.f32 %v5915_v23, %v3228_v44  ;;  %v3379_v34 = vmul.f32 %v5920_v18, %v3228_v44 }
 0x3ef   :  { %3658 = vperm.xlu1 %4667, %v3369_v47   ;;  %3655 = vperm.xlu0 %4666, %v3368_v46   ;;  %v3232_v47 = vrot.slane %v4936_v50, %v5911_v15 }
 0x3f1   :  { %v3381_v46 = vmul.f32 %v5915_v23, %v3232_v47  ;;  %v3384_v50 = vmul.f32 %v5928_v45, %v3232_v47 }
 0x3f3   :  { %3664 = vperm.xlu1 %4667, %v3371_v12   ;;  %3661 = vperm.xlu0 %4666, %v3370_v19   ;;  %v3383_v12 = vmul.f32 %v5920_v18, %v3232_v47  ;;  %v3382_v19 = vmul.f32 %v5922_v25, %v3232_v47 }
 0x3f7   :  { %3670 = vperm.xlu1 %4667, %v3373_v17   ;;  %3667 = vperm.xlu0 %4666, %v3372_v49   ;;  %v3385_v17 = vmul.f32 %v5915_v23, %v3236_v21  ;;  %v3387_v49 = vmul.f32 %v5920_v18, %v3236_v21 }
 0x3fb   :  { %3676 = vperm.xlu1 %4667, %v3375_v31   ;;  %3673 = vperm.xlu0 %4666, %v3374_v27   ;;  %v3386_v31 = vmul.f32 %v5922_v25, %v3236_v21  ;;  %v3240_v27 = vrot.slane %v4940_v52, %v5911_v15 }
 0x3fd   :  { %v3389_v44 = vmul.f32 %v5915_v23, %v3240_v27  ;;  %v3392_v52 = vmul.f32 %v5928_v45, %v3240_v27 }
 0x3ff   :  { %3682 = vperm.xlu1 %4667, %v3377_v16   ;;  %3679 = vperm.xlu0 %4666, %v3376_v48   ;;  %v3391_v16 = vmul.f32 %v5920_v18, %v3240_v27  ;;  %v3390_v48 = vmul.f32 %v5922_v25, %v3240_v27  ;;  %v3256_v27 = vrot.slane %v4948_v56, %v5911_v15 }
 0x401   :  { %v3408_v56 = vmul.f32 %v5928_v45, %v3256_v27 }
 0x403   :  { %3688 = vperm.xlu1 %4667, %v3379_v34   ;;  %3685 = vperm.xlu0 %4666, %v3378_v38   ;;  %v3244_v34 = vrot.slane %v4946_v55, %v5911_v15 }
 0x405   :  { %v3393_v38 = vmul.f32 %v5915_v23, %v3244_v34  ;;  %v3395_v47 = vmul.f32 %v5920_v18, %v3244_v34  ;;  %v3396_v55 = vmul.f32 %v5928_v45, %v3244_v34 }
 0x407   :  { %3694 = vperm.xlu1 %4667, %v3381_v46   ;;  %3691 = vperm.xlu0 %4666, %v3380_v51   ;;  %v3394_v46 = vmul.f32 %v5922_v25, %v3244_v34  ;;  %v3248_v51 = vrot.slane %v4944_v54, %v5911_v15 }
 0x409   :  { %v3398_v21 = vmul.f32 %v5922_v25, %v3248_v51  ;;  %v3400_v54 = vmul.f32 %v5928_v45, %v3248_v51 }
 0x40b   :  { %3700 = vperm.xlu1 %4667, %v3383_v12   ;;  %3697 = vperm.xlu0 %4666, %v3382_v19   ;;  %v3397_v12 = vmul.f32 %v5915_v23, %v3248_v51  ;;  %v3399_v19 = vmul.f32 %v5920_v18, %v3248_v51 }
 0x40f   :  { %3706 = vperm.xlu1 %4667, %v3385_v17   ;;  %3703 = vperm.xlu0 %4666, %v3384_v50   ;;  %v3252_v17 = vrot.slane %v4950_v57, %v5911_v15 }
 0x411   :  { %v3401_v50 = vmul.f32 %v5915_v23, %v3252_v17  ;;  %v3404_v57 = vmul.f32 %v5928_v45, %v3252_v17 }
 0x413   :  { %3712 = vperm.xlu1 %4667, %v3387_v49   ;;  %3709 = vperm.xlu0 %4666, %v3386_v31   ;;  %v3403_v49 = vmul.f32 %v5920_v18, %v3252_v17  ;;  %v3402_v31 = vmul.f32 %v5922_v25, %v3252_v17 }
 0x417   :  { %3718 = vperm.xlu1 %4667, %v3389_v44   ;;  %3715 = vperm.xlu0 %4666, %v3388_v53   ;;  %v3405_v44 = vmul.f32 %v5915_v23, %v3256_v27  ;;  %v3407_v53 = vmul.f32 %v5920_v18, %v3256_v27 }
 0x41b   :  { %3724 = vperm.xlu1 %4667, %v3391_v16   ;;  %3721 = vperm.xlu0 %4666, %v3390_v48   ;;  %v3406_v16 = vmul.f32 %v5922_v25, %v3256_v27  ;;  %v3260_v48 = vrot.slane %v4954_v59, %v5911_v15  ;;  %v1121_v27 = vrot.slane %v5102_v36, %v4919_v42 }
 0x41c   :  { %v1128_v36 = vrot.slane %v5108_v13, %v4922_v43 }
 0x41d   :  { %v3409_v34 = vmul.f32 %v5915_v23, %v3260_v48  ;;  %v3412_v59 = vmul.f32 %v5928_v45, %v3260_v48 }
 0x41f   :  { %3730 = vperm.xlu1 %4667, %v3393_v38   ;;  %3727 = vperm.xlu0 %4666, %v3392_v52   ;;  %v3411_v38 = vmul.f32 %v5920_v18, %v3260_v48  ;;  %v3410_v52 = vmul.f32 %v5922_v25, %v3260_v48  ;;  %v6065_v48 = vrot.slane %v4964_v0, %v5911_v15 }
 0x421   :  { %v3437_v6 = vmul.f32 %v5915_v23, %v6065_v48 }
 0x423   :  { %3736 = vperm.xlu1 %4667, %v3395_v47   ;;  %3733 = vperm.xlu0 %4666, %v3394_v46   ;;  %v3264_v47 = vrot.slane %v4952_v58, %v5911_v15  ;;  %v1138_v58 = vrot.slane %v5116_v22, %v4916_v41  ;;  %v6038_v22 = vrot.slane %v4956_v60, %v5911_v15 }
 0x424   :  { %v6053_v60 = vrot.slane %v4962_v63, %v5911_v15  ;;  %v1157_v63 = vrot.slane %v5130_v32, %v4916_v41 }
 0x425   :  { %v3413_v46 = vmul.f32 %v5915_v23, %v3264_v47  ;;  %v3415_v51 = vmul.f32 %v5920_v18, %v3264_v47  ;;  %v3416_v17 = vmul.f32 %v5928_v45, %v3264_v47 }
 0x427   :  { %3742 = vperm.xlu1 %4667, %v3397_v12   ;;  %3739 = vperm.xlu0 %4666, %v3396_v55   ;;  %v3414_v12 = vmul.f32 %v5922_v25, %v3264_v47  ;;  %v3421_v47 = vmul.f32 %v5915_v23, %v6038_v22 }
 0x42b   :  { %3748 = vperm.xlu1 %4667, %v3399_v19   ;;  %3745 = vperm.xlu0 %4666, %v3398_v21   ;;  %v3268_v19 = vrot.slane %v4958_v61, %v5911_v15  ;;  %v1134_v61 = vrot.slane %v5106_v40, %v4913_v37 }
 0x42d   :  { %v3417_v21 = vmul.f32 %v5915_v23, %v3268_v19  ;;  %v3418_v40 = vmul.f32 %v5922_v25, %v3268_v19  ;;  %v3420_v32 = vmul.f32 %v5928_v45, %v3268_v19 }
 0x42f   :  { %3754 = vperm.xlu1 %4667, %v3401_v50   ;;  %3751 = vperm.xlu0 %4666, %v3400_v54  }
 0x433   :  { %3760 = vperm.xlu1 %4667, %v3403_v49   ;;  %3757 = vperm.xlu0 %4666, %v3402_v31   ;;  %v1114_v49 = vrot.slane %v5094_v30, %v4916_v41  ;;  %v1109_v31 = vrot.slane %v5100_v35, %v4913_v37  ;;  %v1139_v30 = vsel %vm1115_vm1, %v1138_v58, %v1134_v61  ;;  %v7818_v61 = vld [vmem:[#allocation25_spill] sm:$0xff] }
 0x434   :  { %v3419_v35 = vmul.f32 %v5920_v18, %v3268_v19 }
 0x437   :  { %3766 = vperm.xlu1 %4667, %v3405_v44   ;;  %3763 = vperm.xlu0 %4666, %v3404_v57   ;;  %v1143_v44 = vrot.slane %v5114_v20, %v4919_v42  ;;  %v6049_v57 = vrot.slane %v4960_v62, %v5911_v15  ;;  %v1148_v20 = vrot.slane %v5122_v26, %v4922_v43 }
 0x438   :  { %v1116_v62 = vsel %vm1115_vm1, %v1114_v49, %v1109_v31  ;;  %v7817_v31 = vld [vmem:[#allocation18_spill] sm:$0xff] }
 0x439   :  { %v1123_v13 = vsel %vm1122_vm2, %v1121_v27, %v1116_v62  ;;  %v1144_v26 = vsel %vm1122_vm2, %v1143_v44, %v1139_v30  ;;  %v1191_v19 = vrot.slane %v7817_v31, %v4913_v37  ;;  %v1214_v27 = vrot.slane %v7818_v61, %v4916_v41  ;;  %v7819_v44 = vld [vmem:[#allocation16_spill] sm:$0xff] }
 0x43a   :  { %v1167_v30 = vrot.slane %v7819_v44, %v4922_v43  ;;  %v3432_v24 = vmul.f32 %v5928_v45, %v6049_v57 }
 0x43b   :  { %3772 = vperm.xlu1 %4667, %v3407_v53   ;;  %3769 = vperm.xlu0 %4666, %v3406_v16  }
 0x43f   :  { %3778 = vperm.xlu1 %4667, %v3409_v34   ;;  %3775 = vperm.xlu0 %4666, %v3408_v56   ;;  %v1176_v34 = vrot.slane %v5144_v28, %v4916_v41  ;;  %v7813_v56 = vld [vmem:[#allocation13_spill] sm:$0xff]  ;;  %v7816_v28 = vld [vmem:[#allocation15_spill] sm:$0xff] }
 0x440   :  { %v1153_v0 = vrot.slane %v7813_v56, %v4913_v37  ;;  %v1172_v58 = vrot.slane %v7816_v28, %v4913_v37  ;;  %v3423_v56 = vmul.f32 %v5920_v18, %v6038_v22  ;;  %v7825_v28 = vld [vmem:[#allocation24_spill] sm:$0xff] }
 0x442   :  { %v1158_v49 = vsel %vm1115_vm1, %v1157_v63, %v1153_v0  ;;  %v3422_v0 = vmul.f32 %v5922_v25, %v6038_v22 }
 0x443   :  { %3784 = vperm.xlu1 %4667, %v3411_v38   ;;  %3781 = vperm.xlu0 %4666, %v3410_v52   ;;  %v7814_v38 = vld [vmem:[#allocation21_spill] sm:$0xff] }
 0x444   :  { %v1195_v52 = vrot.slane %v7814_v38, %v4916_v41 }
 0x446   :  { %v1196_v63 = vsel %vm1115_vm1, %v1195_v52, %v1191_v19  ;;  %v1219_v52 = vrot.slane %v7825_v28, %v4919_v42 }
 0x447   :  { %3790 = vperm.xlu1 %4667, %v3413_v46   ;;  %3787 = vperm.xlu0 %4666, %v3412_v59   ;;  %v1130_v46 = vsel %vm1129_vm3, %v1128_v36, %v1123_v13  ;;  %v1149_v59 = vsel %vm1129_vm3, %v1148_v20, %v1144_v26  ;;  %v1177_v36 = vsel %vm1115_vm1, %v1176_v34, %v1172_v58  ;;  %v7821_v20 = vld [vmem:[#allocation20_spill] sm:$0xff]  ;;  %v7822_v13 = vld [vmem:[#allocation22_spill] sm:$0xff]  ;;  %v7824_v34 = vld [vmem:[#allocation23_spill] sm:$0xff] }
 0x448   :  { %v1200_v62 = vrot.slane %v7821_v20, %v4919_v42  ;;  %v1210_v26 = vrot.slane %v7822_v13, %v4913_v37  ;;  %v1721_v38 = vsel %vm1720_vm4, %v1149_v59, %v1130_v46  ;;  %v7826_v46 = vld [vmem:[#allocation29_spill] sm:$0xff]  ;;  %v7827_v13 = vld [vmem:[#allocation27_spill] sm:$0xff] }
 0x449   :  { %v1233_v59 = vrot.slane %v7826_v46, %v4916_v41  ;;  %v7831_v46 = vld [vmem:[#allocation30_spill] sm:$0xff] }
 0x44a   :  { %v6018_v55 = vpop.permute.xlu1 %3610  ;;  %v1215_v61 = vsel %vm1115_vm1, %v1214_v27, %v1210_v26  ;;  %v1201_v20 = vsel %vm1122_vm2, %v1200_v62, %v1196_v63  ;;  %v3425_v26 = vmul.f32 %v5915_v23, %v6053_v60  ;;  %v7830_v62 = vld [vmem:[#allocation28_spill] sm:$0xff] }
 0x44b   :  { %3796 = vperm.xlu1 %4667, %v3415_v51   ;;  %3793 = vperm.xlu0 %4666, %v3414_v12   ;;  %v7815_v51 = vld [vmem:[#allocation14_spill] sm:$0xff]  ;;  %v1238_v63 = vrot.slane %v7830_v62, %v4919_v42 }
 0x44c   :  { %v1162_v12 = vrot.slane %v7815_v51, %v4919_v42  ;;  %v1205_v51 = vrot.slane %v7824_v34, %v4922_v43  ;;  %v7828_v34 = vld [vmem:[#allocation26_spill] sm:$0xff] }
 0x44e   :  { %v6026_v50 = vpop.permute.xlu1 %3616  ;;  %v6028_v54 = vpop.permute.xlu0 %3613  ;;  %v1163_v19 = vsel %vm1122_vm2, %v1162_v12, %v1158_v49  ;;  %v1229_v12 = vrot.slane %v7828_v34, %v4913_v37  ;;  %v7829_v49 = vld [vmem:[#allocation33_spill] sm:$0xff]  ;;  %v3427_v34 = vmul.f32 %v5920_v18, %v6053_v60 }
 0x44f   :  { %3802 = vperm.xlu1 %4667, %v3417_v21   ;;  %3799 = vperm.xlu0 %4666, %v3416_v17   ;;  %v1168_v44 = vsel %vm1129_vm3, %v1167_v30, %v1163_v19  ;;  %v1252_v27 = vrot.slane %v7829_v49, %v4916_v41  ;;  %v6164_v49 = vrot.slane %v4966_v1, %v5911_v15  ;;  %v7835_v1 = vld [vmem:[#allocation137_spill] sm:$0xff] }
 0x450   :  { %v1234_v19 = vsel %vm1115_vm1, %v1233_v59, %v1229_v12  ;;  %v3426_v12 = vmul.f32 %v5922_v25, %v6053_v60  ;;  %v2582_v62 = vrot.slane %v7835_v1, %v4916_v41  ;;  %v7843_v1 = vld [vmem:[#allocation145_spill] sm:$0xff] }
 0x452   :  { %v6059_v53 = vpop.permute.xlu1 %3622  ;;  %v6061_v16 = vpop.permute.xlu0 %3619 }
 0x453   :  { %3808 = vperm.xlu1 %4667, %v3419_v35   ;;  %3805 = vperm.xlu0 %4666, %v3418_v40   ;;  %v7820_v35 = vld [vmem:[#allocation17_spill] sm:$0xff] }
 0x454   :  { %v1181_v40 = vrot.slane %v7820_v35, %v4919_v42 }
 0x456   :  { %v6087_v21 = vpop.permute.xlu1 %3628  ;;  %v6089_v17 = vpop.permute.xlu0 %3625  ;;  %v1182_v35 = vsel %vm1122_vm2, %v1181_v40, %v1177_v36  ;;  %v1206_v40 = vsel %vm1129_vm3, %v1205_v51, %v1201_v20  ;;  %v1220_v36 = vsel %vm1122_vm2, %v1219_v52, %v1215_v61  ;;  %v1723_v51 = vsel %vm1722_vm5, %v1168_v44, %v1721_v38  ;;  %v7833_v61 = vld [vmem:[#allocation32_spill] sm:$0xff] }
 0x457   :  { %3814 = vperm.xlu1 %4667, %v3421_v47   ;;  %3811 = vperm.xlu0 %4666, %v3420_v32   ;;  %v7823_v47 = vld [vmem:[#allocation19_spill] sm:$0xff]  ;;  %v1239_v44 = vsel %vm1122_vm2, %v1238_v63, %v1234_v19 }
 0x458   :  { %v1186_v32 = vrot.slane %v7823_v47, %v4922_v43  ;;  %v1224_v47 = vrot.slane %v7827_v13, %v4922_v43  ;;  %v1248_v13 = vrot.slane %v7831_v46, %v4913_v37  ;;  %v7836_v63 = vld [vmem:[#allocation35_spill] sm:$0xff] }
 0x459   :  { %v7837_v46 = vld [vmem:[#allocation131_spill] sm:$0xff] }
 0x45a   :  { %v6117_v58 = vpop.permute.xlu1 %3634  ;;  %v6119_v31 = vpop.permute.xlu0 %3631  ;;  %v1187_v30 = vsel %vm1129_vm3, %v1186_v32, %v1182_v35  ;;  %v1225_v52 = vsel %vm1129_vm3, %v1224_v47, %v1220_v36  ;;  %v1257_v35 = vrot.slane %v7833_v61, %v4919_v42  ;;  %v1253_v59 = vsel %vm1115_vm1, %v1252_v27, %v1248_v13  ;;  %v7834_v47 = vld [vmem:[#allocation133_spill] sm:$0xff]  ;;  %v7840_v61 = vld [vmem:[#allocation134_spill] sm:$0xff] }
 0x45b   :  { %3820 = vperm.xlu1 %4667, %v3423_v56   ;;  %3817 = vperm.xlu0 %4666, %v3422_v0   ;;  %v3424_v56 = vmul.f32 %v5928_v45, %v6038_v22  ;;  %v7832_v22 = vld [vmem:[#allocation31_spill] sm:$0xff]  ;;  %v1725_v20 = vsel %vm1724_vm6, %v1187_v30, %v1723_v51  ;;  %v2559_v13 = vrot.slane %v7837_v46, %v4913_v37 }
 0x45c   :  { %v1243_v32 = vrot.slane %v7832_v22, %v4922_v43  ;;  %v1727_v38 = vsel %vm1726_vm7, %v1206_v40, %v1725_v20  ;;  %v6183_v40 = vsel %vm1122_vm2, %v1257_v35, %v1253_v59  ;;  %v7838_v22 = vld [vmem:[#allocation141_spill] sm:$0xff]  ;;  %v2578_v20 = vrot.slane %v7840_v61, %v4913_v37  ;;  %v7844_v61 = vld [vmem:[#allocation135_spill] sm:$0xff] }
 0x45d   :  { %v6175_v30 = vsel %vm1728_vm8, %v1225_v52, %v1727_v38  ;;  %v2601_v51 = vrot.slane %v7838_v22, %v4916_v41  ;;  %v3428_v35 = vmul.f32 %v5928_v45, %v6053_v60  ;;  %v2620_v46 = vrot.slane %v7843_v1, %v4916_v41  ;;  %v7847_v1 = vld [vmem:[#allocation142_spill] sm:$0xff] }
 0x45e   :  { %v6143_v0 = vpop.permute.xlu1 %3640  ;;  %v6145_v28 = vpop.permute.xlu0 %3637  ;;  %v6178_v36 = vsel %vm1129_vm3, %v1243_v32, %v1239_v44  ;;  %v7839_v32 = vld [vmem:[#allocation132_spill] sm:$0xff]  ;;  %v7842_v44 = vld [vmem:[#allocation138_spill] sm:$0xff]  ;;  %v2573_v19 = vrot.slane %v7844_v61, %v4922_v43  ;;  %v2583_v60 = vsel %vm1115_vm1, %v2582_v62, %v2578_v20  ;;  %v2616_v29 = vrot.slane %v7847_v1, %v4913_v37  ;;  %v7849_v61 = vld [vmem:[#allocation143_spill] sm:$0xff] }
 0x45f   :  { %3826 = vperm.xlu1 %4667, %v3425_v26   ;;  %3823 = vperm.xlu0 %4666, %v3424_v56   ;;  %v2563_v26 = vrot.slane %v7834_v47, %v4916_v41  ;;  %v2568_v52 = vrot.slane %v7839_v32, %v4919_v42  ;;  %v2597_v47 = vrot.slane %v7842_v44, %v4913_v37  ;;  %v7850_v62 = vld [vmem:[#allocation144_spill] sm:$0xff] }
 0x460   :  { %v2611_v11 = vrot.slane %v7849_v61, %v4922_v43  ;;  %v2625_v20 = vrot.slane %v7850_v62, %v4919_v42 }
 0x461   :  { %v2564_v59 = vsel %vm1115_vm1, %v2563_v26, %v2559_v13  ;;  %v7845_v26 = vld [vmem:[#allocation139_spill] sm:$0xff]  ;;  %v2602_v14 = vsel %vm1115_vm1, %v2601_v51, %v2597_v47 }
 0x462   :  { %v6170_v56 = vpop.permute.xlu1 %3646  ;;  %v6172_v27 = vpop.permute.xlu0 %3643  ;;  %v2592_v13 = vrot.slane %v7845_v26, %v4922_v43  ;;  %v2569_v51 = vsel %vm1122_vm2, %v2568_v52, %v2564_v59  ;;  %v2621_v26 = vsel %vm1115_vm1, %v2620_v46, %v2616_v29  ;;  %v7853_v59 = vld [vmem:[#allocation153_spill] sm:$0xff]  ;;  %v2677_v46 = vrot.slane %v5648_v33, %v4916_v41  ;;  %v7857_v33 = vld [vmem:[#allocation154_spill] sm:$0xff] }
 0x463   :  { %3832 = vperm.xlu1 %4667, %v3427_v34   ;;  %3829 = vperm.xlu0 %4666, %v3426_v12   ;;  %v3429_v34 = vmul.f32 %v5915_v23, %v6049_v57  ;;  %v7841_v12 = vld [vmem:[#allocation136_spill] sm:$0xff]  ;;  %v2574_v62 = vsel %vm1129_vm3, %v2573_v19, %v2569_v51  ;;  %v2626_v19 = vsel %vm1122_vm2, %v2625_v20, %v2621_v26 }
 0x464   :  { %v2587_v38 = vrot.slane %v7841_v12, %v4919_v42  ;;  %v7846_v12 = vld [vmem:[#allocation140_spill] sm:$0xff] }
 0x465   :  { %v2606_v44 = vrot.slane %v7846_v12, %v4919_v42  ;;  %v2635_v12 = vrot.slane %v7851_v2, %v4913_v37 }
 0x466   :  { %v6206_v22 = vpop.permute.xlu1 %3652  ;;  %v6208_v32 = vpop.permute.xlu0 %3649  ;;  %v2588_v47 = vsel %vm1122_vm2, %v2587_v38, %v2583_v60  ;;  %v2658_v38 = vrot.slane %v7853_v59, %v4916_v41  ;;  %v7859_v59 = vld [vmem:[#allocation155_spill] sm:$0xff] }
 0x467   :  { %3838 = vperm.xlu1 %4667, %v3429_v34   ;;  %3835 = vperm.xlu0 %4666, %v3428_v35   ;;  %v3431_v34 = vmul.f32 %v5920_v18, %v6049_v57  ;;  %v3430_v35 = vmul.f32 %v5922_v25, %v6049_v57  ;;  %v2593_v3 = vsel %vm1129_vm3, %v2592_v13, %v2588_v47  ;;  %v7858_v57 = vld [vmem:[#allocation152_spill] sm:$0xff] }
 0x468   :  { %v2607_v52 = vsel %vm1122_vm2, %v2606_v44, %v2602_v14  ;;  %v2640_v29 = vsel %vm1115_vm1, %v2639_v10, %v2635_v12  ;;  %v3433_v13 = vmul.f32 %v5915_v23, %v6164_v49  ;;  %v7854_v14 = vld [vmem:[#allocation147_spill] sm:$0xff]  ;;  %v7855_v10 = vld [vmem:[#allocation150_spill] sm:$0xff]  ;;  %v2663_v2 = vrot.slane %v7858_v57, %v4919_v42 }
 0x469   :  { %v2612_v60 = vsel %vm1129_vm3, %v2611_v11, %v2607_v52  ;;  %v2630_v44 = vrot.slane %v7854_v14, %v4922_v43  ;;  %v2673_v11 = vrot.slane %v7857_v33, %v4913_v37  ;;  %v2645_v26 = vsel %vm1122_vm2, %v2644_v9, %v2640_v29  ;;  %v7861_v9 = vld [vmem:[#allocation157_spill] sm:$0xff]  ;;  %v7862_v57 = vld [vmem:[#allocation158_spill] sm:$0xff] }
 0x46a   :  { %v6235_v1 = vpop.permute.xlu1 %3658  ;;  %v6237_v61 = vpop.permute.xlu0 %3655  ;;  %v2696_v12 = vrot.slane %v5662_v39, %v4916_v41  ;;  %v2668_v14 = vrot.slane %v7859_v59, %v4922_v43  ;;  %v2692_v29 = vrot.slane %v7861_v9, %v4913_v37  ;;  %v2687_v8 = vrot.slane %v7862_v57, %v4922_v43 }
 0x46b   :  { %3844 = vperm.xlu1 %4667, %v3431_v34   ;;  %3841 = vperm.xlu0 %4666, %v3430_v35   ;;  %v2654_v34 = vrot.slane %v7855_v10, %v4913_v37  ;;  %v7856_v35 = vld [vmem:[#allocation151_spill] sm:$0xff]  ;;  %v7860_v10 = vld [vmem:[#allocation156_spill] sm:$0xff]  ;;  %v2678_v33 = vsel %vm1115_vm1, %v2677_v46, %v2673_v11  ;;  %v3435_v39 = vmul.f32 %v5920_v18, %v6164_v49 }
 0x46c   :  { %v2649_v51 = vrot.slane %v7856_v35, %v4922_v43  ;;  %v2682_v35 = vrot.slane %v7860_v10, %v4919_v42  ;;  %v7863_v46 = vld [vmem:[#allocation159_spill] sm:$0xff]  ;;  %v2697_v57 = vsel %vm1115_vm1, %v2696_v12, %v2692_v29  ;;  %v3436_v12 = vmul.f32 %v5928_v45, %v6164_v49 }
 0x46d   :  { %v2659_v52 = vsel %vm1115_vm1, %v2658_v38, %v2654_v34  ;;  %v3434_v38 = vmul.f32 %v5922_v25, %v6164_v49  ;;  %v2701_v11 = vrot.slane %v7863_v46, %v4919_v42  ;;  %v7866_v49 = vld [vmem:[#allocation5_spill] sm:$0xff]  ;;  %v4005_v46 = vrot.slane %v6026_v50, %v4919_v42 }
 0x46e   :  { %v6263_v47 = vpop.permute.xlu1 %3664  ;;  %v6265_v20 = vpop.permute.xlu0 %3661  ;;  %v2650_v34 = vsel %vm1129_vm3, %v2649_v51, %v2645_v26  ;;  %v2664_v9 = vsel %vm1122_vm2, %v2663_v2, %v2659_v52  ;;  %v2683_v51 = vsel %vm1122_vm2, %v2682_v35, %v2678_v33  ;;  %v4000_v33 = vrot.slane %v6028_v54, %v4916_v41 }
 0x46f   :  { %3850 = vperm.xlu1 %4667, %v3433_v13   ;;  %3847 = vperm.xlu0 %4666, %v3432_v24   ;;  %v3164_v13 = vsel %vm1720_vm4, %v2593_v3, %v2574_v62  ;;  %v2631_v24 = vsel %vm1129_vm3, %v2630_v44, %v2626_v19  ;;  %v7865_v3 = vrot.slane %v7836_v63, %v4922_v43 }
 0x470   :  { %v3165_v19 = vsel %vm1722_vm5, %v2612_v60, %v3164_v13  ;;  %v2669_v44 = vsel %vm1129_vm3, %v2668_v14, %v2664_v9  ;;  %v2688_v2 = vsel %vm1129_vm3, %v2687_v8, %v2683_v51  ;;  %v2702_v60 = vsel %vm1122_vm2, %v2701_v11, %v2697_v57 }
 0x471   :  { %v1263_v62 = vsel %vm1129_vm3, %v7865_v3, %v6183_v40  ;;  %v3166_v26 = vsel %vm1724_vm6, %v2631_v24, %v3165_v19  ;;  %v1731_v40 = vsel %vm1730_vm9, %v6178_v36, %v6175_v30  ;;  %v2707_v35 = vsel %vm1129_vm3, %v2706_v7, %v2702_v60  ;;  %v7867_v36 = vld [vmem:[#allocation6_spill] sm:$0xff] }
 0x472   :  { %v6291_v59 = vpop.permute.xlu1 %3670  ;;  %v6293_v10 = vpop.permute.xlu0 %3667  ;;  %v3167_v63 = vsel %vm1726_vm7, %v2650_v34, %v3166_v26  ;;  %v6328_v30 = vrot.slane %v7866_v49, %v5911_v15  ;;  %v3292_v29 = vrot.slane %v7867_v36, %v5911_v15  ;;  %v3996_v7 = vrot.slane %v6018_v55, %v4913_v37 }
 0x473   :  { %3856 = vperm.xlu1 %4667, %v3435_v39   ;;  %3853 = vperm.xlu0 %4666, %v3434_v38   ;;  %v3168_v8 = vsel %vm1728_vm8, %v2669_v44, %v3167_v63  ;;  %v6333_v39 = vsel %vm1732_vm10, %v1263_v62, %v1731_v40  ;;  %v4019_v54 = vrot.slane %v6089_v17, %v4916_v41 }
 0x474   :  { %v3169_v38 = vsel %vm1730_vm9, %v2688_v2, %v3168_v8  ;;  %v3439_v13 = vmul.f32 %v5920_v18, %v6065_v48  ;;  %v3438_v24 = vmul.f32 %v5922_v25, %v6065_v48  ;;  %v3441_v55 = vmul.f32 %v5915_v23, %v3292_v29 }
 0x475   :  { %v6345_v34 = vsel %vm1732_vm10, %v2707_v35, %v3169_v38  ;;  %v3440_v17 = vmul.f32 %v5928_v45, %v6065_v48  ;;  %v4001_v57 = vsel %vm1115_vm1, %v4000_v33, %v3996_v7  ;;  %v4015_v3 = vrot.slane %v6059_v53, %v4913_v37 }
 0x476   :  { %v6318_v52 = vpop.permute.xlu1 %3676  ;;  %v6320_v14 = vpop.permute.xlu0 %3673  ;;  %v4010_v62 = vrot.slane %v6061_v16, %v4922_v43  ;;  %v4024_v50 = vrot.slane %v6087_v21, %v4919_v42  ;;  %v4038_v19 = vrot.slane %v6145_v28, %v4916_v41  ;;  %v3443_v44 = vmul.f32 %v5920_v18, %v3292_v29 }
 0x477   :  { %3862 = vperm.xlu1 %4667, %v3437_v6   ;;  %3859 = vperm.xlu0 %4666, %v3436_v12   ;;  %v3442_v48 = vmul.f32 %v5922_v25, %v3292_v29  ;;  %v4020_v51 = vsel %vm1115_vm1, %v4019_v54, %v4015_v3  ;;  %v4029_v53 = vrot.slane %v6119_v31, %v4922_v43 }
 0x478   :  { %v3445_v16 = vmul.f32 %v5915_v23, %v6328_v30  ;;  %v3444_v26 = vmul.f32 %v5928_v45, %v3292_v29  ;;  %v4006_v2 = vsel %vm1122_vm2, %v4005_v46, %v4001_v57  ;;  %v4034_v21 = vrot.slane %v6117_v58, %v4913_v37 }
 0x479   :  { %v4057_v28 = vrot.slane %v6208_v32, %v4916_v41  ;;  %v3447_v40 = vmul.f32 %v5920_v18, %v6328_v30  ;;  %v4011_v31 = vsel %vm1129_vm3, %v4010_v62, %v4006_v2  ;;  %v4043_v63 = vrot.slane %v6143_v0, %v4919_v42 }
 0x47a   :  { %v3683_v11 = vpop.permute.xlu1 %3682  ;;  %v6349_v9 = vpop.permute.xlu0 %3679  ;;  %v3446_v60 = vmul.f32 %v5922_v25, %v6328_v30  ;;  %v4025_v58 = vsel %vm1122_vm2, %v4024_v50, %v4020_v51  ;;  %v4039_v8 = vsel %vm1115_vm1, %v4038_v19, %v4034_v21  ;;  %v4053_v32 = vrot.slane %v6170_v56, %v4913_v37 }
 0x47b   :  { %3868 = vperm.xlu1 %4667, %v3439_v13   ;;  %3865 = vperm.xlu0 %4666, %v3438_v24   ;;  %v4076_v35 = vrot.slane %v6265_v20, %v4916_v41  ;;  %v4030_v33 = vsel %vm1129_vm3, %v4029_v53, %v4025_v58  ;;  %v4048_v0 = vrot.slane %v6172_v27, %v4922_v43 }
 0x47c   :  { %v4062_v49 = vrot.slane %v6206_v22, %v4919_v42  ;;  %v4095_v36 = vrot.slane %v6320_v14, %v4916_v41  ;;  %v4058_v29 = vsel %vm1115_vm1, %v4057_v28, %v4053_v32  ;;  %v4072_v38 = vrot.slane %v6235_v1, %v4913_v37 }
 0x47d   :  { %v4067_v56 = vrot.slane %v6237_v61, %v4922_v43  ;;  %v4044_v27 = vsel %vm1122_vm2, %v4043_v63, %v4039_v8  ;;  %v4081_v22 = vrot.slane %v6263_v47, %v4919_v42  ;;  %v4091_v14 = vrot.slane %v6291_v59, %v4913_v37 }
 0x47e   :  { %v3689_v6 = vpop.permute.xlu1 %3688  ;;  %v3686_v12 = vpop.permute.xlu0 %3685  ;;  %v4077_v13 = vsel %vm1115_vm1, %v4076_v35, %v4072_v38  ;;  %v4086_v1 = vrot.slane %v6293_v10, %v4922_v43  ;;  %v4100_v61 = vrot.slane %v6318_v52, %v4919_v42  ;;  %v4110_v24 = vrot.slane %v3683_v11, %v4913_v37  ;;  %v6425_v11 = vld [vmem:[%s7549_s2] ss:$0 sm:$0xff] }
 0x47f   :  { %3874 = vperm.xlu1 %4667, %v3441_v55   ;;  %3871 = vperm.xlu0 %4666, %v3440_v17   ;;  %v4114_v20 = vrot.slane %v3686_v12, %v4916_v41  ;;  %v4063_v46 = vsel %vm1122_vm2, %v4062_v49, %v4058_v29  ;;  %v4096_v55 = vsel %vm1115_vm1, %v4095_v36, %v4091_v14 }
 0x480   :  { %v4105_v47 = vrot.slane %v6349_v9, %v4922_v43  ;;  %v4119_v59 = vrot.slane %v3689_v6, %v4919_v42  ;;  %v4049_v17 = vsel %vm1129_vm3, %v4048_v0, %v4044_v27  ;;  %v4068_v57 = vsel %vm1129_vm3, %v4067_v56, %v4063_v46  ;;  %v7873_v46 = vld [vmem:[#allocation38_spill] sm:$0xff] }
 0x481   :  { %v4115_v10 = vsel %vm1115_vm1, %v4114_v20, %v4110_v24  ;;  %v4082_v50 = vsel %vm1122_vm2, %v4081_v22, %v4077_v13  ;;  %v4101_v51 = vsel %vm1122_vm2, %v4100_v61, %v4096_v55  ;;  %v3300_v58 = vrot.slane %v4974_v5, %v5911_v15  ;;  %v7869_v20 = vld [vmem:[#allocation41_spill] sm:$0xff]  ;;  %v7871_v13 = vld [vmem:[#allocation8_spill] sm:$0xff] }
 0x482   :  { %v3695_v7 = vpop.permute.xlu1 %3694  ;;  %v3692_v54 = vpop.permute.xlu0 %3691  ;;  %v4106_v21 = vsel %vm1129_vm3, %v4105_v47, %v4101_v51  ;;  %v4120_v28 = vsel %vm1122_vm2, %v4119_v59, %v4115_v10  ;;  %v3448_v5 = vmul.f32 %v5928_v45, %v6328_v30  ;;  %v7870_v30 = vld [vmem:[#allocation34_spill] sm:$0xff]  ;;  %v7872_v61 = vld [vmem:[#allocation36_spill] sm:$0xff]  ;;  %v1286_v55 = vrot.slane %v7873_v46, %v4913_v37  ;;  %v7879_v51 = vld [vmem:[#allocation43_spill] sm:$0xff] }
 0x483   :  { %3880 = vperm.xlu1 %4667, %v3443_v44   ;;  %3877 = vperm.xlu0 %4666, %v3442_v48   ;;  %v4124_v3 = vrot.slane %v3692_v54, %v4922_v43  ;;  %v4129_v9 = vrot.slane %v3695_v7, %v4913_v37  ;;  %v4601_v44 = vsel %vm1720_vm4, %v4030_v33, %v4011_v31  ;;  %v7875_v10 = vld [vmem:[#allocation40_spill] sm:$0xff] }
 0x484   :  { %v4087_v48 = vsel %vm1129_vm3, %v4086_v1, %v4082_v50  ;;  %v4602_v2 = vsel %vm1722_vm5, %v4049_v17, %v4601_v44  ;;  %v3449_v36 = vmul.f32 %v5915_v23, %v3300_v58  ;;  %v1290_v7 = vrot.slane %v7869_v20, %v4916_v41  ;;  %v7877_v50 = vld [vmem:[#allocation39_spill] sm:$0xff]  ;;  %v7878_v44 = vld [vmem:[#allocation42_spill] sm:$0xff]  ;;  %v7888_v46 = vld [vmem:[#allocation52_spill] sm:$0xff] }
 0x485   :  { %v4125_v12 = vsel %vm1129_vm3, %v4124_v3, %v4120_v28  ;;  %v3304_v54 = vrot.slane %v4972_v4, %v5911_v15  ;;  %v1267_v27 = vrot.slane %v7870_v30, %v4913_v37  ;;  %v3451_v22 = vmul.f32 %v5920_v18, %v3300_v58  ;;  %v7874_v4 = vld [vmem:[#allocation45_spill] sm:$0xff]  ;;  %v7881_v28 = vld [vmem:[#allocation46_spill] sm:$0xff]  ;;  %v7886_v20 = vld [vmem:[#allocation51_spill] sm:$0xff] }
 0x486   :  { %v3701_v52 = vpop.permute.xlu1 %3700  ;;  %v3698_v62 = vpop.permute.xlu0 %3697  ;;  %v3450_v14 = vmul.f32 %v5922_v25, %v3300_v58  ;;  %v6474_v1 = vrot.slane %v7871_v13, %v5911_v15  ;;  %v1276_v24 = vrot.slane %v7872_v61, %v4919_v42  ;;  %v1309_v47 = vrot.slane %v7874_v4, %v4916_v41 }
 0x487   :  { %v4133_v19 = vrot.slane %v3698_v62, %v4916_v41  ;;  %3886 = vperm.xlu1 %4667, %v3445_v16   ;;  %3883 = vperm.xlu0 %4666, %v3444_v26   ;;  %v4138_v53 = vrot.slane %v3701_v52, %v4919_v42  ;;  %v1759_v16 = vadd.f32 %v6425_v11, %v6333_v39  ;;  %v7876_v52 = vld [vmem:[#allocation49_spill] sm:$0xff] }
 0x488   :  { %v4603_v26 = vsel %vm1724_vm6, %v4068_v57, %v4602_v2  ;;  %v1295_v3 = vrot.slane %v7875_v10, %v4919_v42  ;;  %v1328_v62 = vrot.slane %v7876_v52, %v4916_v41  ;;  %v7880_v2 = vld [vmem:[#allocation44_spill] sm:$0xff]  ;;  %v3454_v13 = vmul.f32 %v5922_v25, %v3304_v54  ;;  %v7889_v10 = vld [vmem:[#allocation54_spill] sm:$0xff]  ;;  %v7890_v52 = vld [vmem:[#allocation55_spill] sm:$0xff] }
 0x489   :  { %v4134_v6 = vsel %vm1115_vm1, %v4133_v19, %v4129_v9  ;;  %v4604_v8 = vsel %vm1726_vm7, %v4087_v48, %v4603_v26  ;;  %v3196_v35 = vadd.f32 %v6345_v34, %v1759_v16  ;;  %v7868_v34 = vld [vmem:[#allocation37_spill] sm:$0xff]  ;;  %v1281_v9 = vrot.slane %v7877_v50, %v4922_v43 }
 0x48a   :  { %v6442_v31 = vpop.permute.xlu1 %3706  ;;  %v3704_v63 = vpop.permute.xlu0 %3703  ;;  %v4605_v39 = vsel %vm1728_vm8, %v4106_v21, %v4604_v8  ;;  %v4139_v33 = vsel %vm1122_vm2, %v4138_v53, %v4134_v6  ;;  %v1271_v38 = vrot.slane %v7868_v34, %v4916_v41  ;;  %v1291_v19 = vsel %vm1115_vm1, %v1290_v7, %v1286_v55  ;;  %v7891_v50 = vld [vmem:[#allocation61_spill] sm:$0xff] }
 0x48b   :  { %v4143_v32 = vrot.slane %v3704_v63, %v4922_v43  ;;  %3892 = vperm.xlu1 %4667, %v3447_v40   ;;  %3889 = vperm.xlu0 %4666, %v3446_v60   ;;  %v4606_v0 = vsel %vm1730_vm9, %v4125_v12, %v4605_v39  ;;  %v1305_v48 = vrot.slane %v7878_v44, %v4913_v37  ;;  %v7882_v63 = vld [vmem:[#allocation47_spill] sm:$0xff]  ;;  %v7884_v39 = vld [vmem:[#allocation53_spill] sm:$0xff] }
 0x48c   :  { %v1272_v57 = vsel %vm1115_vm1, %v1271_v38, %v1267_v27  ;;  %v1300_v53 = vrot.slane %v7879_v51, %v4922_v43  ;;  %v1314_v21 = vrot.slane %v7880_v2, %v4919_v42  ;;  %v1324_v6 = vrot.slane %v7881_v28, %v4913_v37  ;;  %v7885_v38 = vld [vmem:[#allocation50_spill] sm:$0xff]  ;;  %v7887_v27 = vld [vmem:[#allocation57_spill] sm:$0xff] }
 0x48d   :  { %v4144_v49 = vsel %vm1129_vm3, %v4143_v32, %v4139_v33  ;;  %v3453_v16 = vmul.f32 %v5915_v23, %v3304_v54  ;;  %v3452_v26 = vmul.f32 %v5928_v45, %v3300_v58  ;;  %v1310_v12 = vsel %vm1115_vm1, %v1309_v47, %v1305_v48  ;;  %v7883_v32 = vld [vmem:[#allocation48_spill] sm:$0xff]  ;;  %v7894_v28 = vld [vmem:[#allocation58_spill] sm:$0xff] }
 0x48e   :  { %v4607_v29 = vsel %vm1732_vm10, %v4144_v49, %v4606_v0  ;;  %v6457_v40 = vpop.permute.xlu1 %3712  ;;  %v6459_v60 = vpop.permute.xlu0 %3709  ;;  %v1319_v8 = vrot.slane %v7882_v63, %v4922_v43  ;;  %v1347_v33 = vrot.slane %v7884_v39, %v4916_v41  ;;  %v1329_v58 = vsel %vm1115_vm1, %v1328_v62, %v1324_v6 }
 0x48f   :  { %v4633_v56 = vadd.f32 %v4607_v29, %v3196_v35  ;;  %3898 = vperm.xlu1 %4667, %v3449_v36   ;;  %3895 = vperm.xlu0 %4666, %v3448_v5   ;;  %v1333_v35 = vrot.slane %v7883_v32, %v4919_v42  ;;  %v1277_v36 = vsel %vm1122_vm2, %v1276_v24, %v1272_v57 }
 0x490   :  { %v1296_v5 = vsel %vm1122_vm2, %v1295_v3, %v1291_v19  ;;  %v1282_v29 = vsel %vm1129_vm3, %v1281_v9, %v1277_v36  ;;  %v1338_v7 = vrot.slane %v7886_v20, %v4922_v43  ;;  %v1315_v30 = vsel %vm1122_vm2, %v1314_v21, %v1310_v12  ;;  %v7892_v19 = vld [vmem:[#allocation7_spill] sm:$0xff] }
 0x491   :  { %4638 = vst.msk [vmem:[#allocation2] sm:$0xff] %vm4637_vm11, %v4633_v56  ;;  %v1301_v34 = vsel %vm1129_vm3, %v1300_v53, %v1296_v5  ;;  %v1343_v56 = vrot.slane %v7885_v38, %v4913_v37  ;;  %v1320_v61 = vsel %vm1129_vm3, %v1319_v8, %v1315_v30  ;;  %v1334_v24 = vsel %vm1122_vm2, %v1333_v35, %v1329_v58  ;;  %v7893_v53 = vld [vmem:[#allocation56_spill] sm:$0xff]  ;;  %v7895_v8 = vld [vmem:[#allocation59_spill] sm:$0xff] }
 0x492   :  { %v6482_v59 = vpop.permute.xlu1 %3718  ;;  %v6484_v17 = vpop.permute.xlu0 %3715  ;;  %v1352_v55 = vrot.slane %v7888_v46, %v4919_v42  ;;  %v1362_v3 = vrot.slane %v7889_v10, %v4913_v37  ;;  %v1357_v62 = vrot.slane %v7890_v52, %v4922_v43  ;;  %v1385_v9 = vrot.slane %v7891_v50, %v4916_v41  ;;  %v7896_v35 = vld [vmem:[#allocation60_spill] sm:$0xff] }
 0x493   :  { %3904 = vperm.xlu1 %4667, %v3451_v22   ;;  %3901 = vperm.xlu0 %4666, %v3450_v14   ;;  %v1366_v22 = vrot.slane %v7887_v27, %v4916_v41  ;;  %v3455_v14 = vmul.f32 %v5920_v18, %v3304_v54  ;;  %v1348_v4 = vsel %vm1115_vm1, %v1347_v33, %v1343_v56  ;;  %v7899_v56 = vld [vmem:[#allocation10_spill] sm:$0xff]  ;;  %v7902_v10 = vld [vmem:[#allocation64_spill] sm:$0xff] }
 0x494   :  { %v6546_v44 = vrot.slane %v7892_v19, %v5911_v15  ;;  %v1734_v48 = vsel %vm1720_vm4, %v1301_v34, %v1282_v29  ;;  %v1339_v51 = vsel %vm1129_vm3, %v1338_v7, %v1334_v24  ;;  %v1371_v2 = vrot.slane %v7893_v53, %v4919_v42  ;;  %v7898_v34 = vld [vmem:[#allocation9_spill] sm:$0xff]  ;;  %v7900_v27 = vld [vmem:[#allocation62_spill] sm:$0xff]  ;;  %v7905_v53 = vld [vmem:[#allocation63_spill] sm:$0xff] }
 0x495   :  { %v1367_v21 = vsel %vm1115_vm1, %v1366_v22, %v1362_v3  ;;  %v1381_v6 = vrot.slane %v7894_v28, %v4913_v37  ;;  %v1735_v12 = vsel %vm1722_vm5, %v1320_v61, %v1734_v48  ;;  %v1353_v63 = vsel %vm1122_vm2, %v1352_v55, %v1348_v4  ;;  %v7904_v48 = vld [vmem:[#allocation164_spill] sm:$0xff] }
 0x496   :  { %v6511_v0 = vpop.permute.xlu1 %3724  ;;  %v6513_v49 = vpop.permute.xlu0 %3721  ;;  %v1376_v32 = vrot.slane %v7895_v8, %v4922_v43  ;;  %v1390_v39 = vrot.slane %v7896_v35, %v4919_v42  ;;  %v1358_v5 = vsel %vm1129_vm3, %v1357_v62, %v1353_v63  ;;  %v6574_v38 = vrot.slane %v7898_v34, %v5911_v15  ;;  %v7909_v8 = vld [vmem:[#allocation169_spill] sm:$0xff] }
 0x497   :  { %3910 = vperm.xlu1 %4667, %v3453_v16   ;;  %3907 = vperm.xlu0 %4666, %v3452_v26   ;;  %v3457_v16 = vmul.f32 %v5915_v23, %v6474_v1  ;;  %v3456_v26 = vmul.f32 %v5928_v45, %v3304_v54  ;;  %v1386_v58 = vsel %vm1115_vm1, %v1385_v9, %v1381_v6  ;;  %v7897_v54 = vld [vmem:[#allocation65_spill] sm:$0xff]  ;;  %v7903_v9 = vld [vmem:[#allocation163_spill] sm:$0xff]  ;;  %v7907_v6 = vld [vmem:[#allocation166_spill] sm:$0xff] }
 0x498   :  { %v1404_v29 = vrot.slane %v7897_v54, %v4916_v41  ;;  %v6578_v20 = vrot.slane %v7899_v56, %v5911_v15  ;;  %v1736_v7 = vsel %vm1724_vm6, %v1339_v51, %v1735_v12  ;;  %v1372_v30 = vsel %vm1122_vm2, %v1371_v2, %v1367_v21  ;;  %v7906_v21 = vld [vmem:[#allocation160_spill] sm:$0xff]  ;;  %v7912_v56 = vld [vmem:[#allocation175_spill] sm:$0xff] }
 0x499   :  { %v1400_v22 = vrot.slane %v7900_v27, %v4913_v37  ;;  %v3459_v61 = vmul.f32 %v5920_v18, %v6474_v1  ;;  %v3458_v24 = vmul.f32 %v5922_v25, %v6474_v1  ;;  %v6591_v46 = vsel %vm1726_vm7, %v1358_v5, %v1736_v7 }
 0x49a   :  { %v6534_v47 = vpop.permute.xlu1 %3730  ;;  %v6536_v57 = vpop.permute.xlu0 %3727  ;;  %v6594_v55 = vsel %vm1129_vm3, %v1376_v32, %v1372_v30  ;;  %v6597_v4 = vsel %vm1122_vm2, %v1390_v39, %v1386_v58  ;;  %v1409_v3 = vrot.slane %v7902_v10, %v4919_v42  ;;  %v2715_v19 = vrot.slane %v7903_v9, %v4916_v41  ;;  %v7910_v58 = vld [vmem:[#allocation162_spill] sm:$0xff]  ;;  %v7916_v9 = vld [vmem:[#allocation173_spill] sm:$0xff] }
 0x49b   :  { %3916 = vperm.xlu1 %4667, %v3455_v14   ;;  %3913 = vperm.xlu0 %4666, %v3454_v13   ;;  %v7901_v14 = vld [vmem:[#allocation167_spill] sm:$0xff]  ;;  %v1405_v50 = vsel %vm1115_vm1, %v1404_v29, %v1400_v22  ;;  %v2730_v51 = vrot.slane %v7904_v48, %v4913_v37  ;;  %v1395_v2 = vrot.slane %v7905_v53, %v4922_v43  ;;  %v7911_v29 = vld [vmem:[#allocation168_spill] sm:$0xff] }
 0x49c   :  { %v2734_v13 = vrot.slane %v7901_v14, %v4916_v41  ;;  %v2711_v28 = vrot.slane %v7906_v21, %v4913_v37  ;;  %v2744_v32 = vrot.slane %v7909_v8, %v4922_v43  ;;  %v3461_v35 = vmul.f32 %v5915_v23, %v6546_v44  ;;  %v7913_v14 = vld [vmem:[#allocation165_spill] sm:$0xff] }
 0x49d   :  { %v3460_v39 = vmul.f32 %v5928_v45, %v6474_v1  ;;  %v1410_v5 = vsel %vm1122_vm2, %v1409_v3, %v1405_v50  ;;  %v2720_v54 = vrot.slane %v7910_v58, %v4919_v42  ;;  %v2749_v34 = vrot.slane %v7911_v29, %v4913_v37  ;;  %v7915_v3 = vld [vmem:[#allocation172_spill] sm:$0xff]  ;;  %v7919_v8 = vld [vmem:[#allocation177_spill] sm:$0xff] }
 0x49e   :  { %v6564_v33 = vpop.permute.xlu1 %3736  ;;  %v6566_v36 = vpop.permute.xlu0 %3733  ;;  %v2735_v63 = vsel %vm1115_vm1, %v2734_v13, %v2730_v51  ;;  %v2772_v7 = vrot.slane %v7912_v56, %v4916_v41  ;;  %v2716_v22 = vsel %vm1115_vm1, %v2715_v19, %v2711_v28  ;;  %v2725_v1 = vrot.slane %v7913_v14, %v4922_v43  ;;  %v7914_v13 = vld [vmem:[#allocation170_spill] sm:$0xff] }
 0x49f   :  { %3922 = vperm.xlu1 %4667, %v3457_v16   ;;  %3919 = vperm.xlu0 %4666, %v3456_v26   ;;  %v2739_v16 = vrot.slane %v7907_v6, %v4919_v42  ;;  %v7908_v26 = vld [vmem:[#allocation171_spill] sm:$0xff]  ;;  %v2768_v50 = vrot.slane %v7915_v3, %v4913_v37  ;;  %v2763_v48 = vrot.slane %v7916_v9, %v4922_v43  ;;  %v7917_v51 = vld [vmem:[#allocation174_spill] sm:$0xff]  ;;  %v7923_v3 = vld [vmem:[#allocation176_spill] sm:$0xff] }
 0x4a0   :  { %v2753_v12 = vrot.slane %v7908_v26, %v4916_v41  ;;  %v2777_v21 = vrot.slane %v7917_v51, %v4919_v42  ;;  %v3463_v28 = vmul.f32 %v5920_v18, %v6546_v44  ;;  %v3462_v6 = vmul.f32 %v5922_v25, %v6546_v44  ;;  %v7925_v51 = vld [vmem:[#allocation180_spill] sm:$0xff] }
 0x4a2   :  { %v6601_v52 = vpop.permute.xlu1 %3742  ;;  %v6603_v62 = vpop.permute.xlu0 %3739  ;;  %v2754_v10 = vsel %vm1115_vm1, %v2753_v12, %v2749_v34  ;;  %v2721_v12 = vsel %vm1122_vm2, %v2720_v54, %v2716_v22  ;;  %v7920_v34 = vld [vmem:[#allocation179_spill] sm:$0xff] }
 0x4a3   :  { %3928 = vperm.xlu1 %4667, %v3459_v61   ;;  %3925 = vperm.xlu0 %4666, %v3458_v24   ;;  %v2758_v61 = vrot.slane %v7914_v13, %v4919_v42  ;;  %v2740_v24 = vsel %vm1122_vm2, %v2739_v16, %v2735_v63  ;;  %v7918_v16 = vld [vmem:[#allocation67_spill] sm:$0xff]  ;;  %v2773_v63 = vsel %vm1115_vm1, %v2772_v7, %v2768_v50 }
 0x4a4   :  { %v2745_v19 = vsel %vm1129_vm3, %v2744_v32, %v2740_v24  ;;  %v1414_v26 = vrot.slane %v7918_v16, %v4922_v43  ;;  %v2726_v58 = vsel %vm1129_vm3, %v2725_v1, %v2721_v12  ;;  %v2791_v56 = vrot.slane %v7920_v34, %v4916_v41  ;;  %v7921_v22 = vld [vmem:[#allocation183_spill] sm:$0xff] }
 0x4a5   :  { %v2759_v29 = vsel %vm1122_vm2, %v2758_v61, %v2754_v10  ;;  %v3171_v54 = vsel %vm1720_vm4, %v2745_v19, %v2726_v58  ;;  %v2810_v14 = vrot.slane %v7921_v22, %v4916_v41  ;;  %v7922_v13 = vld [vmem:[#allocation187_spill] sm:$0xff]  ;;  %v2787_v1 = vrot.slane %v7923_v3, %v4913_v37  ;;  %v7929_v22 = vld [vmem:[#allocation185_spill] sm:$0xff]  ;;  %v7930_v3 = vld [vmem:[#allocation186_spill] sm:$0xff] }
 0x4a6   :  { %v6632_v30 = vpop.permute.xlu1 %3748  ;;  %v6634_v27 = vpop.permute.xlu0 %3745  ;;  %v2764_v7 = vsel %vm1129_vm3, %v2763_v48, %v2759_v29  ;;  %v2829_v24 = vrot.slane %v7922_v13, %v4916_v41  ;;  %v2778_v61 = vsel %vm1122_vm2, %v2777_v21, %v2773_v63  ;;  %v3466_v10 = vmul.f32 %v5922_v25, %v6578_v20  ;;  %v7924_v48 = vld [vmem:[#allocation178_spill] sm:$0xff] }
 0x4a7   :  { %3934 = vperm.xlu1 %4667, %v3461_v35   ;;  %3931 = vperm.xlu0 %4666, %v3460_v39   ;;  %v2782_v35 = vrot.slane %v7919_v8, %v4922_v43  ;;  %v3465_v50 = vmul.f32 %v5915_v23, %v6578_v20  ;;  %v2796_v19 = vrot.slane %v7924_v48, %v4919_v42  ;;  %v7927_v8 = vld [vmem:[#allocation181_spill] sm:$0xff] }
 0x4a8   :  { %v2792_v63 = vsel %vm1115_vm1, %v2791_v56, %v2787_v1  ;;  %v2801_v58 = vrot.slane %v7927_v8, %v4922_v43  ;;  %v2820_v13 = vrot.slane %v7929_v22, %v4922_v43  ;;  %v7931_v56 = vld [vmem:[#allocation189_spill] sm:$0xff] }
 0x4a9   :  { %v2783_v9 = vsel %vm1129_vm3, %v2782_v35, %v2778_v61  ;;  %v7928_v35 = vld [vmem:[#allocation182_spill] sm:$0xff]  ;;  %v2834_v61 = vrot.slane %v7930_v3, %v4919_v42  ;;  %v2839_v1 = vrot.slane %v7931_v56, %v4922_v43  ;;  %v7933_v3 = vld [vmem:[#allocation188_spill] sm:$0xff] }
 0x4aa   :  { %v6660_v32 = vpop.permute.xlu1 %3754  ;;  %v6662_v39 = vpop.permute.xlu0 %3751  ;;  %v2815_v29 = vrot.slane %v7928_v35, %v4919_v42  ;;  %v2844_v56 = vrot.slane %v7933_v3, %v4913_v37 }
 0x4ab   :  { %3940 = vperm.xlu1 %4667, %v3463_v28   ;;  %3937 = vperm.xlu0 %4666, %v3462_v6   ;;  %v2806_v28 = vrot.slane %v7925_v51, %v4913_v37  ;;  %v7926_v6 = vld [vmem:[#allocation184_spill] sm:$0xff]  ;;  %v7932_v51 = vld [vmem:[#allocation191_spill] sm:$0xff] }
 0x4ac   :  { %v2825_v16 = vrot.slane %v7926_v6, %v4913_v37  ;;  %v2848_v6 = vrot.slane %v7932_v51, %v4916_v41 }
 0x4ad   :  { %v2811_v34 = vsel %vm1115_vm1, %v2810_v14, %v2806_v28  ;;  %v3464_v14 = vmul.f32 %v5928_v45, %v6546_v44  ;;  %v3172_v28 = vsel %vm1722_vm5, %v2764_v7, %v3171_v54 }
 0x4ae   :  { %v6688_v12 = vpop.permute.xlu1 %3760  ;;  %v6690_v21 = vpop.permute.xlu0 %3757  ;;  %v2830_v48 = vsel %vm1115_vm1, %v2829_v24, %v2825_v16  ;;  %v1415_v24 = vsel %vm1129_vm3, %v1414_v26, %v1410_v5  ;;  %v2797_v16 = vsel %vm1122_vm2, %v2796_v19, %v2792_v63  ;;  %v2816_v44 = vsel %vm1122_vm2, %v2815_v29, %v2811_v34  ;;  %v7934_v5 = vld [vmem:[#allocation190_spill] sm:$0xff] }
 0x4af   :  { %3949 = vperm.xlu1 %4667, %v3466_v10   ;;  %3946 = vperm.xlu0 %4666, %v3465_v50   ;;  %v3467_v10 = vmul.f32 %v5920_v18, %v6578_v20  ;;  %v1396_v50 = vsel %vm1129_vm3, %v1395_v2, %v6597_v4  ;;  %v2802_v22 = vsel %vm1129_vm3, %v2801_v58, %v2797_v16  ;;  %v7935_v58 = vld [vmem:[#allocation11_spill] sm:$0xff] }
 0x4b0   :  { %v3173_v4 = vsel %vm1724_vm6, %v2783_v9, %v3172_v28  ;;  %v2821_v53 = vsel %vm1129_vm3, %v2820_v13, %v2816_v44  ;;  %v2835_v2 = vsel %vm1122_vm2, %v2834_v61, %v2830_v48  ;;  %v2853_v26 = vrot.slane %v7934_v5, %v4919_v42  ;;  %v7936_v13 = vld [vmem:[#allocation193_spill] sm:$0xff] }
 0x4b1   :  { %v2840_v54 = vsel %vm1129_vm3, %v2839_v1, %v2835_v2  ;;  %v2849_v7 = vsel %vm1115_vm1, %v2848_v6, %v2844_v56  ;;  %v3470_v19 = vmul.f32 %v5922_v25, %v6574_v38  ;;  %v3469_v63 = vmul.f32 %v5915_v23, %v6574_v38 }
 0x4b2   :  { %v6719_v8 = vpop.permute.xlu1 %3766  ;;  %v6721_v35 = vpop.permute.xlu0 %3763  ;;  %v6740_v9 = vrot.slane %v7935_v58, %v5911_v15  ;;  %v1738_v29 = vsel %vm1728_vm8, %v6594_v55, %v6591_v46  ;;  %v3174_v34 = vsel %vm1726_vm7, %v2802_v22, %v3173_v4  ;;  %v2858_v61 = vrot.slane %v7936_v13, %v4922_v43  ;;  %v7937_v46 = vld [vmem:[#allocation12_spill] sm:$0xff] }
 0x4b3   :  { %3952 = vperm.xlu1 %4667, %v3467_v10   ;;  %3943 = vperm.xlu0 %4666, %v3464_v14   ;;  %v1739_v51 = vsel %vm1730_vm9, %v1396_v50, %v1738_v29  ;;  %v3175_v6 = vsel %vm1728_vm8, %v2821_v53, %v3174_v34  ;;  %v4152_v10 = vrot.slane %v6459_v60, %v4916_v41 }
 0x4b4   :  { %v3324_v55 = vrot.slane %v7937_v46, %v5911_v15  ;;  %v6759_v14 = vsel %vm1732_vm10, %v1415_v24, %v1739_v51  ;;  %v6762_v28 = vsel %vm1730_vm9, %v2840_v54, %v3175_v6  ;;  %v2854_v16 = vsel %vm1122_vm2, %v2853_v26, %v2849_v7 }
 0x4b5   :  { %v4148_v50 = vrot.slane %v6442_v31, %v4913_v37  ;;  %v4171_v22 = vrot.slane %v6513_v49, %v4916_v41  ;;  %v3471_v60 = vmul.f32 %v5920_v18, %v6574_v38  ;;  %v3468_v15 = vmul.f32 %v5928_v45, %v6578_v20 }
 0x4b6   :  { %v6748_v48 = vpop.permute.xlu1 %3772  ;;  %v6750_v1 = vpop.permute.xlu0 %3769  ;;  %v6774_v24 = vsel %vm1129_vm3, %v2858_v61, %v2854_v16  ;;  %v4157_v44 = vrot.slane %v6457_v40, %v4919_v42  ;;  %v3474_v31 = vmul.f32 %v5922_v25, %v3324_v55  ;;  %v3473_v4 = vmul.f32 %v5915_v23, %v3324_v55 }
 0x4b7   :  { %3961 = vperm.xlu1 %4667, %v3470_v19   ;;  %3958 = vperm.xlu0 %4666, %v3469_v63   ;;  %v4153_v49 = vsel %vm1115_vm1, %v4152_v10, %v4148_v50  ;;  %v4167_v53 = vrot.slane %v6482_v59, %v4913_v37  ;;  %v4162_v20 = vrot.slane %v6484_v17, %v4922_v43 }
 0x4b8   :  { %v4176_v40 = vrot.slane %v6511_v0, %v4919_v42  ;;  %v4190_v2 = vrot.slane %v6566_v36, %v4916_v41  ;;  %v3475_v5 = vmul.f32 %v5920_v18, %v3324_v55  ;;  %v3472_v26 = vmul.f32 %v5928_v45, %v6574_v38 }
 0x4b9   :  { %v4172_v54 = vsel %vm1115_vm1, %v4171_v22, %v4167_v53  ;;  %v4181_v59 = vrot.slane %v6536_v57, %v4922_v43  ;;  %v3478_v17 = vmul.f32 %v5922_v25, %v6740_v9  ;;  %v3477_v7 = vmul.f32 %v5915_v23, %v6740_v9 }
 0x4ba   :  { %v3779_v3 = vpop.permute.xlu1 %3778  ;;  %v6778_v56 = vpop.permute.xlu0 %3775  ;;  %v4158_v0 = vsel %vm1122_vm2, %v4157_v44, %v4153_v49  ;;  %v4186_v36 = vrot.slane %v6534_v47, %v4913_v37  ;;  %v4209_v19 = vrot.slane %v6634_v27, %v4916_v41  ;;  %v3479_v58 = vmul.f32 %v5920_v18, %v6740_v9 }
 0x4bb   :  { %3964 = vperm.xlu1 %4667, %v3471_v60   ;;  %3955 = vperm.xlu0 %4666, %v3468_v15   ;;  %v4163_v57 = vsel %vm1129_vm3, %v4162_v20, %v4158_v0  ;;  %v4195_v25 = vrot.slane %v6564_v33, %v4919_v42  ;;  %v3476_v23 = vmul.f32 %v5928_v45, %v3324_v55 }
 0x4bc   :  { %v4177_v29 = vsel %vm1122_vm2, %v4176_v40, %v4172_v54  ;;  %v4191_v47 = vsel %vm1115_vm1, %v4190_v2, %v4186_v36  ;;  %v4205_v27 = vrot.slane %v6601_v52, %v4913_v37  ;;  %v4228_v34 = vrot.slane %v6690_v21, %v4916_v41 }
 0x4bd   :  { %v4182_v18 = vsel %vm1129_vm3, %v4181_v59, %v4177_v29  ;;  %v4200_v13 = vrot.slane %v6603_v62, %v4922_v43  ;;  %v4214_v33 = vrot.slane %v6632_v30, %v4919_v42  ;;  %v4247_v61 = vrot.slane %v6750_v1, %v4916_v41 }
 0x4be   :  { %v3785_v38 = vpop.permute.xlu1 %3784  ;;  %v3782_v63 = vpop.permute.xlu0 %3781  ;;  %v4210_v51 = vsel %vm1115_vm1, %v4209_v19, %v4205_v27  ;;  %v4224_v6 = vrot.slane %v6660_v32, %v4913_v37  ;;  %v4219_v52 = vrot.slane %v6662_v39, %v4922_v43  ;;  %v4196_v62 = vsel %vm1122_vm2, %v4195_v25, %v4191_v47 }
 0x4bf   :  { %3973 = vperm.xlu1 %4667, %v3474_v31   ;;  %3970 = vperm.xlu0 %4666, %v3473_v4   ;;  %v4266_v21 = vrot.slane %v3782_v63, %v4916_v41  ;;  %v4233_v30 = vrot.slane %v6688_v12, %v4919_v42  ;;  %v4243_v1 = vrot.slane %v6719_v8, %v4913_v37 }
 0x4c0   :  { %v4229_v55 = vsel %vm1115_vm1, %v4228_v34, %v4224_v6  ;;  %v4238_v32 = vrot.slane %v6721_v35, %v4922_v43  ;;  %v4252_v39 = vrot.slane %v6748_v48, %v4919_v42  ;;  %v4262_v16 = vrot.slane %v3779_v3, %v4913_v37 }
 0x4c1   :  { %v4215_v50 = vsel %vm1122_vm2, %v4214_v33, %v4210_v51  ;;  %v4248_v22 = vsel %vm1115_vm1, %v4247_v61, %v4243_v1  ;;  %v4257_v12 = vrot.slane %v6778_v56, %v4922_v43  ;;  %v4271_v8 = vrot.slane %v3785_v38, %v4919_v42  ;;  %v7939_v33 = vld [vmem:[#allocation69_spill] sm:$0xff]  ;;  %v7940_v51 = vld [vmem:[#allocation70_spill] sm:$0xff] }
 0x4c2   :  { %v3791_v10 = vpop.permute.xlu1 %3790  ;;  %v3788_v46 = vpop.permute.xlu0 %3787  ;;  %v4201_v60 = vsel %vm1129_vm3, %v4200_v13, %v4196_v62  ;;  %v4220_v15 = vsel %vm1129_vm3, %v4219_v52, %v4215_v50  ;;  %v4267_v35 = vsel %vm1115_vm1, %v4266_v21, %v4262_v16  ;;  %v4234_v3 = vsel %vm1122_vm2, %v4233_v30, %v4229_v55  ;;  %v7942_v62 = vld [vmem:[#allocation66_spill] sm:$0xff]  ;;  %v7943_v55 = vld [vmem:[#allocation77_spill] sm:$0xff]  ;;  %v7945_v50 = vld [vmem:[#allocation75_spill] sm:$0xff] }
 0x4c3   :  { %3976 = vperm.xlu1 %4667, %v3475_v5   ;;  %3967 = vperm.xlu0 %4666, %v3472_v26   ;;  %v4276_v44 = vrot.slane %v3788_v46, %v4922_v43  ;;  %v4281_v4 = vrot.slane %v3791_v10, %v4913_v37  ;;  %v4608_v56 = vsel %vm1720_vm4, %v4182_v18, %v4163_v57  ;;  %v7941_v10 = vld [vmem:[#allocation72_spill] sm:$0xff] }
 0x4c4   :  { %v4239_v53 = vsel %vm1129_vm3, %v4238_v32, %v4234_v3  ;;  %v4253_v20 = vsel %vm1122_vm2, %v4252_v39, %v4248_v22  ;;  %v4609_v2 = vsel %vm1722_vm5, %v4201_v60, %v4608_v56  ;;  %v4272_v26 = vsel %vm1122_vm2, %v4271_v8, %v4267_v35  ;;  %v7944_v39 = vld [vmem:[#allocation68_spill] sm:$0xff]  ;;  %v7946_v8 = vld [vmem:[#allocation74_spill] sm:$0xff] }
 0x4c5   :  { %v4258_v5 = vsel %vm1129_vm3, %v4257_v12, %v4253_v20  ;;  %v3177_v59 = vsel %vm1732_vm10, %v6774_v24, %v6762_v28  ;;  %v1760_v19 = vadd.f32 %v6425_v11, %v6759_v14  ;;  %v3480_v47 = vmul.f32 %v5928_v45, %v6740_v9  ;;  %v7938_v45 = vld [vmem:[#allocation73_spill] sm:$0xff] }
 0x4c6   :  { %v3797_v48 = vpop.permute.xlu1 %3796  ;;  %v3794_v31 = vpop.permute.xlu0 %3793  ;;  %v1442_v9 = vrot.slane %v7938_v45, %v4916_v41  ;;  %v1423_v61 = vrot.slane %v7939_v33, %v4916_v41  ;;  %v1438_v6 = vrot.slane %v7940_v51, %v4913_v37  ;;  %v1447_v46 = vrot.slane %v7941_v10, %v4919_v42  ;;  %v7959_v51 = vld [vmem:[#allocation87_spill] sm:$0xff]  ;;  %v7960_v10 = vld [vmem:[#allocation88_spill] sm:$0xff] }
 0x4c7   :  { %v4285_v49 = vrot.slane %v3794_v31, %v4916_v41  ;;  %3985 = vperm.xlu1 %4667, %v3478_v17   ;;  %3982 = vperm.xlu0 %4666, %v3477_v7   ;;  %v4290_v40 = vrot.slane %v3797_v48, %v4919_v42  ;;  %v4610_v17 = vsel %vm1724_vm6, %v4220_v15, %v4609_v2  ;;  %v7947_v15 = vld [vmem:[#allocation81_spill] sm:$0xff]  ;;  %v7948_v31 = vld [vmem:[#allocation71_spill] sm:$0xff]  ;;  %v7951_v2 = vld [vmem:[#allocation78_spill] sm:$0xff] }
 0x4c8   :  { %v4277_v7 = vsel %vm1129_vm3, %v4276_v44, %v4272_v26  ;;  %v4611_v38 = vsel %vm1726_vm7, %v4239_v53, %v4610_v17  ;;  %v3197_v24 = vadd.f32 %v3177_v59, %v1760_v19  ;;  %v1419_v30 = vrot.slane %v7942_v62, %v4913_v37  ;;  %v7950_v53 = vld [vmem:[#allocation85_spill] sm:$0xff]  ;;  %v7952_v26 = vld [vmem:[#allocation79_spill] sm:$0xff]  ;;  %v7954_v19 = vld [vmem:[#allocation80_spill] sm:$0xff] }
 0x4c9   :  { %v4286_v54 = vsel %vm1115_vm1, %v4285_v49, %v4281_v4  ;;  %v4612_v57 = vsel %vm1728_vm8, %v4258_v5, %v4611_v38  ;;  %v1443_v1 = vsel %vm1115_vm1, %v1442_v9, %v1438_v6  ;;  %v1461_v32 = vrot.slane %v7943_v55, %v4916_v41  ;;  %v7949_v49 = vld [vmem:[#allocation76_spill] sm:$0xff]  ;;  %v7953_v59 = vld [vmem:[#allocation89_spill] sm:$0xff]  ;;  %v7961_v55 = vld [vmem:[#allocation91_spill] sm:$0xff] }
 0x4ca   :  { %v6867_v0 = vpop.permute.xlu1 %3802  ;;  %v3800_v36 = vpop.permute.xlu0 %3799  ;;  %v4291_v28 = vsel %vm1122_vm2, %v4290_v40, %v4286_v54  ;;  %v4613_v25 = vsel %vm1730_vm9, %v4277_v7, %v4612_v57  ;;  %v1428_v16 = vrot.slane %v7944_v39, %v4919_v42  ;;  %v1452_v22 = vrot.slane %v7945_v50, %v4922_v43  ;;  %v7962_v50 = vld [vmem:[#allocation93_spill] sm:$0xff] }
 0x4cb   :  { %v4295_v63 = vrot.slane %v3800_v36, %v4922_v43  ;;  %3988 = vperm.xlu1 %4667, %v3479_v58   ;;  %3979 = vperm.xlu0 %4666, %v3476_v23   ;;  %v1424_v12 = vsel %vm1115_vm1, %v1423_v61, %v1419_v30  ;;  %v1457_v60 = vrot.slane %v7946_v8, %v4913_v37 }
 0x4cc   :  { %v1480_v35 = vrot.slane %v7947_v15, %v4916_v41  ;;  %v1433_v3 = vrot.slane %v7948_v31, %v4922_v43  ;;  %v1448_v4 = vsel %vm1122_vm2, %v1447_v46, %v1443_v1  ;;  %v1466_v56 = vrot.slane %v7949_v49, %v4919_v42 }
 0x4cd   :  { %v4296_v29 = vsel %vm1129_vm3, %v4295_v63, %v4291_v28  ;;  %v1499_v20 = vrot.slane %v7950_v53, %v4916_v41  ;;  %v1462_v40 = vsel %vm1115_vm1, %v1461_v32, %v1457_v60  ;;  %v1476_v5 = vrot.slane %v7951_v2, %v4913_v37  ;;  %v7955_v63 = vld [vmem:[#allocation82_spill] sm:$0xff]  ;;  %v7963_v60 = vld [vmem:[#allocation97_spill] sm:$0xff] }
 0x4ce   :  { %v4614_v11 = vsel %vm1732_vm10, %v4296_v29, %v4613_v25  ;;  %v6880_v14 = vpop.permute.xlu1 %3808  ;;  %v6882_v27 = vpop.permute.xlu0 %3805  ;;  %v1471_v54 = vrot.slane %v7952_v26, %v4922_v43  ;;  %v1518_v17 = vrot.slane %v7953_v59, %v4916_v41  ;;  %v1429_v7 = vsel %vm1122_vm2, %v1428_v16, %v1424_v12  ;;  %v7957_v29 = vld [vmem:[#allocation84_spill] sm:$0xff]  ;;  %v7965_v53 = vld [vmem:[#allocation90_spill] sm:$0xff] }
 0x4cf   :  { %v4634_v58 = vadd.f32 %v4614_v11, %v3197_v24  ;;  %3991 = vperm.xlu0 %4666, %v3480_v47   ;;  %v1453_v36 = vsel %vm1129_vm3, %v1452_v22, %v1448_v4  ;;  %v1485_v38 = vrot.slane %v7954_v19, %v4919_v42  ;;  %v1495_v57 = vrot.slane %v7955_v63, %v4913_v37  ;;  %v7956_v24 = vld [vmem:[#allocation83_spill] sm:$0xff]  ;;  %v7958_v11 = vld [vmem:[#allocation86_spill] sm:$0xff] }
 0x4d0   :  { %v1481_v28 = vsel %vm1115_vm1, %v1480_v35, %v1476_v5  ;;  %v1490_v25 = vrot.slane %v7956_v24, %v4922_v43  ;;  %v1504_v47 = vrot.slane %v7957_v29, %v4919_v42  ;;  %v1467_v33 = vsel %vm1122_vm2, %v1466_v56, %v1462_v40  ;;  %v7964_v35 = vld [vmem:[#allocation195_spill] sm:$0xff]  ;;  %v7966_v5 = vld [vmem:[#allocation92_spill] sm:$0xff] }
 0x4d1   :  { %4639 = vst.msk [vmem:[#allocation2 + $0x8] sm:$0xff] %vm4637_vm11, %v4634_v58  ;;  %v1514_v58 = vrot.slane %v7958_v11, %v4913_v37  ;;  %v1500_v61 = vsel %vm1115_vm1, %v1499_v20, %v1495_v57  ;;  %v1509_v6 = vrot.slane %v7959_v51, %v4922_v43  ;;  %v1523_v46 = vrot.slane %v7960_v10, %v4919_v42  ;;  %v7970_v57 = vld [vmem:[#allocation194_spill] sm:$0xff]  ;;  %v7972_v51 = vld [vmem:[#allocation203_spill] sm:$0xff] }
 0x4d2   :  { %v6885_v23 = vpop.permute.xlu1 %3814  ;;  %v6887_v34 = vpop.permute.xlu0 %3811  ;;  %v1434_v62 = vsel %vm1129_vm3, %v1433_v3, %v1429_v7  ;;  %v1472_v30 = vsel %vm1129_vm3, %v1471_v54, %v1467_v33  ;;  %v1528_v32 = vrot.slane %v7961_v55, %v4922_v43  ;;  %v1486_v16 = vsel %vm1122_vm2, %v1485_v38, %v1481_v28  ;;  %v7967_v54 = vld [vmem:[#allocation94_spill] sm:$0xff]  ;;  %v7969_v38 = vld [vmem:[#allocation96_spill] sm:$0xff]  ;;  %v7975_v55 = vld [vmem:[#allocation207_spill] sm:$0xff] }
 0x4d3   :  { %v1519_v1 = vsel %vm1115_vm1, %v1518_v17, %v1514_v58  ;;  %v1741_v39 = vsel %vm1720_vm4, %v1453_v36, %v1434_v62  ;;  %v1537_v22 = vrot.slane %v7962_v50, %v4916_v41  ;;  %v1491_v12 = vsel %vm1129_vm3, %v1490_v25, %v1486_v16  ;;  %v7968_v17 = vld [vmem:[#allocation192_spill] sm:$0xff]  ;;  %v7976_v50 = vld [vmem:[#allocation197_spill] sm:$0xff] }
 0x4d4   :  { %v1505_v8 = vsel %vm1122_vm2, %v1504_v47, %v1500_v61  ;;  %v1556_v15 = vrot.slane %v7963_v60, %v4916_v41  ;;  %v2867_v31 = vrot.slane %v7964_v35, %v4916_v41  ;;  %v1742_v49 = vsel %vm1722_vm5, %v1472_v30, %v1741_v39  ;;  %v7971_v47 = vld [vmem:[#allocation199_spill] sm:$0xff]  ;;  %v7974_v30 = vld [vmem:[#allocation196_spill] sm:$0xff]  ;;  %v7978_v60 = vld [vmem:[#allocation198_spill] sm:$0xff] }
 0x4d5   :  { %v1510_v56 = vsel %vm1129_vm3, %v1509_v6, %v1505_v8  ;;  %v1533_v20 = vrot.slane %v7965_v53, %v4913_v37  ;;  %v1524_v40 = vsel %vm1122_vm2, %v1523_v46, %v1519_v1  ;;  %v1542_v26 = vrot.slane %v7966_v5, %v4919_v42  ;;  %v7973_v46 = vld [vmem:[#allocation95_spill] sm:$0xff] }
 0x4d6   :  { %v6889_v18 = vpop.permute.xlu1 %3820  ;;  %v6891_v13 = vpop.permute.xlu0 %3817  ;;  %v1529_v2 = vsel %vm1129_vm3, %v1528_v32, %v1524_v40  ;;  %v1552_v59 = vrot.slane %v7967_v54, %v4913_v37  ;;  %v2863_v7 = vrot.slane %v7968_v17, %v4913_v37  ;;  %v1743_v36 = vsel %vm1724_vm6, %v1491_v12, %v1742_v49  ;;  %v7977_v12 = vld [vmem:[#allocation200_spill] sm:$0xff]  ;;  %v7983_v17 = vld [vmem:[#allocation206_spill] sm:$0xff] }
 0x4d7   :  { %v1538_v19 = vsel %vm1115_vm1, %v1537_v22, %v1533_v20  ;;  %v1561_v63 = vrot.slane %v7969_v38, %v4919_v42  ;;  %v2872_v28 = vrot.slane %v7970_v57, %v4919_v42  ;;  %v1744_v24 = vsel %vm1726_vm7, %v1510_v56, %v1743_v36  ;;  %v7980_v56 = vld [vmem:[#allocation211_spill] sm:$0xff]  ;;  %v7984_v36 = vld [vmem:[#allocation205_spill] sm:$0xff] }
 0x4d8   :  { %v1557_v25 = vsel %vm1115_vm1, %v1556_v15, %v1552_v59  ;;  %v2868_v29 = vsel %vm1115_vm1, %v2867_v31, %v2863_v7  ;;  %v2886_v11 = vrot.slane %v7971_v47, %v4916_v41  ;;  %v7007_v61 = vsel %vm1728_vm8, %v1529_v2, %v1744_v24  ;;  %v7979_v31 = vld [vmem:[#allocation204_spill] sm:$0xff]  ;;  %v7981_v2 = vld [vmem:[#allocation201_spill] sm:$0xff] }
 0x4d9   :  { %v2905_v6 = vrot.slane %v7972_v51, %v4916_v41  ;;  %v1543_v10 = vsel %vm1122_vm2, %v1542_v26, %v1538_v19  ;;  %v1547_v62 = vrot.slane %v7973_v46, %v4922_v43  ;;  %v2882_v1 = vrot.slane %v7974_v30, %v4913_v37  ;;  %v7982_v26 = vld [vmem:[#allocation202_spill] sm:$0xff] }
 0x4da   :  { %v6899_v52 = vpop.permute.xlu1 %3826  ;;  %v6901_v21 = vpop.permute.xlu0 %3823  ;;  %v2924_v32 = vrot.slane %v7975_v55, %v4916_v41  ;;  %v1562_v39 = vsel %vm1122_vm2, %v1561_v63, %v1557_v25  ;;  %v2873_v16 = vsel %vm1122_vm2, %v2872_v28, %v2868_v29  ;;  %v2877_v22 = vrot.slane %v7976_v50, %v4922_v43  ;;  %v7985_v63 = vld [vmem:[#allocation208_spill] sm:$0xff]  ;;  %v7986_v28 = vld [vmem:[#allocation209_spill] sm:$0xff]  ;;  %v7987_v25 = vld [vmem:[#allocation99_spill] sm:$0xff] }
 0x4db   :  { %v2901_v8 = vrot.slane %v7977_v12, %v4913_v37  ;;  %v2891_v15 = vrot.slane %v7978_v60, %v4919_v42  ;;  %v2887_v35 = vsel %vm1115_vm1, %v2886_v11, %v2882_v1  ;;  %v2920_v49 = vrot.slane %v7979_v31, %v4913_v37  ;;  %v7988_v11 = vld [vmem:[#allocation210_spill] sm:$0xff]  ;;  %v7990_v55 = vld [vmem:[#allocation213_spill] sm:$0xff]  ;;  %v7991_v50 = vld [vmem:[#allocation219_spill] sm:$0xff] }
 0x4dc   :  { %v2943_v53 = vrot.slane %v7980_v56, %v4916_v41  ;;  %v2896_v5 = vrot.slane %v7981_v2, %v4922_v43  ;;  %v2910_v54 = vrot.slane %v7982_v26, %v4919_v42  ;;  %v2929_v7 = vrot.slane %v7983_v17, %v4919_v42  ;;  %v7994_v26 = vld [vmem:[#allocation216_spill] sm:$0xff] }
 0x4dd   :  { %v2906_v59 = vsel %vm1115_vm1, %v2905_v6, %v2901_v8  ;;  %v2915_v19 = vrot.slane %v7984_v36, %v4922_v43  ;;  %v2925_v38 = vsel %vm1115_vm1, %v2924_v32, %v2920_v49  ;;  %v2939_v57 = vrot.slane %v7985_v63, %v4913_v37  ;;  %v7989_v6 = vld [vmem:[#allocation215_spill] sm:$0xff] }
 0x4de   :  { %v6919_v44 = vpop.permute.xlu1 %3832  ;;  %v6921_v48 = vpop.permute.xlu0 %3829  ;;  %v2934_v24 = vrot.slane %v7986_v28, %v4922_v43  ;;  %v1566_v29 = vrot.slane %v7987_v25, %v4922_v43  ;;  %v2878_v47 = vsel %vm1129_vm3, %v2877_v22, %v2873_v16  ;;  %v2948_v51 = vrot.slane %v7988_v11, %v4919_v42  ;;  %v7997_v28 = vld [vmem:[#allocation221_spill] sm:$0xff] }
 0x4df   :  { %v2962_v46 = vrot.slane %v7989_v6, %v4916_v41  ;;  %v2892_v30 = vsel %vm1122_vm2, %v2891_v15, %v2887_v35  ;;  %v2944_v1 = vsel %vm1115_vm1, %v2943_v53, %v2939_v57  ;;  %v2953_v32 = vrot.slane %v7990_v55, %v4922_v43  ;;  %v7992_v15 = vld [vmem:[#allocation212_spill] sm:$0xff]  ;;  %v7993_v53 = vld [vmem:[#allocation214_spill] sm:$0xff] }
 0x4e0   :  { %v2981_v12 = vrot.slane %v7991_v50, %v4916_v41  ;;  %v2897_v16 = vsel %vm1129_vm3, %v2896_v5, %v2892_v30  ;;  %v2911_v22 = vsel %vm1122_vm2, %v2910_v54, %v2906_v59  ;;  %v2930_v31 = vsel %vm1122_vm2, %v2929_v7, %v2925_v38  ;;  %v7995_v54 = vld [vmem:[#allocation217_spill] sm:$0xff]  ;;  %v7996_v7 = vld [vmem:[#allocation218_spill] sm:$0xff]  ;;  %v7998_v30 = vld [vmem:[#allocation223_spill] sm:$0xff] }
 0x4e1   :  { %v2958_v35 = vrot.slane %v7992_v15, %v4913_v37  ;;  %v2916_v49 = vsel %vm1129_vm3, %v2915_v19, %v2911_v22  ;;  %v2935_v56 = vsel %vm1129_vm3, %v2934_v24, %v2930_v31  ;;  %v2967_v2 = vrot.slane %v7993_v53, %v4919_v42  ;;  %v8000_v22 = vld [vmem:[#allocation222_spill] sm:$0xff] }
 0x4e2   :  { %v6950_v45 = vpop.permute.xlu1 %3838  ;;  %v6952_v9 = vpop.permute.xlu0 %3835  ;;  %v2977_v17 = vrot.slane %v7994_v26, %v4913_v37  ;;  %v2949_v36 = vsel %vm1122_vm2, %v2948_v51, %v2944_v1  ;;  %v2972_v59 = vrot.slane %v7995_v54, %v4922_v43  ;;  %v2986_v38 = vrot.slane %v7996_v7, %v4919_v42 }
 0x4e3   :  { %v2963_v5 = vsel %vm1115_vm1, %v2962_v46, %v2958_v35  ;;  %v3178_v19 = vsel %vm1720_vm4, %v2897_v16, %v2878_v47  ;;  %v2954_v63 = vsel %vm1129_vm3, %v2953_v32, %v2949_v36  ;;  %v2991_v24 = vrot.slane %v7997_v28, %v4922_v43 }
 0x4e4   :  { %v2982_v57 = vsel %vm1115_vm1, %v2981_v12, %v2977_v17  ;;  %v1548_v51 = vsel %vm1129_vm3, %v1547_v62, %v1543_v10  ;;  %v1567_v6 = vsel %vm1129_vm3, %v1566_v29, %v1562_v39  ;;  %v3179_v46 = vsel %vm1722_vm5, %v2916_v49, %v3178_v19  ;;  %v7999_v62 = vld [vmem:[#allocation220_spill] sm:$0xff] }
 0x4e5   :  { %v3000_v47 = vrot.slane %v7998_v30, %v4916_v41  ;;  %v3180_v1 = vsel %vm1724_vm6, %v2935_v56, %v3179_v46  ;;  %v2968_v55 = vsel %vm1122_vm2, %v2967_v2, %v2963_v5  ;;  %v4304_v32 = vrot.slane %v6882_v27, %v4916_v41  ;;  %v8001_v56 = vld [vmem:[#allocation225_spill] sm:$0xff] }
 0x4e6   :  { %v6975_v3 = vpop.permute.xlu1 %3844  ;;  %v6977_v4 = vpop.permute.xlu0 %3841  ;;  %v4323_v50 = vrot.slane %v6891_v13, %v4916_v41  ;;  %v3181_v12 = vsel %vm1726_vm7, %v2954_v63, %v3180_v1  ;;  %v2973_v10 = vsel %vm1129_vm3, %v2972_v59, %v2968_v55  ;;  %v2996_v39 = vrot.slane %v7999_v62, %v4913_v37 }
 0x4e7   :  { %v2987_v29 = vsel %vm1122_vm2, %v2986_v38, %v2982_v57  ;;  %v3005_v31 = vrot.slane %v8000_v22, %v4919_v42  ;;  %v4300_v27 = vrot.slane %v6867_v0, %v4913_v37  ;;  %v4319_v13 = vrot.slane %v6885_v23, %v4913_v37 }
 0x4e8   :  { %v2992_v16 = vsel %vm1129_vm3, %v2991_v24, %v2987_v29  ;;  %v3001_v49 = vsel %vm1115_vm1, %v3000_v47, %v2996_v39  ;;  %v3010_v53 = vrot.slane %v8001_v56, %v4922_v43  ;;  %v4309_v2 = vrot.slane %v6880_v14, %v4919_v42 }
 0x4e9   :  { %v4328_v26 = vrot.slane %v6889_v18, %v4919_v42  ;;  %v4305_v17 = vsel %vm1115_vm1, %v4304_v32, %v4300_v27  ;;  %v4314_v0 = vrot.slane %v6887_v34, %v4922_v43  ;;  %v4324_v23 = vsel %vm1115_vm1, %v4323_v50, %v4319_v13 }
 0x4ea   :  { %v7002_v58 = vpop.permute.xlu1 %3850  ;;  %v7004_v33 = vpop.permute.xlu0 %3847  ;;  %v4333_v36 = vrot.slane %v6901_v21, %v4922_v43  ;;  %v1746_v5 = vsel %vm1730_vm9, %v1548_v51, %v7007_v61  ;;  %v3182_v54 = vsel %vm1728_vm8, %v2973_v10, %v3181_v12  ;;  %v4342_v14 = vrot.slane %v6921_v48, %v4916_v41 }
 0x4eb   :  { %v1747_v18 = vsel %vm1732_vm10, %v1567_v6, %v1746_v5  ;;  %v3183_v59 = vsel %vm1730_vm9, %v2992_v16, %v3182_v54  ;;  %v3006_v7 = vsel %vm1122_vm2, %v3005_v31, %v3001_v49  ;;  %v4310_v19 = vsel %vm1122_vm2, %v4309_v2, %v4305_v17  ;;  %v7205_v54 = vld [vmem:[%s7549_s2] ss:$0 sm:$0xff]  ;;  %s4724_s2 = smov [#allocation2]  }
 0x4ec   :  { %v4338_v21 = vrot.slane %v6899_v52, %v4913_v37  ;;  %v4329_v61 = vsel %vm1122_vm2, %v4328_v26, %v4324_v23  ;;  %v4361_v63 = vrot.slane %v6977_v4, %v4916_v41  ;;  %v3011_v48 = vsel %vm1129_vm3, %v3010_v53, %v3006_v7  ;;  %s4647_s30 = sshll.u32 %s4724_s2, 4  ;;  %s4648_s30 = int_to_ptr.vmem [resolvable:$true] %s4647_s30 }
 0x4ed   :  { %v4315_v57 = vsel %vm1129_vm3, %v4314_v0, %v4310_v19  ;;  %v4334_v28 = vsel %vm1129_vm3, %v4333_v36, %v4329_v61  ;;  %v4347_v51 = vrot.slane %v6919_v44, %v4919_v42  ;;  %v4357_v52 = vrot.slane %v6950_v45, %v4913_v37  ;;  %s4701_s4 = scalar_lea.vmem %s4648_s30, 512  ;;  %p4706_p1 = scmp.lt.s32.totalorder %s4648_s30, %s4648_s30 }
 0x4ee   :  { %v7031_v20 = vpop.permute.xlu1 %3856  ;;  %v7033_v40 = vpop.permute.xlu0 %3853  ;;  %v4343_v6 = vsel %vm1115_vm1, %v4342_v14, %v4338_v21  ;;  %v4352_v46 = vrot.slane %v6952_v9, %v4922_v43  ;;  %v4366_v30 = vrot.slane %v6975_v3, %v4919_v42  ;;  %v4371_v45 = vrot.slane %v7004_v33, %v4922_v43  ;;  %p4702_p0 = scmp.ne.s32.totalorder %s4648_s30, %s4701_s4  ;;  %p4707_p2 = scmp.lt.s32.totalorder %s4701_s4, %s4701_s4 }
 0x4ef   :  { %v4380_v24 = vrot.slane %v7033_v40, %v4916_v41  ;;  %v4376_v40 = vrot.slane %v7002_v58, %v4913_v37  ;;  %v4362_v55 = vsel %vm1115_vm1, %v4361_v63, %v4357_v52  ;;  %v4348_v12 = vsel %vm1122_vm2, %v4347_v51, %v4343_v6  ;;  %v8002_v52 = vld [vmem:[#allocation101_spill] sm:$0xff] }
 0x4f0   :  { %v4367_v62 = vsel %vm1122_vm2, %v4366_v30, %v4362_v55  ;;  %v4615_v13 = vsel %vm1720_vm4, %v4334_v28, %v4315_v57  ;;  %v3184_v17 = vsel %vm1732_vm10, %v3011_v48, %v3183_v59  ;;  %v1761_v14 = vadd.f32 %v7205_v54, %v1747_v18  ;;  %p4708_p3 = por %p4707_p2, %p4706_p1 }
 0x4f1   :  { %v4381_v3 = vsel %vm1115_vm1, %v4380_v24, %v4376_v40  ;;  %v4372_v16 = vsel %vm1129_vm3, %v4371_v45, %v4367_v62  ;;  %v8004_v40 = vld [vmem:[#allocation98_spill] sm:$0xff] }
 0x4f2   :  { %v7062_v8 = vpop.permute.xlu1 %3862  ;;  %v7064_v60 = vpop.permute.xlu0 %3859  ;;  %v3198_v19 = vadd.f32 %v3184_v17, %v1761_v14  ;;  %v8018_v14 = vld [vmem:[#allocation112_spill] sm:$0xff]  ;;  %p4709_p4 = pnand %p4708_p3, %p4702_p0 }
 0x4f3   :  { %v4395_v9 = vrot.slane %v7062_v8, %v4913_v37  ;;  %v4390_v58 = vrot.slane %v7064_v60, %v4922_v43  ;;  %v4353_v8 = vsel %vm1129_vm3, %v4352_v46, %v4348_v12  ;;  %v8003_v46 = vld [vmem:[#allocation105_spill] sm:$0xff] }
 0x4f4   :  { %v4616_v56 = vsel %vm1722_vm5, %v4353_v8, %v4615_v13  ;;  %v1594_v30 = vrot.slane %v8003_v46, %v4916_v41  ;;  %v8008_v12 = vld [vmem:[#allocation109_spill] sm:$0xff]  ;;  %v8010_v8 = vld [vmem:[#allocation106_spill] sm:$0xff] }
 0x4f5   :  { %v4617_v0 = vsel %vm1724_vm6, %v4372_v16, %v4616_v56  ;;  %v1609_v62 = vrot.slane %v8010_v8, %v4913_v37  ;;  %v8013_v13 = vld [vmem:[#allocation117_spill] sm:$0xff] }
 0x4f6   :  { %v7088_v25 = vpop.permute.xlu1 %3868  ;;  %v7090_v11 = vpop.permute.xlu0 %3865 }
 0x4f7   :  { %v4399_v4 = vrot.slane %v7090_v11, %v4916_v41  ;;  %v4385_v11 = vrot.slane %v7031_v20, %v4919_v42  ;;  %v4404_v32 = vrot.slane %v7088_v25, %v4919_v42 }
 0x4f9   :  { %v4400_v33 = vsel %vm1115_vm1, %v4399_v4, %v4395_v9  ;;  %v4386_v22 = vsel %vm1122_vm2, %v4385_v11, %v4381_v3  ;;  %v1575_v4 = vrot.slane %v8002_v52, %v4916_v41  ;;  %v8006_v11 = vld [vmem:[#allocation100_spill] sm:$0xff] }
 0x4fa   :  { %v3875_v15 = vpop.permute.xlu1 %3874  ;;  %v7115_v35 = vpop.permute.xlu0 %3871  ;;  %v1580_v9 = vrot.slane %v8006_v11, %v4919_v42  ;;  %v8007_v3 = vld [vmem:[#allocation104_spill] sm:$0xff] }
 0x4fb   :  { %v4414_v50 = vrot.slane %v3875_v15, %v4913_v37  ;;  %v4409_v20 = vrot.slane %v7115_v35, %v4922_v43  ;;  %v4391_v15 = vsel %vm1129_vm3, %v4390_v58, %v4386_v22  ;;  %v4405_v35 = vsel %vm1122_vm2, %v4404_v32, %v4400_v33 }
 0x4fc   :  { %v4618_v7 = vsel %vm1726_vm7, %v4391_v15, %v4617_v0  ;;  %v1599_v58 = vrot.slane %v8007_v3, %v4919_v42  ;;  %v1613_v33 = vrot.slane %v8008_v12, %v4916_v41  ;;  %v1651_v15 = vrot.slane %v8013_v13, %v4916_v41  ;;  %v8017_v0 = vld [vmem:[#allocation103_spill] sm:$0xff] }
 0x4fd   :  { %v4410_v53 = vsel %vm1129_vm3, %v4409_v20, %v4405_v35  ;;  %v8009_v20 = vld [vmem:[#allocation107_spill] sm:$0xff] }
 0x4fe   :  { %v3881_v34 = vpop.permute.xlu1 %3880  ;;  %v3878_v38 = vpop.permute.xlu0 %3877  ;;  %v4619_v59 = vsel %vm1728_vm8, %v4410_v53, %v4618_v7  ;;  %v1614_v35 = vsel %vm1115_vm1, %v1613_v33, %v1609_v62  ;;  %v8015_v53 = vld [vmem:[#allocation111_spill] sm:$0xff]  ;;  %v1637_v7 = vrot.slane %v8018_v14, %v4919_v42 }
 0x4ff   :  { %v4418_v47 = vrot.slane %v3878_v38, %v4916_v41  ;;  %v4423_v10 = vrot.slane %v3881_v34, %v4919_v42 }
 0x501   :  { %v4419_v60 = vsel %vm1115_vm1, %v4418_v47, %v4414_v50  ;;  %v1571_v47 = vrot.slane %v8004_v40, %v4913_v37 }
 0x502   :  { %v3887_v44 = vpop.permute.xlu1 %3886  ;;  %v3884_v1 = vpop.permute.xlu0 %3883  ;;  %v4424_v2 = vsel %vm1122_vm2, %v4423_v10, %v4419_v60  ;;  %v1604_v10 = vrot.slane %v8009_v20, %v4922_v43  ;;  %v8011_v60 = vld [vmem:[#allocation113_spill] sm:$0xff] }
 0x503   :  { %v4428_v39 = vrot.slane %v3884_v1, %v4922_v43  ;;  %v4433_v31 = vrot.slane %v3887_v44, %v4913_v37  ;;  %v8005_v44 = vld [vmem:[#allocation102_spill] sm:$0xff]  ;;  %v1576_v32 = vsel %vm1115_vm1, %v1575_v4, %v1571_v47  ;;  %v8023_v47 = vld [vmem:[#allocation119_spill] sm:$0xff] }
 0x504   :  { %v1590_v1 = vrot.slane %v8005_v44, %v4913_v37  ;;  %v1581_v16 = vsel %vm1122_vm2, %v1580_v9, %v1576_v32  ;;  %v1661_v44 = vrot.slane %v8023_v47, %v4922_v43 }
 0x505   :  { %v4429_v23 = vsel %vm1129_vm3, %v4428_v39, %v4424_v2  ;;  %v1632_v39 = vrot.slane %v8011_v60, %v4916_v41  ;;  %v1623_v2 = vrot.slane %v8015_v53, %v4922_v43  ;;  %v8027_v60 = vld [vmem:[#allocation122_spill] sm:$0xff]  ;;  %v8029_v53 = vld [vmem:[#allocation127_spill] sm:$0xff] }
 0x506   :  { %v3893_v25 = vpop.permute.xlu1 %3892  ;;  %v3890_v29 = vpop.permute.xlu0 %3889  ;;  %v4620_v21 = vsel %vm1730_vm9, %v4429_v23, %v4619_v59  ;;  %v1595_v50 = vsel %vm1115_vm1, %v1594_v30, %v1590_v1  ;;  %v1585_v23 = vrot.slane %v8017_v0, %v4922_v43  ;;  %v8024_v1 = vld [vmem:[#allocation120_spill] sm:$0xff] }
 0x507   :  { %v4437_v27 = vrot.slane %v3890_v29, %v4916_v41  ;;  %v4442_v49 = vrot.slane %v3893_v25, %v4919_v42  ;;  %v1600_v22 = vsel %vm1122_vm2, %v1599_v58, %v1595_v50  ;;  %v1675_v11 = vrot.slane %v8024_v1, %v4919_v42  ;;  %v8025_v58 = vld [vmem:[#allocation123_spill] sm:$0xff]  ;;  %v8026_v50 = vld [vmem:[#allocation125_spill] sm:$0xff] }
 0x508   :  { %v1680_v32 = vrot.slane %v8025_v58, %v4922_v43  ;;  %v1689_v12 = vrot.slane %v8026_v50, %v4916_v41  ;;  %v1586_v33 = vsel %vm1129_vm3, %v1585_v23, %v1581_v16  ;;  %v8031_v23 = vld [vmem:[#allocation227_spill] sm:$0xff] }
 0x509   :  { %v4438_v26 = vsel %vm1115_vm1, %v4437_v27, %v4433_v31  ;;  %v8012_v31 = vld [vmem:[#allocation108_spill] sm:$0xff]  ;;  %v8036_v1 = vld [vmem:[#allocation235_spill] sm:$0xff] }
 0x50a   :  { %v7200_v36 = vpop.permute.xlu1 %3898  ;;  %v3896_v5 = vpop.permute.xlu0 %3895  ;;  %v4443_v38 = vsel %vm1122_vm2, %v4442_v49, %v4438_v26  ;;  %v1618_v27 = vrot.slane %v8012_v31, %v4919_v42  ;;  %v8014_v49 = vld [vmem:[#allocation110_spill] sm:$0xff]  ;;  %v8016_v26 = vld [vmem:[#allocation121_spill] sm:$0xff] }
 0x50b   :  { %v4447_v34 = vrot.slane %v3896_v5, %v4922_v43  ;;  %v1628_v56 = vrot.slane %v8014_v49, %v4913_v37  ;;  %v1670_v17 = vrot.slane %v8016_v26, %v4916_v41  ;;  %v1605_v5 = vsel %vm1129_vm3, %v1604_v10, %v1600_v22  ;;  %v8030_v26 = vld [vmem:[#allocation129_spill] sm:$0xff] }
 0x50c   :  { %v1619_v30 = vsel %vm1122_vm2, %v1618_v27, %v1614_v35  ;;  %v1748_v10 = vsel %vm1720_vm4, %v1605_v5, %v1586_v33  ;;  %v3019_v5 = vrot.slane %v8031_v23, %v4916_v41  ;;  %v8047_v23 = vld [vmem:[#allocation237_spill] sm:$0xff] }
 0x50d   :  { %v4448_v61 = vsel %vm1129_vm3, %v4447_v34, %v4443_v38  ;;  %v8019_v34 = vld [vmem:[#allocation114_spill] sm:$0xff]  ;;  %v1633_v38 = vsel %vm1115_vm1, %v1632_v39, %v1628_v56  ;;  %v1624_v9 = vsel %vm1129_vm3, %v1623_v2, %v1619_v30  ;;  %v1685_v39 = vrot.slane %v8027_v60, %v4913_v37  ;;  %v8042_v60 = vld [vmem:[#allocation232_spill] sm:$0xff] }
 0x50e   :  { %v4621_v63 = vsel %vm1732_vm10, %v4448_v61, %v4620_v21  ;;  %v7215_v48 = vpop.permute.xlu1 %3904  ;;  %v7217_v57 = vpop.permute.xlu0 %3901  ;;  %v1647_v59 = vrot.slane %v8019_v34, %v4913_v37  ;;  %v8021_v61 = vld [vmem:[#allocation116_spill] sm:$0xff]  ;;  %v1638_v20 = vsel %vm1122_vm2, %v1637_v7, %v1633_v38  ;;  %v1749_v27 = vsel %vm1722_vm5, %v1624_v9, %v1748_v10  ;;  %v8032_v7 = vld [vmem:[#allocation126_spill] sm:$0xff] }
 0x50f   :  { %v4635_v18 = vadd.f32 %v4621_v63, %v3198_v19  ;;  %v8020_v19 = vld [vmem:[#allocation115_spill] sm:$0xff]  ;;  %v1656_v63 = vrot.slane %v8021_v61, %v4919_v42  ;;  %v1690_v56 = vsel %vm1115_vm1, %v1689_v12, %v1685_v39  ;;  %v1699_v2 = vrot.slane %v8029_v53, %v4922_v43  ;;  %v8033_v61 = vld [vmem:[#allocation224_spill] sm:$0xff]  ;;  %v8037_v9 = vld [vmem:[#allocation226_spill] sm:$0xff] }
 0x510   :  { %v1642_v21 = vrot.slane %v8020_v19, %v4922_v43  ;;  %v1652_v40 = vsel %vm1115_vm1, %v1651_v15, %v1647_v59  ;;  %v8028_v15 = vld [vmem:[#allocation124_spill] sm:$0xff]  ;;  %v1704_v34 = vrot.slane %v8032_v7, %v4913_v37  ;;  %v8039_v12 = vld [vmem:[#allocation239_spill] sm:$0xff]  ;;  %v3053_v39 = vrot.slane %v8042_v60, %v4913_v37  ;;  %v8045_v53 = vld [vmem:[#allocation234_spill] sm:$0xff] }
 0x511   :  { %4640 = vst.msk [vmem:[#allocation2 + $0x10] sm:$0xff] %vm4637_vm11, %v4635_v18  ;;  %v8022_v18 = vld [vmem:[#allocation118_spill] sm:$0xff]  ;;  %v1657_v62 = vsel %vm1122_vm2, %v1656_v63, %v1652_v40  ;;  %v1694_v35 = vrot.slane %v8028_v15, %v4919_v42  ;;  %v3015_v63 = vrot.slane %v8033_v61, %v4913_v37  ;;  %v8035_v40 = vld [vmem:[#allocation128_spill] sm:$0xff]  ;;  %v3076_v33 = vrot.slane %v8039_v12, %v4916_v41 }
 0x512   :  { %v7220_v28 = vpop.permute.xlu1 %3910  ;;  %v7222_v24 = vpop.permute.xlu0 %3907  ;;  %v1666_v52 = vrot.slane %v8022_v18, %v4913_v37  ;;  %v1643_v8 = vsel %vm1129_vm3, %v1642_v21, %v1638_v20  ;;  %v1662_v13 = vsel %vm1129_vm3, %v1661_v44, %v1657_v62  ;;  %v8034_v18 = vld [vmem:[#allocation231_spill] sm:$0xff]  ;;  %v1713_v47 = vrot.slane %v8035_v40, %v4919_v42  ;;  %v8040_v20 = vld [vmem:[#allocation229_spill] sm:$0xff] }
 0x513   :  { %v1750_v0 = vsel %vm1724_vm6, %v1643_v8, %v1749_v27  ;;  %v1695_v21 = vsel %vm1122_vm2, %v1694_v35, %v1690_v56  ;;  %v3020_v58 = vsel %vm1115_vm1, %v3019_v5, %v3015_v63  ;;  %v3029_v10 = vrot.slane %v8040_v20, %v4922_v43  ;;  %v8041_v8 = vld [vmem:[#allocation230_spill] sm:$0xff]  ;;  %v8043_v27 = vld [vmem:[#allocation243_spill] sm:$0xff]  ;;  %v8050_v63 = vld [vmem:[#allocation241_spill] sm:$0xff] }
 0x514   :  { %v1671_v3 = vsel %vm1115_vm1, %v1670_v17, %v1666_v52  ;;  %v1708_v17 = vrot.slane %v8030_v26, %v4916_v41  ;;  %v1751_v14 = vsel %vm1726_vm7, %v1662_v13, %v1750_v0  ;;  %v3038_v52 = vrot.slane %v8034_v18, %v4916_v41  ;;  %v8046_v26 = vld [vmem:[#allocation236_spill] sm:$0xff]  ;;  %v8054_v20 = vld [vmem:[#allocation245_spill] sm:$0xff] }
 0x515   :  { %v1676_v16 = vsel %vm1122_vm2, %v1675_v11, %v1671_v3  ;;  %v1700_v30 = vsel %vm1129_vm3, %v1699_v2, %v1695_v21  ;;  %v3057_v11 = vrot.slane %v8036_v1, %v4916_v41  ;;  %v3024_v3 = vrot.slane %v8037_v9, %v4919_v42  ;;  %v8052_v1 = vld [vmem:[#allocation247_spill] sm:$0xff]  ;;  %v8053_v9 = vld [vmem:[#allocation130_spill] sm:$0xff] }
 0x516   :  { %v7224_v51 = vpop.permute.xlu1 %3916  ;;  %v7226_v6 = vpop.permute.xlu0 %3913  ;;  %v1681_v49 = vsel %vm1129_vm3, %v1680_v32, %v1676_v16  ;;  %v1709_v44 = vsel %vm1115_vm1, %v1708_v17, %v1704_v34  ;;  %v8038_v32 = vld [vmem:[#allocation228_spill] sm:$0xff]  ;;  %v3043_v62 = vrot.slane %v8041_v8, %v4919_v42  ;;  %v3095_v13 = vrot.slane %v8043_v27, %v4916_v41 }
 0x517   :  { %v1752_v19 = vsel %vm1728_vm8, %v1681_v49, %v1751_v14  ;;  %v3034_v50 = vrot.slane %v8038_v32, %v4913_v37  ;;  %v8044_v49 = vld [vmem:[#allocation233_spill] sm:$0xff]  ;;  %v3062_v2 = vrot.slane %v8045_v53, %v4919_v42  ;;  %v3072_v17 = vrot.slane %v8046_v26, %v4913_v37  ;;  %v8048_v14 = vld [vmem:[#allocation238_spill] sm:$0xff]  ;;  %v8049_v34 = vld [vmem:[#allocation240_spill] sm:$0xff] }
 0x518   :  { %v3048_v56 = vrot.slane %v8044_v49, %v4922_v43  ;;  %v3058_v0 = vsel %vm1115_vm1, %v3057_v11, %v3053_v39  ;;  %v3067_v5 = vrot.slane %v8047_v23, %v4922_v43  ;;  %v3081_v7 = vrot.slane %v8048_v14, %v4919_v42  ;;  %v8055_v53 = vld [vmem:[#allocation244_spill] sm:$0xff] }
 0x519   :  { %v3039_v35 = vsel %vm1115_vm1, %v3038_v52, %v3034_v50  ;;  %v3091_v21 = vrot.slane %v8049_v34, %v4913_v37  ;;  %v3077_v61 = vsel %vm1115_vm1, %v3076_v33, %v3072_v17  ;;  %v3086_v18 = vrot.slane %v8050_v63, %v4922_v43  ;;  %v8051_v52 = vld [vmem:[#allocation242_spill] sm:$0xff] }
 0x51a   :  { %v7236_v55 = vpop.permute.xlu1 %3922  ;;  %v7238_v45 = vpop.permute.xlu0 %3919  ;;  %v3100_v40 = vrot.slane %v8051_v52, %v4919_v42  ;;  %v3114_v11 = vrot.slane %v8052_v1, %v4916_v41  ;;  %v1718_v32 = vrot.slane %v8053_v9, %v4922_v43  ;;  %v3044_v50 = vsel %vm1122_vm2, %v3043_v62, %v3039_v35  ;;  %v8056_v17 = vld [vmem:[#allocation246_spill] sm:$0xff]  ;;  %v8060_v1 = vld [vmem:[#allocation248_spill] sm:$0xff] }
 0x51b   :  { %v3096_v12 = vsel %vm1115_vm1, %v3095_v13, %v3091_v21  ;;  %v3105_v8 = vrot.slane %v8054_v20, %v4922_v43  ;;  %v3025_v39 = vsel %vm1122_vm2, %v3024_v3, %v3020_v58  ;;  %v3049_v27 = vsel %vm1129_vm3, %v3048_v56, %v3044_v50  ;;  %v8057_v56 = vld [vmem:[#allocation249_spill] sm:$0xff]  ;;  %v8062_v20 = vld [vmem:[#allocation252_spill] sm:$0xff] }
 0x51c   :  { %v3063_v49 = vsel %vm1122_vm2, %v3062_v2, %v3058_v0  ;;  %v3110_v26 = vrot.slane %v8055_v53, %v4913_v37  ;;  %v3030_v62 = vsel %vm1129_vm3, %v3029_v10, %v3025_v39  ;;  %v3082_v35 = vsel %vm1122_vm2, %v3081_v7, %v3077_v61  ;;  %v8058_v7 = vld [vmem:[#allocation251_spill] sm:$0xff] }
 0x51d   :  { %v3068_v13 = vsel %vm1129_vm3, %v3067_v5, %v3063_v49  ;;  %v3119_v23 = vrot.slane %v8056_v17, %v4919_v42  ;;  %v3087_v14 = vsel %vm1129_vm3, %v3086_v18, %v3082_v35  ;;  %v3101_v3 = vsel %vm1122_vm2, %v3100_v40, %v3096_v12  ;;  %v8059_v40 = vld [vmem:[#allocation255_spill] sm:$0xff] }
 0x51e   :  { %v7254_v25 = vpop.permute.xlu1 %3928  ;;  %v7256_v29 = vpop.permute.xlu0 %3925  ;;  %v3115_v58 = vsel %vm1115_vm1, %v3114_v11, %v3110_v26  ;;  %v3124_v2 = vrot.slane %v8057_v56, %v4922_v43  ;;  %v1714_v0 = vsel %vm1122_vm2, %v1713_v47, %v1709_v44  ;;  %v3185_v10 = vsel %vm1720_vm4, %v3049_v27, %v3030_v62  ;;  %v8063_v27 = vld [vmem:[#allocation253_spill] sm:$0xff] }
 0x51f   :  { %v3106_v5 = vsel %vm1129_vm3, %v3105_v8, %v3101_v3  ;;  %v3133_v34 = vrot.slane %v8058_v7, %v4916_v41  ;;  %v1753_v63 = vsel %vm1730_vm9, %v1700_v30, %v1752_v19  ;;  %v1719_v18 = vsel %vm1129_vm3, %v1718_v32, %v1714_v0  ;;  %v8061_v30 = vld [vmem:[#allocation250_spill] sm:$0xff] }
 0x520   :  { %v3186_v52 = vsel %vm1722_vm5, %v3068_v13, %v3185_v10  ;;  %v3152_v47 = vrot.slane %v8059_v40, %v4916_v41  ;;  %v3129_v11 = vrot.slane %v8060_v1, %v4913_v37  ;;  %v3120_v9 = vsel %vm1122_vm2, %v3119_v23, %v3115_v58  ;;  %v8064_v13 = vld [vmem:[#allocation254_spill] sm:$0xff]  ;;  %v8065_v23 = vld [vmem:[#allocation256_spill] sm:$0xff] }
 0x521   :  { %v3187_v44 = vsel %vm1724_vm6, %v3087_v14, %v3186_v52  ;;  %v4456_v50 = vrot.slane %v7217_v57, %v4916_v41  ;;  %v3125_v19 = vsel %vm1129_vm3, %v3124_v2, %v3120_v9  ;;  %v3138_v32 = vrot.slane %v8061_v30, %v4919_v42 }
 0x522   :  { %v7285_v4 = vpop.permute.xlu1 %3934  ;;  %v7287_v46 = vpop.permute.xlu0 %3931  ;;  %v3188_v12 = vsel %vm1726_vm7, %v3106_v5, %v3187_v44  ;;  %v3148_v8 = vrot.slane %v8062_v20, %v4913_v37  ;;  %v3134_v39 = vsel %vm1115_vm1, %v3133_v34, %v3129_v11  ;;  %v3143_v49 = vrot.slane %v8063_v27, %v4922_v43 }
 0x523   :  { %v4452_v53 = vrot.slane %v7200_v36, %v4913_v37  ;;  %v4475_v57 = vrot.slane %v7226_v6, %v4916_v41  ;;  %v3157_v35 = vrot.slane %v8064_v13, %v4919_v42  ;;  %v3162_v14 = vrot.slane %v8065_v23, %v4922_v43 }
 0x524   :  { %v3153_v17 = vsel %vm1115_vm1, %v3152_v47, %v3148_v8  ;;  %v4461_v3 = vrot.slane %v7215_v48, %v4919_v42  ;;  %v4471_v6 = vrot.slane %v7220_v28, %v4913_v37  ;;  %v4466_v58 = vrot.slane %v7222_v24, %v4922_v43 }
 0x525   :  { %v4457_v36 = vsel %vm1115_vm1, %v4456_v50, %v4452_v53  ;;  %v4494_v56 = vrot.slane %v7256_v29, %v4916_v41  ;;  %v1754_v2 = vsel %vm1732_vm10, %v1719_v18, %v1753_v63  ;;  %v3189_v0 = vsel %vm1728_vm8, %v3125_v19, %v3188_v12 }
 0x526   :  { %v7308_v22 = vpop.permute.xlu1 %3940  ;;  %v7310_v31 = vpop.permute.xlu0 %3937  ;;  %v3139_v10 = vsel %vm1122_vm2, %v3138_v32, %v3134_v39  ;;  %v4480_v48 = vrot.slane %v7224_v51, %v4919_v42  ;;  %v4476_v7 = vsel %vm1115_vm1, %v4475_v57, %v4471_v6  ;;  %v4490_v28 = vrot.slane %v7236_v55, %v4913_v37 }
 0x527   :  { %v3144_v5 = vsel %vm1129_vm3, %v3143_v49, %v3139_v10  ;;  %v4513_v24 = vrot.slane %v7310_v31, %v4916_v41  ;;  %v3158_v63 = vsel %vm1122_vm2, %v3157_v35, %v3153_v17  ;;  %v4462_v18 = vsel %vm1122_vm2, %v4461_v3, %v4457_v36 }
 0x528   :  { %v4485_v52 = vrot.slane %v7238_v45, %v4922_v43  ;;  %v4499_v51 = vrot.slane %v7254_v25, %v4919_v42  ;;  %v3163_v40 = vsel %vm1129_vm3, %v3162_v14, %v3158_v63  ;;  %v4467_v47 = vsel %vm1129_vm3, %v4466_v58, %v4462_v18 }
 0x529   :  { %v4495_v55 = vsel %vm1115_vm1, %v4494_v56, %v4490_v28  ;;  %v4509_v31 = vrot.slane %v7285_v4, %v4913_v37  ;;  %v4481_v44 = vsel %vm1122_vm2, %v4480_v48, %v4476_v7  ;;  %v4518_v1 = vrot.slane %v7308_v22, %v4919_v42 }
 0x52a   :  { %v7329_v59 = vpop.permute.xlu1 %3949  ;;  %v7331_v38 = vpop.permute.xlu0 %3946  ;;  %v4504_v11 = vrot.slane %v7287_v46, %v4922_v43  ;;  %v4486_v22 = vsel %vm1129_vm3, %v4485_v52, %v4481_v44  ;;  %v3190_v3 = vsel %vm1730_vm9, %v3144_v5, %v3189_v0  ;;  %v1762_v48 = vadd.f32 %v7205_v54, %v1754_v2 }
 0x52b   :  { %v4532_v45 = vrot.slane %v7329_v59, %v4916_v41  ;;  %v4528_v25 = vrot.slane %v7331_v38, %v4913_v37  ;;  %v4514_v9 = vsel %vm1115_vm1, %v4513_v24, %v4509_v31  ;;  %v4500_v59 = vsel %vm1122_vm2, %v4499_v51, %v4495_v55 }
 0x52c   :  { %v4519_v8 = vsel %vm1122_vm2, %v4518_v1, %v4514_v9  ;;  %v4622_v39 = vsel %vm1720_vm4, %v4486_v22, %v4467_v47 }
 0x52d   :  { %v4533_v20 = vsel %vm1115_vm1, %v4532_v45, %v4528_v25 }
 0x52e   :  { %v7360_v16 = vpop.permute.xlu1 %3952  ;;  %v7362_v15 = vpop.permute.xlu0 %3943 }
 0x52f   :  { %v4537_v50 = vrot.slane %v7360_v16, %v4919_v42  ;;  %v4523_v4 = vrot.slane %v7362_v15, %v4922_v43 }
 0x531   :  { %v4524_v27 = vsel %vm1129_vm3, %v4523_v4, %v4519_v8 }
 0x532   :  { %v7391_v33 = vpop.permute.xlu1 %3961  ;;  %v7393_v60 = vpop.permute.xlu0 %3958 }
 0x533   :  { %v4551_v38 = vrot.slane %v7391_v33, %v4916_v41  ;;  %v4547_v46 = vrot.slane %v7393_v60, %v4913_v37 }
 0x535   :  { %v4552_v57 = vsel %vm1115_vm1, %v4551_v38, %v4547_v46 }
 0x536   :  { %v7415_v21 = vpop.permute.xlu1 %3964  ;;  %v7417_v61 = vpop.permute.xlu0 %3955 }
 0x537   :  { %v4556_v30 = vrot.slane %v7415_v21, %v4919_v42  ;;  %v4542_v16 = vrot.slane %v7417_v61, %v4922_v43  ;;  %v4505_v21 = vsel %vm1129_vm3, %v4504_v11, %v4500_v59  ;;  %v4538_v61 = vsel %vm1122_vm2, %v4537_v50, %v4533_v20 }
 0x538   :  { %v4623_v36 = vsel %vm1722_vm5, %v4505_v21, %v4622_v39 }
 0x539   :  { %v4557_v35 = vsel %vm1122_vm2, %v4556_v30, %v4552_v57  ;;  %v4543_v17 = vsel %vm1129_vm3, %v4542_v16, %v4538_v61  ;;  %v4624_v58 = vsel %vm1724_vm6, %v4524_v27, %v4623_v36 }
 0x53a   :  { %v7443_v26 = vpop.permute.xlu1 %3973  ;;  %v7445_v62 = vpop.permute.xlu0 %3970  ;;  %v4625_v7 = vsel %vm1726_vm7, %v4543_v17, %v4624_v58 }
 0x53b   :  { %v4570_v15 = vrot.slane %v7443_v26, %v4916_v41  ;;  %v4566_v32 = vrot.slane %v7445_v62, %v4913_v37 }
 0x53d   :  { %v4571_v23 = vsel %vm1115_vm1, %v4570_v15, %v4566_v32 }
 0x53e   :  { %v3977_v29 = vpop.permute.xlu1 %3976  ;;  %v3968_v34 = vpop.permute.xlu0 %3967 }
 0x53f   :  { %v4575_v33 = vrot.slane %v3977_v29, %v4919_v42  ;;  %v4561_v60 = vrot.slane %v3968_v34, %v4922_v43 }
 0x541   :  { %v4576_v6 = vsel %vm1122_vm2, %v4575_v33, %v4571_v23 }
 0x542   :  { %v3986_v12 = vpop.permute.xlu1 %3985  ;;  %v3983_v19 = vpop.permute.xlu0 %3982 }
 0x543   :  { %v4589_v26 = vrot.slane %v3986_v12, %v4916_v41  ;;  %v4585_v62 = vrot.slane %v3983_v19, %v4913_v37  ;;  %v4562_v41 = vsel %vm1129_vm3, %v4561_v60, %v4557_v35  ;;  %v3191_v37 = vsel %vm1732_vm10, %v3163_v40, %v3190_v3 }
 0x544   :  { %v4626_v5 = vsel %vm1728_vm8, %v4562_v41, %v4625_v7  ;;  %v3199_v24 = vadd.f32 %v3191_v37, %v1762_v48 }
 0x546   :  { %v3989_v49 = vpop.permute.xlu1 %3988  ;;  %v3980_v53 = vpop.permute.xlu0 %3979 }
 0x547   :  { %v4580_v13 = vrot.slane %v3980_v53, %v4922_v43  ;;  %v4594_v14 = vrot.slane %v3989_v49, %v4919_v42  ;;  %v4590_v42 = vsel %vm1115_vm1, %v4589_v26, %v4585_v62 }
 0x549   :  { %v4581_v56 = vsel %vm1129_vm3, %v4580_v13, %v4576_v6  ;;  %v4595_v28 = vsel %vm1122_vm2, %v4594_v14, %v4590_v42 }
 0x54a   :  { %v3992_v10 = vpop.permute.xlu0 %3991  ;;  %v4627_v29 = vsel %vm1730_vm9, %v4581_v56, %v4626_v5 }
 0x54b   :  { %v4599_v0 = vrot.slane %v3992_v10, %v4922_v43 }
 0x54d   :  { %v4600_v34 = vsel %vm1129_vm3, %v4599_v0, %v4595_v28 }
 0x54e   :  { %v4628_v63 = vsel %vm1732_vm10, %v4600_v34, %v4627_v29 }
 0x54f   :  { %v4636_v54 = vadd.f32 %v4628_v63, %v3199_v24 }
 0x551   :  { %4641 = vst.msk [vmem:[#allocation2 + $0x18] sm:$0xff] %vm4637_vm11, %v4636_v54 }
 0x552   :  { %4712 = shalt.err (!%p4709_p4)
}
 0x553   :  { %s4725_s5 = smov 128   ;;  %s4726_s6 = smov 8  }
 0x554   :  { %4653 = dma.vmem_to_hbm [thread:$0]  %s4648_s30, 512, %s7550_s3, [#allocation3], %s4725_s5, %s4725_s5, %s4726_s6  }
 0x555   :  { %4721 = dma.done.wait [#allocation3], 512  }
 0x556   :  { %4722 = vsyncadd [#allocation3], 4294966784 }
 0x557   :  { %4657 = vsyncpa [#allocation3], 1 }

</bundles_post_ra>
